<compile_context>
chip_gen: v6e
topology: v6e:2x2x1
jax: 0.10.0
libtpu: 0.0.40
codegen_flags: <defaults>
</compile_context>

<pallas_src>
import functools

import jax
import jax.numpy as jnp
from jax.experimental import pallas as pl
from jax.experimental.pallas import tpu as pltpu

EPS = 1e-5  # nn.InstanceNorm2d default

_TAPS = tuple((dy, dx) for dy in range(3) for dx in range(3))  # tap t = dy*3+dx


def _make_encoder_kernel(shapes):
    """Build the fused encoder kernel.

    shapes: tuple of (H, W, Cin, Cout, resize) per block (static).
    Kernel ref order:
        x_ref,                              # (1, H0, W0, Cin0)  NHWC input tile
        [w_i, gamma_i, beta_i] * n_blocks,  # (9*Cin_i, Cout_i), (1, Cout_i), (1, Cout_i)
        [skip_i] * n_blocks,                # (1, Cout_i, H_i*W_i)  channel-major out
        [pad_i, im2col_i, (act_i if resize)] * n_blocks   # VMEM scratch
    """
    n_blocks = len(shapes)

    def kernel(*refs):
        x_ref = refs[0]
        param_refs = refs[1:1 + 3 * n_blocks]
        skip_refs = refs[1 + 3 * n_blocks:1 + 4 * n_blocks]
        scratch_refs = refs[1 + 4 * n_blocks:]

        s = 0
        cur = x_ref[0]  # (H0, W0, Cin0) NHWC value for block 0
        for i, (H, W, Cin, Cout, resize) in enumerate(shapes):
            w_ref = param_refs[3 * i + 0]      # (9*Cin, Cout)
            g_ref = param_refs[3 * i + 1]      # (1, Cout)
            be_ref = param_refs[3 * i + 2]     # (1, Cout)
            pad_ref = scratch_refs[s]; s += 1  # (H+2, W+2, Cin)
            im_ref = scratch_refs[s]; s += 1   # (H*W, 9*Cin)
            act_ref = None
            if resize:
                act_ref = scratch_refs[s]; s += 1  # (H, W, Cout)

            # Zero padding (padding=1). Scratch is re-zeroed every grid step so
            # the halo stays 0 under megacore grid partitioning.
            pad_ref[...] = jnp.zeros_like(pad_ref)
            pad_ref[1:H + 1, 1:W + 1, :] = cur

            # im2col: build a single (H*W, 9*Cin) LHS -> one MXU matmul with
            # K = 9*Cin instead of 9 tiny K=Cin matmuls.
            for t, (dy, dx) in enumerate(_TAPS):
                patch = pad_ref[dy:dy + H, dx:dx + W, :]            # (H, W, Cin)
                im_ref[:, t * Cin:(t + 1) * Cin] = patch.reshape(H * W, Cin)

            acc = jnp.dot(im_ref[...], w_ref[...],
                          preferred_element_type=jnp.float32)       # (H*W, Cout)
            # Conv bias omitted on purpose: InstanceNorm mean-subtraction
            # cancels any per-channel constant exactly.

            # InstanceNorm2d (biased variance, eps=1e-5) + affine + ReLU (f32).
            mean = jnp.mean(acc, axis=0, keepdims=True)
            cent = acc - mean
            var = jnp.mean(cent * cent, axis=0, keepdims=True)
            y = cent * jax.lax.rsqrt(var + EPS)
            y = y * g_ref[0] + be_ref[0]
            y = jnp.maximum(y, 0.0)                                  # (H*W, Cout)

            # Skip output already transposed to channel-major (NCHW-flat), so
            # the wrapper only needs a free reshape (no XLA transpose).
            skip_refs[i][...] = y.T.reshape(1, Cout, H * W)

            if resize:
                # F.interpolate(scale_factor=0.5, mode='nearest') == pick even
                # rows / cols: strided read from the full-res activation.
                act_ref[...] = y.reshape(H, W, Cout)
                cur = act_ref[pl.ds(0, H // 2, 2), pl.ds(0, W // 2, 2), :]

    return kernel


def init_encoder_params(key, in_ch, out_ch):
    assert len(in_ch) == len(out_ch)
    params = []
    for i in range(len(in_ch)):
        key, kw, kb = jax.random.split(key, 3)
        fan_in = in_ch[i] * 9
        w = jax.random.normal(kw, (3, 3, in_ch[i], out_ch[i]), jnp.float32)
        w = w * (1.0 / jnp.sqrt(fan_in))
        b = 0.01 * jax.random.normal(kb, (out_ch[i],), jnp.float32)  # unused in fwd (cancelled by IN)
        gamma = jnp.ones((out_ch[i],), jnp.float32)
        beta = jnp.zeros((out_ch[i],), jnp.float32)
        params.append((w, b, gamma, beta))
    return params


def encoder_forward(x_nchw, params):
    """Reproduces Encoder.forward. Input NCHW (PyTorch); returns NCHW outputs."""
    N, C0, H0, W0 = x_nchw.shape
    x_nhwc = jnp.transpose(x_nchw, (0, 2, 3, 1)).astype(jnp.float32)

    n_blocks = len(params)
    shapes = []
    H, W, Cin = H0, W0, C0
    for i, p in enumerate(params):
        w = p[0]
        Cout = w.shape[-1]
        resize = i != n_blocks - 1
        shapes.append((H, W, Cin, Cout, resize))
        if resize:
            H, W = H // 2, W // 2
        Cin = Cout
    shapes = tuple(shapes)

    flat_inputs = [x_nhwc]
    in_specs = [pl.BlockSpec((1, H0, W0, C0), lambda n: (n, 0, 0, 0))]
    for (Hb, Wb, Ci, Co, _), p in zip(shapes, params):
        w, _b, gamma, beta = p            # conv bias dropped (no-op before IN)
        flat_inputs += [
            w.reshape(9 * Ci, Co).astype(jnp.float32),
            gamma.reshape(1, Co).astype(jnp.float32),
            beta.reshape(1, Co).astype(jnp.float32),
        ]
        in_specs += [
            pl.BlockSpec((9 * Ci, Co), lambda n: (0, 0)),
            pl.BlockSpec((1, Co), lambda n: (0, 0)),
            pl.BlockSpec((1, Co), lambda n: (0, 0)),
        ]

    out_shapes, out_specs, scratch_shapes = [], [], []
    for (Hb, Wb, Ci, Co, resize) in shapes:
        out_shapes.append(jax.ShapeDtypeStruct((N, Co, Hb * Wb), jnp.float32))
        out_specs.append(pl.BlockSpec((1, Co, Hb * Wb), lambda n: (n, 0, 0)))
        scratch_shapes.append(pltpu.VMEM((Hb + 2, Wb + 2, Ci), jnp.float32))   # padded input
        scratch_shapes.append(pltpu.VMEM((Hb * Wb, 9 * Ci), jnp.float32))      # im2col LHS
        if resize:
            scratch_shapes.append(pltpu.VMEM((Hb, Wb, Co), jnp.float32))       # full-res act for downsample

    kern = _make_encoder_kernel(shapes)

    skips_flat = pl.pallas_call(
        kern,
        out_shape=tuple(out_shapes),
        grid=(N,),
        in_specs=in_specs,
        out_specs=tuple(out_specs),
        scratch_shapes=scratch_shapes,
        compiler_params=pltpu.CompilerParams(
            dimension_semantics=("parallel",)),   # v7x: one sample per TensorCore
    )(*flat_inputs)

    # Free metadata reshapes to NCHW (no transposes).
    skips = [s.reshape(N, Co, Hb, Wb)
             for s, (Hb, Wb, Ci, Co, _) in zip(skips_flat, shapes)]
    x_out = skips[-1]   # last block has resize=False, so x == skip
    return x_out, skips


def _reference_forward(x_nchw, params):
    """Pure-JAX reference (same math) for correctness checking."""
    x = jnp.transpose(x_nchw, (0, 2, 3, 1)).astype(jnp.float32)
    n_blocks = len(params)
    skips = []
    for i, (w, _b, gamma, beta) in enumerate(params):
        y = jax.lax.conv_general_dilated(
            x, w, window_strides=(1, 1), padding="SAME",
            dimension_numbers=("NHWC", "HWIO", "NHWC"),
            precision=jax.lax.Precision.HIGHEST)
        mean = jnp.mean(y, axis=(1, 2), keepdims=True)
        var = jnp.mean((y - mean) ** 2, axis=(1, 2), keepdims=True)
        y = (y - mean) * jax.lax.rsqrt(var + EPS)
        y = y * gamma + beta
        y = jnp.maximum(y, 0.0)
        skips.append(jnp.transpose(y, (0, 3, 1, 2)))
        x = y[:, ::2, ::2, :] if i != n_blocks - 1 else y
    return jnp.transpose(x, (0, 3, 1, 2)), skips


if __name__ == "__main__":
    key = jax.random.PRNGKey(0)
    k_x, k_p = jax.random.split(key)

    # Small shapes consistent with the module: 3 blocks, batch=2, spatial=16.
    in_ch = [4, 8, 16]
    out_ch = [8, 16, 32]
    x = jax.random.normal(k_x, (2, 4, 16, 16), jnp.float32)  # NCHW

    params = init_encoder_params(k_p, in_ch, out_ch)

    fwd = jax.jit(encoder_forward)
    out, skips = fwd(x, params)
    out = jax.block_until_ready(out)
    skips = [jax.block_until_ready(s) for s in skips]

    assert out.shape == (2, 32, 4, 4), out.shape
    assert skips[0].shape == (2, 8, 16, 16)
    assert skips[1].shape == (2, 16, 8, 8)
    assert skips[2].shape == (2, 32, 4, 4)
    assert jnp.all(jnp.isfinite(out))

    # Numerical check vs. pure-JAX reference.
    ref_out, ref_skips = _reference_forward(x, params)
    err = float(jnp.max(jnp.abs(out - ref_out)))
    for s, r in zip(skips, ref_skips):
        err = max(err, float(jnp.max(jnp.abs(s - r))))
    assert err < 1e-3, f"max abs error vs reference: {err}"

    print("KERNEL_OK")
</pallas_src>

<mosaic_0001>
module attributes {stable_mosaic.version = 11 : i64} {
  func.func @kernel(%arg0: i32, %arg1: memref<1x16x16x4xf32, #tpu.memory_space<vmem>>, %arg2: memref<36x8xf32, #tpu.memory_space<vmem>>, %arg3: memref<1x8xf32, #tpu.memory_space<vmem>>, %arg4: memref<1x8xf32, #tpu.memory_space<vmem>>, %arg5: memref<72x16xf32, #tpu.memory_space<vmem>>, %arg6: memref<1x16xf32, #tpu.memory_space<vmem>>, %arg7: memref<1x16xf32, #tpu.memory_space<vmem>>, %arg8: memref<144x32xf32, #tpu.memory_space<vmem>>, %arg9: memref<1x32xf32, #tpu.memory_space<vmem>>, %arg10: memref<1x32xf32, #tpu.memory_space<vmem>>, %arg11: memref<1x8x256xf32, #tpu.memory_space<vmem>>, %arg12: memref<1x16x64xf32, #tpu.memory_space<vmem>>, %arg13: memref<1x32x16xf32, #tpu.memory_space<vmem>>, %arg14: memref<18x18x4xf32, #tpu.memory_space<vmem>>, %arg15: memref<256x36xf32, #tpu.memory_space<vmem>>, %arg16: memref<16x16x8xf32, #tpu.memory_space<vmem>>, %arg17: memref<10x10x8xf32, #tpu.memory_space<vmem>>, %arg18: memref<64x72xf32, #tpu.memory_space<vmem>>, %arg19: memref<8x8x16xf32, #tpu.memory_space<vmem>>, %arg20: memref<6x6x16xf32, #tpu.memory_space<vmem>>, %arg21: memref<16x144xf32, #tpu.memory_space<vmem>>) attributes {dimension_semantics = [#tpu.dimension_semantics<parallel>], iteration_bounds = array<i64: 2>, scalar_prefetch = 0 : i64, scratch_operands = 8 : i64, tpu.core_type = #tpu.core_type<tc>, window_params = [{transform_indices = @transform_0, window_bounds = array<i64: 1, 16, 16, 4>}, {pipeline_mode = #tpu.pipeline_mode<synchronous>, transform_indices = @transform_1, window_bounds = array<i64: 36, 8>}, {pipeline_mode = #tpu.pipeline_mode<synchronous>, transform_indices = @transform_2, window_bounds = array<i64: 1, 8>}, {pipeline_mode = #tpu.pipeline_mode<synchronous>, transform_indices = @transform_3, window_bounds = array<i64: 1, 8>}, {pipeline_mode = #tpu.pipeline_mode<synchronous>, transform_indices = @transform_4, window_bounds = array<i64: 72, 16>}, {pipeline_mode = #tpu.pipeline_mode<synchronous>, transform_indices = @transform_5, window_bounds = array<i64: 1, 16>}, {pipeline_mode = #tpu.pipeline_mode<synchronous>, transform_indices = @transform_6, window_bounds = array<i64: 1, 16>}, {pipeline_mode = #tpu.pipeline_mode<synchronous>, transform_indices = @transform_7, window_bounds = array<i64: 144, 32>}, {pipeline_mode = #tpu.pipeline_mode<synchronous>, transform_indices = @transform_8, window_bounds = array<i64: 1, 32>}, {pipeline_mode = #tpu.pipeline_mode<synchronous>, transform_indices = @transform_9, window_bounds = array<i64: 1, 32>}, {transform_indices = @transform_10, window_bounds = array<i64: 1, 8, 256>}, {transform_indices = @transform_11, window_bounds = array<i64: 1, 16, 64>}, {transform_indices = @transform_12, window_bounds = array<i64: 1, 32, 16>}]} {
    %c0 = arith.constant 0 : index
    %c0_0 = arith.constant 0 : index
    %c0_1 = arith.constant 0 : index
    %c0_2 = arith.constant 0 : index
    %0 = vector.load %arg1[%c0, %c0_0, %c0_1, %c0_2] : memref<1x16x16x4xf32, #tpu.memory_space<vmem>>, vector<1x16x16x4xf32>
    %1 = vector.shape_cast %0 : vector<1x16x16x4xf32> to vector<16x16x4xf32>
    %cst = arith.constant 0.000000e+00 : f32
    %2 = vector.broadcast %cst : f32 to vector<18x18x4xf32>
    %c0_3 = arith.constant 0 : index
    %c0_4 = arith.constant 0 : index
    %c0_5 = arith.constant 0 : index
    %3 = vector.load %arg14[%c0_3, %c0_4, %c0_5] : memref<18x18x4xf32, #tpu.memory_space<vmem>>, vector<18x18x4xf32>
    tpu.vector_store %arg14[%c0_3, %c0_4, %c0_5], %2 {strides = array<i32>} : memref<18x18x4xf32, #tpu.memory_space<vmem>>, vector<18x18x4xf32>,
    %c1 = arith.constant 1 : index
    %c1_6 = arith.constant 1 : index
    %c0_7 = arith.constant 0 : index
    %4 = vector.load %arg14[%c1, %c1_6, %c0_7] : memref<18x18x4xf32, #tpu.memory_space<vmem>>, vector<16x16x4xf32>
    tpu.vector_store %arg14[%c1, %c1_6, %c0_7], %1 {strides = array<i32>} : memref<18x18x4xf32, #tpu.memory_space<vmem>>, vector<16x16x4xf32>,
    %c0_8 = arith.constant 0 : index
    %c0_9 = arith.constant 0 : index
    %c0_10 = arith.constant 0 : index
    %5 = vector.load %arg14[%c0_8, %c0_9, %c0_10] : memref<18x18x4xf32, #tpu.memory_space<vmem>>, vector<16x16x4xf32>
    %6 = vector.shape_cast %5 : vector<16x16x4xf32> to vector<256x4xf32>
    %c0_11 = arith.constant 0 : index
    %c0_12 = arith.constant 0 : index
    %7 = vector.load %arg15[%c0_11, %c0_12] : memref<256x36xf32, #tpu.memory_space<vmem>>, vector<256x4xf32>
    tpu.vector_store %arg15[%c0_11, %c0_12], %6 {strides = array<i32>} : memref<256x36xf32, #tpu.memory_space<vmem>>, vector<256x4xf32>,
    %c0_13 = arith.constant 0 : index
    %c1_14 = arith.constant 1 : index
    %c0_15 = arith.constant 0 : index
    %8 = vector.load %arg14[%c0_13, %c1_14, %c0_15] : memref<18x18x4xf32, #tpu.memory_space<vmem>>, vector<16x16x4xf32>
    %9 = vector.shape_cast %8 : vector<16x16x4xf32> to vector<256x4xf32>
    %c0_16 = arith.constant 0 : index
    %c4 = arith.constant 4 : index
    %10 = vector.load %arg15[%c0_16, %c4] : memref<256x36xf32, #tpu.memory_space<vmem>>, vector<256x4xf32>
    tpu.vector_store %arg15[%c0_16, %c4], %9 {strides = array<i32>} : memref<256x36xf32, #tpu.memory_space<vmem>>, vector<256x4xf32>,
    %c0_17 = arith.constant 0 : index
    %c2 = arith.constant 2 : index
    %c0_18 = arith.constant 0 : index
    %11 = vector.load %arg14[%c0_17, %c2, %c0_18] : memref<18x18x4xf32, #tpu.memory_space<vmem>>, vector<16x16x4xf32>
    %12 = vector.shape_cast %11 : vector<16x16x4xf32> to vector<256x4xf32>
    %c0_19 = arith.constant 0 : index
    %c8 = arith.constant 8 : index
    %13 = vector.load %arg15[%c0_19, %c8] : memref<256x36xf32, #tpu.memory_space<vmem>>, vector<256x4xf32>
    tpu.vector_store %arg15[%c0_19, %c8], %12 {strides = array<i32>} : memref<256x36xf32, #tpu.memory_space<vmem>>, vector<256x4xf32>,
    %c1_20 = arith.constant 1 : index
    %c0_21 = arith.constant 0 : index
    %c0_22 = arith.constant 0 : index
    %14 = vector.load %arg14[%c1_20, %c0_21, %c0_22] : memref<18x18x4xf32, #tpu.memory_space<vmem>>, vector<16x16x4xf32>
    %15 = vector.shape_cast %14 : vector<16x16x4xf32> to vector<256x4xf32>
    %c0_23 = arith.constant 0 : index
    %c12 = arith.constant 12 : index
    %16 = vector.load %arg15[%c0_23, %c12] : memref<256x36xf32, #tpu.memory_space<vmem>>, vector<256x4xf32>
    tpu.vector_store %arg15[%c0_23, %c12], %15 {strides = array<i32>} : memref<256x36xf32, #tpu.memory_space<vmem>>, vector<256x4xf32>,
    %c1_24 = arith.constant 1 : index
    %c1_25 = arith.constant 1 : index
    %c0_26 = arith.constant 0 : index
    %17 = vector.load %arg14[%c1_24, %c1_25, %c0_26] : memref<18x18x4xf32, #tpu.memory_space<vmem>>, vector<16x16x4xf32>
    %18 = vector.shape_cast %17 : vector<16x16x4xf32> to vector<256x4xf32>
    %c0_27 = arith.constant 0 : index
    %c16 = arith.constant 16 : index
    %19 = vector.load %arg15[%c0_27, %c16] : memref<256x36xf32, #tpu.memory_space<vmem>>, vector<256x4xf32>
    tpu.vector_store %arg15[%c0_27, %c16], %18 {strides = array<i32>} : memref<256x36xf32, #tpu.memory_space<vmem>>, vector<256x4xf32>,
    %c1_28 = arith.constant 1 : index
    %c2_29 = arith.constant 2 : index
    %c0_30 = arith.constant 0 : index
    %20 = vector.load %arg14[%c1_28, %c2_29, %c0_30] : memref<18x18x4xf32, #tpu.memory_space<vmem>>, vector<16x16x4xf32>
    %21 = vector.shape_cast %20 : vector<16x16x4xf32> to vector<256x4xf32>
    %c0_31 = arith.constant 0 : index
    %c20 = arith.constant 20 : index
    %22 = vector.load %arg15[%c0_31, %c20] : memref<256x36xf32, #tpu.memory_space<vmem>>, vector<256x4xf32>
    tpu.vector_store %arg15[%c0_31, %c20], %21 {strides = array<i32>} : memref<256x36xf32, #tpu.memory_space<vmem>>, vector<256x4xf32>,
    %c2_32 = arith.constant 2 : index
    %c0_33 = arith.constant 0 : index
    %c0_34 = arith.constant 0 : index
    %23 = vector.load %arg14[%c2_32, %c0_33, %c0_34] : memref<18x18x4xf32, #tpu.memory_space<vmem>>, vector<16x16x4xf32>
    %24 = vector.shape_cast %23 : vector<16x16x4xf32> to vector<256x4xf32>
    %c0_35 = arith.constant 0 : index
    %c24 = arith.constant 24 : index
    %25 = vector.load %arg15[%c0_35, %c24] : memref<256x36xf32, #tpu.memory_space<vmem>>, vector<256x4xf32>
    tpu.vector_store %arg15[%c0_35, %c24], %24 {strides = array<i32>} : memref<256x36xf32, #tpu.memory_space<vmem>>, vector<256x4xf32>,
    %c2_36 = arith.constant 2 : index
    %c1_37 = arith.constant 1 : index
    %c0_38 = arith.constant 0 : index
    %26 = vector.load %arg14[%c2_36, %c1_37, %c0_38] : memref<18x18x4xf32, #tpu.memory_space<vmem>>, vector<16x16x4xf32>
    %27 = vector.shape_cast %26 : vector<16x16x4xf32> to vector<256x4xf32>
    %c0_39 = arith.constant 0 : index
    %c28 = arith.constant 28 : index
    %28 = vector.load %arg15[%c0_39, %c28] : memref<256x36xf32, #tpu.memory_space<vmem>>, vector<256x4xf32>
    tpu.vector_store %arg15[%c0_39, %c28], %27 {strides = array<i32>} : memref<256x36xf32, #tpu.memory_space<vmem>>, vector<256x4xf32>,
    %c2_40 = arith.constant 2 : index
    %c2_41 = arith.constant 2 : index
    %c0_42 = arith.constant 0 : index
    %29 = vector.load %arg14[%c2_40, %c2_41, %c0_42] : memref<18x18x4xf32, #tpu.memory_space<vmem>>, vector<16x16x4xf32>
    %30 = vector.shape_cast %29 : vector<16x16x4xf32> to vector<256x4xf32>
    %c0_43 = arith.constant 0 : index
    %c32 = arith.constant 32 : index
    %31 = vector.load %arg15[%c0_43, %c32] : memref<256x36xf32, #tpu.memory_space<vmem>>, vector<256x4xf32>
    tpu.vector_store %arg15[%c0_43, %c32], %30 {strides = array<i32>} : memref<256x36xf32, #tpu.memory_space<vmem>>, vector<256x4xf32>,
    %c0_44 = arith.constant 0 : index
    %c0_45 = arith.constant 0 : index
    %32 = vector.load %arg15[%c0_44, %c0_45] : memref<256x36xf32, #tpu.memory_space<vmem>>, vector<256x36xf32>
    %c0_46 = arith.constant 0 : index
    %c0_47 = arith.constant 0 : index
    %33 = vector.load %arg2[%c0_46, %c0_47] : memref<36x8xf32, #tpu.memory_space<vmem>>, vector<36x8xf32>
    %cst_48 = arith.constant dense<0.000000e+00> : vector<256x8xf32>
    %34 = tpu.matmul %32, %33, %cst_48 {dimension_numbers = #tpu.dot_dimension_numbers<[1], [0], [0], [1], [0, 0, 1, 1], [], []>} : vector<256x36xf32>, vector<36x8xf32>, vector<256x8xf32> -> vector<256x8xf32>
    %cst_49 = arith.constant dense<0.000000e+00> : vector<8xf32>
    %35 = vector.multi_reduction <add>, %34, %cst_49 [0] : vector<256x8xf32> to vector<8xf32>
    %36 = vector.shape_cast %35 : vector<8xf32> to vector<1x8xf32>
    %cst_50 = arith.constant 2.560000e+02 : f32
    %37 = vector.broadcast %cst_50 : f32 to vector<1x8xf32>
    %38 = arith.divf %36, %37 : vector<1x8xf32>
    %39 = vector.broadcast %38 : vector<1x8xf32> to vector<256x8xf32>
    %40 = arith.subf %34, %39 : vector<256x8xf32>
    %41 = arith.mulf %40, %40 : vector<256x8xf32>
    %cst_51 = arith.constant dense<0.000000e+00> : vector<8xf32>
    %42 = vector.multi_reduction <add>, %41, %cst_51 [0] : vector<256x8xf32> to vector<8xf32>
    %43 = vector.shape_cast %42 : vector<8xf32> to vector<1x8xf32>
    %cst_52 = arith.constant 2.560000e+02 : f32
    %44 = vector.broadcast %cst_52 : f32 to vector<1x8xf32>
    %45 = arith.divf %43, %44 : vector<1x8xf32>
    %cst_53 = arith.constant 9.99999974E-6 : f32
    %46 = vector.broadcast %cst_53 : f32 to vector<1x8xf32>
    %47 = arith.addf %45, %46 : vector<1x8xf32>
    %48 = math.rsqrt %47 : vector<1x8xf32>
    %49 = vector.broadcast %48 : vector<1x8xf32> to vector<256x8xf32>
    %50 = arith.mulf %40, %49 : vector<256x8xf32>
    %c0_54 = arith.constant 0 : index
    %c0_55 = arith.constant 0 : index
    %51 = vector.load %arg3[%c0_54, %c0_55] : memref<1x8xf32, #tpu.memory_space<vmem>>, vector<1x8xf32>
    %52 = vector.shape_cast %51 : vector<1x8xf32> to vector<8xf32>
    %53 = vector.shape_cast %52 : vector<8xf32> to vector<1x8xf32>
    %54 = vector.broadcast %53 : vector<1x8xf32> to vector<256x8xf32>
    %55 = arith.mulf %50, %54 : vector<256x8xf32>
    %c0_56 = arith.constant 0 : index
    %c0_57 = arith.constant 0 : index
    %56 = vector.load %arg4[%c0_56, %c0_57] : memref<1x8xf32, #tpu.memory_space<vmem>>, vector<1x8xf32>
    %57 = vector.shape_cast %56 : vector<1x8xf32> to vector<8xf32>
    %58 = vector.shape_cast %57 : vector<8xf32> to vector<1x8xf32>
    %59 = vector.broadcast %58 : vector<1x8xf32> to vector<256x8xf32>
    %60 = arith.addf %55, %59 : vector<256x8xf32>
    %cst_58 = arith.constant 0.000000e+00 : f32
    %61 = vector.broadcast %cst_58 : f32 to vector<256x8xf32>
    %62 = arith.maximumf %60, %61 : vector<256x8xf32>
    %63 = tpu.transpose %62, [1, 0] : vector<256x8xf32> -> vector<8x256xf32>
    %64 = vector.shape_cast %63 : vector<8x256xf32> to vector<1x8x256xf32>
    %c0_59 = arith.constant 0 : index
    %c0_60 = arith.constant 0 : index
    %c0_61 = arith.constant 0 : index
    %65 = vector.load %arg11[%c0_59, %c0_60, %c0_61] : memref<1x8x256xf32, #tpu.memory_space<vmem>>, vector<1x8x256xf32>
    tpu.vector_store %arg11[%c0_59, %c0_60, %c0_61], %64 {strides = array<i32>} : memref<1x8x256xf32, #tpu.memory_space<vmem>>, vector<1x8x256xf32>,
    %66 = vector.shape_cast %62 : vector<256x8xf32> to vector<16x16x8xf32>
    %c0_62 = arith.constant 0 : index
    %c0_63 = arith.constant 0 : index
    %c0_64 = arith.constant 0 : index
    %67 = vector.load %arg16[%c0_62, %c0_63, %c0_64] : memref<16x16x8xf32, #tpu.memory_space<vmem>>, vector<16x16x8xf32>
    tpu.vector_store %arg16[%c0_62, %c0_63, %c0_64], %66 {strides = array<i32>} : memref<16x16x8xf32, #tpu.memory_space<vmem>>, vector<16x16x8xf32>,
    %c0_65 = arith.constant 0 : index
    %c0_66 = arith.constant 0 : index
    %c0_67 = arith.constant 0 : index
    %68 = tpu.strided_load %arg16[%c0_65, %c0_66, %c0_67] {strides = array<i32: 2, 2, 1>} : memref<16x16x8xf32, #tpu.memory_space<vmem>>, vector<8x8x8xf32>
    %cst_68 = arith.constant 0.000000e+00 : f32
    %69 = vector.broadcast %cst_68 : f32 to vector<10x10x8xf32>
    %c0_69 = arith.constant 0 : index
    %c0_70 = arith.constant 0 : index
    %c0_71 = arith.constant 0 : index
    %70 = vector.load %arg17[%c0_69, %c0_70, %c0_71] : memref<10x10x8xf32, #tpu.memory_space<vmem>>, vector<10x10x8xf32>
    tpu.vector_store %arg17[%c0_69, %c0_70, %c0_71], %69 {strides = array<i32>} : memref<10x10x8xf32, #tpu.memory_space<vmem>>, vector<10x10x8xf32>,
    %c1_72 = arith.constant 1 : index
    %c1_73 = arith.constant 1 : index
    %c0_74 = arith.constant 0 : index
    %71 = vector.load %arg17[%c1_72, %c1_73, %c0_74] : memref<10x10x8xf32, #tpu.memory_space<vmem>>, vector<8x8x8xf32>
    tpu.vector_store %arg17[%c1_72, %c1_73, %c0_74], %68 {strides = array<i32>} : memref<10x10x8xf32, #tpu.memory_space<vmem>>, vector<8x8x8xf32>,
    %c0_75 = arith.constant 0 : index
    %c0_76 = arith.constant 0 : index
    %c0_77 = arith.constant 0 : index
    %72 = vector.load %arg17[%c0_75, %c0_76, %c0_77] : memref<10x10x8xf32, #tpu.memory_space<vmem>>, vector<8x8x8xf32>
    %73 = vector.shape_cast %72 : vector<8x8x8xf32> to vector<64x8xf32>
    %c0_78 = arith.constant 0 : index
    %c0_79 = arith.constant 0 : index
    %74 = vector.load %arg18[%c0_78, %c0_79] : memref<64x72xf32, #tpu.memory_space<vmem>>, vector<64x8xf32>
    tpu.vector_store %arg18[%c0_78, %c0_79], %73 {strides = array<i32>} : memref<64x72xf32, #tpu.memory_space<vmem>>, vector<64x8xf32>,
    %c0_80 = arith.constant 0 : index
    %c1_81 = arith.constant 1 : index
    %c0_82 = arith.constant 0 : index
    %75 = vector.load %arg17[%c0_80, %c1_81, %c0_82] : memref<10x10x8xf32, #tpu.memory_space<vmem>>, vector<8x8x8xf32>
    %76 = vector.shape_cast %75 : vector<8x8x8xf32> to vector<64x8xf32>
    %c0_83 = arith.constant 0 : index
    %c8_84 = arith.constant 8 : index
    %77 = vector.load %arg18[%c0_83, %c8_84] : memref<64x72xf32, #tpu.memory_space<vmem>>, vector<64x8xf32>
    tpu.vector_store %arg18[%c0_83, %c8_84], %76 {strides = array<i32>} : memref<64x72xf32, #tpu.memory_space<vmem>>, vector<64x8xf32>,
    %c0_85 = arith.constant 0 : index
    %c2_86 = arith.constant 2 : index
    %c0_87 = arith.constant 0 : index
    %78 = vector.load %arg17[%c0_85, %c2_86, %c0_87] : memref<10x10x8xf32, #tpu.memory_space<vmem>>, vector<8x8x8xf32>
    %79 = vector.shape_cast %78 : vector<8x8x8xf32> to vector<64x8xf32>
    %c0_88 = arith.constant 0 : index
    %c16_89 = arith.constant 16 : index
    %80 = vector.load %arg18[%c0_88, %c16_89] : memref<64x72xf32, #tpu.memory_space<vmem>>, vector<64x8xf32>
    tpu.vector_store %arg18[%c0_88, %c16_89], %79 {strides = array<i32>} : memref<64x72xf32, #tpu.memory_space<vmem>>, vector<64x8xf32>,
    %c1_90 = arith.constant 1 : index
    %c0_91 = arith.constant 0 : index
    %c0_92 = arith.constant 0 : index
    %81 = vector.load %arg17[%c1_90, %c0_91, %c0_92] : memref<10x10x8xf32, #tpu.memory_space<vmem>>, vector<8x8x8xf32>
    %82 = vector.shape_cast %81 : vector<8x8x8xf32> to vector<64x8xf32>
    %c0_93 = arith.constant 0 : index
    %c24_94 = arith.constant 24 : index
    %83 = vector.load %arg18[%c0_93, %c24_94] : memref<64x72xf32, #tpu.memory_space<vmem>>, vector<64x8xf32>
    tpu.vector_store %arg18[%c0_93, %c24_94], %82 {strides = array<i32>} : memref<64x72xf32, #tpu.memory_space<vmem>>, vector<64x8xf32>,
    %c1_95 = arith.constant 1 : index
    %c1_96 = arith.constant 1 : index
    %c0_97 = arith.constant 0 : index
    %84 = vector.load %arg17[%c1_95, %c1_96, %c0_97] : memref<10x10x8xf32, #tpu.memory_space<vmem>>, vector<8x8x8xf32>
    %85 = vector.shape_cast %84 : vector<8x8x8xf32> to vector<64x8xf32>
    %c0_98 = arith.constant 0 : index
    %c32_99 = arith.constant 32 : index
    %86 = vector.load %arg18[%c0_98, %c32_99] : memref<64x72xf32, #tpu.memory_space<vmem>>, vector<64x8xf32>
    tpu.vector_store %arg18[%c0_98, %c32_99], %85 {strides = array<i32>} : memref<64x72xf32, #tpu.memory_space<vmem>>, vector<64x8xf32>,
    %c1_100 = arith.constant 1 : index
    %c2_101 = arith.constant 2 : index
    %c0_102 = arith.constant 0 : index
    %87 = vector.load %arg17[%c1_100, %c2_101, %c0_102] : memref<10x10x8xf32, #tpu.memory_space<vmem>>, vector<8x8x8xf32>
    %88 = vector.shape_cast %87 : vector<8x8x8xf32> to vector<64x8xf32>
    %c0_103 = arith.constant 0 : index
    %c40 = arith.constant 40 : index
    %89 = vector.load %arg18[%c0_103, %c40] : memref<64x72xf32, #tpu.memory_space<vmem>>, vector<64x8xf32>
    tpu.vector_store %arg18[%c0_103, %c40], %88 {strides = array<i32>} : memref<64x72xf32, #tpu.memory_space<vmem>>, vector<64x8xf32>,
    %c2_104 = arith.constant 2 : index
    %c0_105 = arith.constant 0 : index
    %c0_106 = arith.constant 0 : index
    %90 = vector.load %arg17[%c2_104, %c0_105, %c0_106] : memref<10x10x8xf32, #tpu.memory_space<vmem>>, vector<8x8x8xf32>
    %91 = vector.shape_cast %90 : vector<8x8x8xf32> to vector<64x8xf32>
    %c0_107 = arith.constant 0 : index
    %c48 = arith.constant 48 : index
    %92 = vector.load %arg18[%c0_107, %c48] : memref<64x72xf32, #tpu.memory_space<vmem>>, vector<64x8xf32>
    tpu.vector_store %arg18[%c0_107, %c48], %91 {strides = array<i32>} : memref<64x72xf32, #tpu.memory_space<vmem>>, vector<64x8xf32>,
    %c2_108 = arith.constant 2 : index
    %c1_109 = arith.constant 1 : index
    %c0_110 = arith.constant 0 : index
    %93 = vector.load %arg17[%c2_108, %c1_109, %c0_110] : memref<10x10x8xf32, #tpu.memory_space<vmem>>, vector<8x8x8xf32>
    %94 = vector.shape_cast %93 : vector<8x8x8xf32> to vector<64x8xf32>
    %c0_111 = arith.constant 0 : index
    %c56 = arith.constant 56 : index
    %95 = vector.load %arg18[%c0_111, %c56] : memref<64x72xf32, #tpu.memory_space<vmem>>, vector<64x8xf32>
    tpu.vector_store %arg18[%c0_111, %c56], %94 {strides = array<i32>} : memref<64x72xf32, #tpu.memory_space<vmem>>, vector<64x8xf32>,
    %c2_112 = arith.constant 2 : index
    %c2_113 = arith.constant 2 : index
    %c0_114 = arith.constant 0 : index
    %96 = vector.load %arg17[%c2_112, %c2_113, %c0_114] : memref<10x10x8xf32, #tpu.memory_space<vmem>>, vector<8x8x8xf32>
    %97 = vector.shape_cast %96 : vector<8x8x8xf32> to vector<64x8xf32>
    %c0_115 = arith.constant 0 : index
    %c64 = arith.constant 64 : index
    %98 = vector.load %arg18[%c0_115, %c64] : memref<64x72xf32, #tpu.memory_space<vmem>>, vector<64x8xf32>
    tpu.vector_store %arg18[%c0_115, %c64], %97 {strides = array<i32>} : memref<64x72xf32, #tpu.memory_space<vmem>>, vector<64x8xf32>,
    %c0_116 = arith.constant 0 : index
    %c0_117 = arith.constant 0 : index
    %99 = vector.load %arg18[%c0_116, %c0_117] : memref<64x72xf32, #tpu.memory_space<vmem>>, vector<64x72xf32>
    %c0_118 = arith.constant 0 : index
    %c0_119 = arith.constant 0 : index
    %100 = vector.load %arg5[%c0_118, %c0_119] : memref<72x16xf32, #tpu.memory_space<vmem>>, vector<72x16xf32>
    %cst_120 = arith.constant dense<0.000000e+00> : vector<64x16xf32>
    %101 = tpu.matmul %99, %100, %cst_120 {dimension_numbers = #tpu.dot_dimension_numbers<[1], [0], [0], [1], [0, 0, 1, 1], [], []>} : vector<64x72xf32>, vector<72x16xf32>, vector<64x16xf32> -> vector<64x16xf32>
    %cst_121 = arith.constant dense<0.000000e+00> : vector<16xf32>
    %102 = vector.multi_reduction <add>, %101, %cst_121 [0] : vector<64x16xf32> to vector<16xf32>
    %103 = vector.shape_cast %102 : vector<16xf32> to vector<1x16xf32>
    %cst_122 = arith.constant 6.400000e+01 : f32
    %104 = vector.broadcast %cst_122 : f32 to vector<1x16xf32>
    %105 = arith.divf %103, %104 : vector<1x16xf32>
    %106 = vector.broadcast %105 : vector<1x16xf32> to vector<64x16xf32>
    %107 = arith.subf %101, %106 : vector<64x16xf32>
    %108 = arith.mulf %107, %107 : vector<64x16xf32>
    %cst_123 = arith.constant dense<0.000000e+00> : vector<16xf32>
    %109 = vector.multi_reduction <add>, %108, %cst_123 [0] : vector<64x16xf32> to vector<16xf32>
    %110 = vector.shape_cast %109 : vector<16xf32> to vector<1x16xf32>
    %cst_124 = arith.constant 6.400000e+01 : f32
    %111 = vector.broadcast %cst_124 : f32 to vector<1x16xf32>
    %112 = arith.divf %110, %111 : vector<1x16xf32>
    %cst_125 = arith.constant 9.99999974E-6 : f32
    %113 = vector.broadcast %cst_125 : f32 to vector<1x16xf32>
    %114 = arith.addf %112, %113 : vector<1x16xf32>
    %115 = math.rsqrt %114 : vector<1x16xf32>
    %116 = vector.broadcast %115 : vector<1x16xf32> to vector<64x16xf32>
    %117 = arith.mulf %107, %116 : vector<64x16xf32>
    %c0_126 = arith.constant 0 : index
    %c0_127 = arith.constant 0 : index
    %118 = vector.load %arg6[%c0_126, %c0_127] : memref<1x16xf32, #tpu.memory_space<vmem>>, vector<1x16xf32>
    %119 = vector.shape_cast %118 : vector<1x16xf32> to vector<16xf32>
    %120 = vector.shape_cast %119 : vector<16xf32> to vector<1x16xf32>
    %121 = vector.broadcast %120 : vector<1x16xf32> to vector<64x16xf32>
    %122 = arith.mulf %117, %121 : vector<64x16xf32>
    %c0_128 = arith.constant 0 : index
    %c0_129 = arith.constant 0 : index
    %123 = vector.load %arg7[%c0_128, %c0_129] : memref<1x16xf32, #tpu.memory_space<vmem>>, vector<1x16xf32>
    %124 = vector.shape_cast %123 : vector<1x16xf32> to vector<16xf32>
    %125 = vector.shape_cast %124 : vector<16xf32> to vector<1x16xf32>
    %126 = vector.broadcast %125 : vector<1x16xf32> to vector<64x16xf32>
    %127 = arith.addf %122, %126 : vector<64x16xf32>
    %cst_130 = arith.constant 0.000000e+00 : f32
    %128 = vector.broadcast %cst_130 : f32 to vector<64x16xf32>
    %129 = arith.maximumf %127, %128 : vector<64x16xf32>
    %130 = tpu.transpose %129, [1, 0] : vector<64x16xf32> -> vector<16x64xf32>
    %131 = vector.shape_cast %130 : vector<16x64xf32> to vector<1x16x64xf32>
    %c0_131 = arith.constant 0 : index
    %c0_132 = arith.constant 0 : index
    %c0_133 = arith.constant 0 : index
    %132 = vector.load %arg12[%c0_131, %c0_132, %c0_133] : memref<1x16x64xf32, #tpu.memory_space<vmem>>, vector<1x16x64xf32>
    tpu.vector_store %arg12[%c0_131, %c0_132, %c0_133], %131 {strides = array<i32>} : memref<1x16x64xf32, #tpu.memory_space<vmem>>, vector<1x16x64xf32>,
    %133 = vector.shape_cast %129 : vector<64x16xf32> to vector<8x8x16xf32>
    %c0_134 = arith.constant 0 : index
    %c0_135 = arith.constant 0 : index
    %c0_136 = arith.constant 0 : index
    %134 = vector.load %arg19[%c0_134, %c0_135, %c0_136] : memref<8x8x16xf32, #tpu.memory_space<vmem>>, vector<8x8x16xf32>
    tpu.vector_store %arg19[%c0_134, %c0_135, %c0_136], %133 {strides = array<i32>} : memref<8x8x16xf32, #tpu.memory_space<vmem>>, vector<8x8x16xf32>,
    %c0_137 = arith.constant 0 : index
    %c0_138 = arith.constant 0 : index
    %c0_139 = arith.constant 0 : index
    %135 = tpu.strided_load %arg19[%c0_137, %c0_138, %c0_139] {strides = array<i32: 2, 2, 1>} : memref<8x8x16xf32, #tpu.memory_space<vmem>>, vector<4x4x16xf32>
    %cst_140 = arith.constant 0.000000e+00 : f32
    %136 = vector.broadcast %cst_140 : f32 to vector<6x6x16xf32>
    %c0_141 = arith.constant 0 : index
    %c0_142 = arith.constant 0 : index
    %c0_143 = arith.constant 0 : index
    %137 = vector.load %arg20[%c0_141, %c0_142, %c0_143] : memref<6x6x16xf32, #tpu.memory_space<vmem>>, vector<6x6x16xf32>
    tpu.vector_store %arg20[%c0_141, %c0_142, %c0_143], %136 {strides = array<i32>} : memref<6x6x16xf32, #tpu.memory_space<vmem>>, vector<6x6x16xf32>,
    %c1_144 = arith.constant 1 : index
    %c1_145 = arith.constant 1 : index
    %c0_146 = arith.constant 0 : index
    %138 = vector.load %arg20[%c1_144, %c1_145, %c0_146] : memref<6x6x16xf32, #tpu.memory_space<vmem>>, vector<4x4x16xf32>
    tpu.vector_store %arg20[%c1_144, %c1_145, %c0_146], %135 {strides = array<i32>} : memref<6x6x16xf32, #tpu.memory_space<vmem>>, vector<4x4x16xf32>,
    %c0_147 = arith.constant 0 : index
    %c0_148 = arith.constant 0 : index
    %c0_149 = arith.constant 0 : index
    %139 = vector.load %arg20[%c0_147, %c0_148, %c0_149] : memref<6x6x16xf32, #tpu.memory_space<vmem>>, vector<4x4x16xf32>
    %140 = vector.shape_cast %139 : vector<4x4x16xf32> to vector<16x16xf32>
    %c0_150 = arith.constant 0 : index
    %c0_151 = arith.constant 0 : index
    %141 = vector.load %arg21[%c0_150, %c0_151] : memref<16x144xf32, #tpu.memory_space<vmem>>, vector<16x16xf32>
    tpu.vector_store %arg21[%c0_150, %c0_151], %140 {strides = array<i32>} : memref<16x144xf32, #tpu.memory_space<vmem>>, vector<16x16xf32>,
    %c0_152 = arith.constant 0 : index
    %c1_153 = arith.constant 1 : index
    %c0_154 = arith.constant 0 : index
    %142 = vector.load %arg20[%c0_152, %c1_153, %c0_154] : memref<6x6x16xf32, #tpu.memory_space<vmem>>, vector<4x4x16xf32>
    %143 = vector.shape_cast %142 : vector<4x4x16xf32> to vector<16x16xf32>
    %c0_155 = arith.constant 0 : index
    %c16_156 = arith.constant 16 : index
    %144 = vector.load %arg21[%c0_155, %c16_156] : memref<16x144xf32, #tpu.memory_space<vmem>>, vector<16x16xf32>
    tpu.vector_store %arg21[%c0_155, %c16_156], %143 {strides = array<i32>} : memref<16x144xf32, #tpu.memory_space<vmem>>, vector<16x16xf32>,
    %c0_157 = arith.constant 0 : index
    %c2_158 = arith.constant 2 : index
    %c0_159 = arith.constant 0 : index
    %145 = vector.load %arg20[%c0_157, %c2_158, %c0_159] : memref<6x6x16xf32, #tpu.memory_space<vmem>>, vector<4x4x16xf32>
    %146 = vector.shape_cast %145 : vector<4x4x16xf32> to vector<16x16xf32>
    %c0_160 = arith.constant 0 : index
    %c32_161 = arith.constant 32 : index
    %147 = vector.load %arg21[%c0_160, %c32_161] : memref<16x144xf32, #tpu.memory_space<vmem>>, vector<16x16xf32>
    tpu.vector_store %arg21[%c0_160, %c32_161], %146 {strides = array<i32>} : memref<16x144xf32, #tpu.memory_space<vmem>>, vector<16x16xf32>,
    %c1_162 = arith.constant 1 : index
    %c0_163 = arith.constant 0 : index
    %c0_164 = arith.constant 0 : index
    %148 = vector.load %arg20[%c1_162, %c0_163, %c0_164] : memref<6x6x16xf32, #tpu.memory_space<vmem>>, vector<4x4x16xf32>
    %149 = vector.shape_cast %148 : vector<4x4x16xf32> to vector<16x16xf32>
    %c0_165 = arith.constant 0 : index
    %c48_166 = arith.constant 48 : index
    %150 = vector.load %arg21[%c0_165, %c48_166] : memref<16x144xf32, #tpu.memory_space<vmem>>, vector<16x16xf32>
    tpu.vector_store %arg21[%c0_165, %c48_166], %149 {strides = array<i32>} : memref<16x144xf32, #tpu.memory_space<vmem>>, vector<16x16xf32>,
    %c1_167 = arith.constant 1 : index
    %c1_168 = arith.constant 1 : index
    %c0_169 = arith.constant 0 : index
    %151 = vector.load %arg20[%c1_167, %c1_168, %c0_169] : memref<6x6x16xf32, #tpu.memory_space<vmem>>, vector<4x4x16xf32>
    %152 = vector.shape_cast %151 : vector<4x4x16xf32> to vector<16x16xf32>
    %c0_170 = arith.constant 0 : index
    %c64_171 = arith.constant 64 : index
    %153 = vector.load %arg21[%c0_170, %c64_171] : memref<16x144xf32, #tpu.memory_space<vmem>>, vector<16x16xf32>
    tpu.vector_store %arg21[%c0_170, %c64_171], %152 {strides = array<i32>} : memref<16x144xf32, #tpu.memory_space<vmem>>, vector<16x16xf32>,
    %c1_172 = arith.constant 1 : index
    %c2_173 = arith.constant 2 : index
    %c0_174 = arith.constant 0 : index
    %154 = vector.load %arg20[%c1_172, %c2_173, %c0_174] : memref<6x6x16xf32, #tpu.memory_space<vmem>>, vector<4x4x16xf32>
    %155 = vector.shape_cast %154 : vector<4x4x16xf32> to vector<16x16xf32>
    %c0_175 = arith.constant 0 : index
    %c80 = arith.constant 80 : index
    %156 = vector.load %arg21[%c0_175, %c80] : memref<16x144xf32, #tpu.memory_space<vmem>>, vector<16x16xf32>
    tpu.vector_store %arg21[%c0_175, %c80], %155 {strides = array<i32>} : memref<16x144xf32, #tpu.memory_space<vmem>>, vector<16x16xf32>,
    %c2_176 = arith.constant 2 : index
    %c0_177 = arith.constant 0 : index
    %c0_178 = arith.constant 0 : index
    %157 = vector.load %arg20[%c2_176, %c0_177, %c0_178] : memref<6x6x16xf32, #tpu.memory_space<vmem>>, vector<4x4x16xf32>
    %158 = vector.shape_cast %157 : vector<4x4x16xf32> to vector<16x16xf32>
    %c0_179 = arith.constant 0 : index
    %c96 = arith.constant 96 : index
    %159 = vector.load %arg21[%c0_179, %c96] : memref<16x144xf32, #tpu.memory_space<vmem>>, vector<16x16xf32>
    tpu.vector_store %arg21[%c0_179, %c96], %158 {strides = array<i32>} : memref<16x144xf32, #tpu.memory_space<vmem>>, vector<16x16xf32>,
    %c2_180 = arith.constant 2 : index
    %c1_181 = arith.constant 1 : index
    %c0_182 = arith.constant 0 : index
    %160 = vector.load %arg20[%c2_180, %c1_181, %c0_182] : memref<6x6x16xf32, #tpu.memory_space<vmem>>, vector<4x4x16xf32>
    %161 = vector.shape_cast %160 : vector<4x4x16xf32> to vector<16x16xf32>
    %c0_183 = arith.constant 0 : index
    %c112 = arith.constant 112 : index
    %162 = vector.load %arg21[%c0_183, %c112] : memref<16x144xf32, #tpu.memory_space<vmem>>, vector<16x16xf32>
    tpu.vector_store %arg21[%c0_183, %c112], %161 {strides = array<i32>} : memref<16x144xf32, #tpu.memory_space<vmem>>, vector<16x16xf32>,
    %c2_184 = arith.constant 2 : index
    %c2_185 = arith.constant 2 : index
    %c0_186 = arith.constant 0 : index
    %163 = vector.load %arg20[%c2_184, %c2_185, %c0_186] : memref<6x6x16xf32, #tpu.memory_space<vmem>>, vector<4x4x16xf32>
    %164 = vector.shape_cast %163 : vector<4x4x16xf32> to vector<16x16xf32>
    %c0_187 = arith.constant 0 : index
    %c128 = arith.constant 128 : index
    %165 = vector.load %arg21[%c0_187, %c128] : memref<16x144xf32, #tpu.memory_space<vmem>>, vector<16x16xf32>
    tpu.vector_store %arg21[%c0_187, %c128], %164 {strides = array<i32>} : memref<16x144xf32, #tpu.memory_space<vmem>>, vector<16x16xf32>,
    %c0_188 = arith.constant 0 : index
    %c0_189 = arith.constant 0 : index
    %166 = vector.load %arg21[%c0_188, %c0_189] : memref<16x144xf32, #tpu.memory_space<vmem>>, vector<16x144xf32>
    %c0_190 = arith.constant 0 : index
    %c0_191 = arith.constant 0 : index
    %167 = vector.load %arg8[%c0_190, %c0_191] : memref<144x32xf32, #tpu.memory_space<vmem>>, vector<144x32xf32>
    %cst_192 = arith.constant dense<0.000000e+00> : vector<16x32xf32>
    %168 = tpu.matmul %166, %167, %cst_192 {dimension_numbers = #tpu.dot_dimension_numbers<[1], [0], [0], [1], [0, 0, 1, 1], [], []>} : vector<16x144xf32>, vector<144x32xf32>, vector<16x32xf32> -> vector<16x32xf32>
    %cst_193 = arith.constant dense<0.000000e+00> : vector<32xf32>
    %169 = vector.multi_reduction <add>, %168, %cst_193 [0] : vector<16x32xf32> to vector<32xf32>
    %170 = vector.shape_cast %169 : vector<32xf32> to vector<1x32xf32>
    %cst_194 = arith.constant 1.600000e+01 : f32
    %171 = vector.broadcast %cst_194 : f32 to vector<1x32xf32>
    %172 = arith.divf %170, %171 : vector<1x32xf32>
    %173 = vector.broadcast %172 : vector<1x32xf32> to vector<16x32xf32>
    %174 = arith.subf %168, %173 : vector<16x32xf32>
    %175 = arith.mulf %174, %174 : vector<16x32xf32>
    %cst_195 = arith.constant dense<0.000000e+00> : vector<32xf32>
    %176 = vector.multi_reduction <add>, %175, %cst_195 [0] : vector<16x32xf32> to vector<32xf32>
    %177 = vector.shape_cast %176 : vector<32xf32> to vector<1x32xf32>
    %cst_196 = arith.constant 1.600000e+01 : f32
    %178 = vector.broadcast %cst_196 : f32 to vector<1x32xf32>
    %179 = arith.divf %177, %178 : vector<1x32xf32>
    %cst_197 = arith.constant 9.99999974E-6 : f32
    %180 = vector.broadcast %cst_197 : f32 to vector<1x32xf32>
    %181 = arith.addf %179, %180 : vector<1x32xf32>
    %182 = math.rsqrt %181 : vector<1x32xf32>
    %183 = vector.broadcast %182 : vector<1x32xf32> to vector<16x32xf32>
    %184 = arith.mulf %174, %183 : vector<16x32xf32>
    %c0_198 = arith.constant 0 : index
    %c0_199 = arith.constant 0 : index
    %185 = vector.load %arg9[%c0_198, %c0_199] : memref<1x32xf32, #tpu.memory_space<vmem>>, vector<1x32xf32>
    %186 = vector.shape_cast %185 : vector<1x32xf32> to vector<32xf32>
    %187 = vector.shape_cast %186 : vector<32xf32> to vector<1x32xf32>
    %188 = vector.broadcast %187 : vector<1x32xf32> to vector<16x32xf32>
    %189 = arith.mulf %184, %188 : vector<16x32xf32>
    %c0_200 = arith.constant 0 : index
    %c0_201 = arith.constant 0 : index
    %190 = vector.load %arg10[%c0_200, %c0_201] : memref<1x32xf32, #tpu.memory_space<vmem>>, vector<1x32xf32>
    %191 = vector.shape_cast %190 : vector<1x32xf32> to vector<32xf32>
    %192 = vector.shape_cast %191 : vector<32xf32> to vector<1x32xf32>
    %193 = vector.broadcast %192 : vector<1x32xf32> to vector<16x32xf32>
    %194 = arith.addf %189, %193 : vector<16x32xf32>
    %cst_202 = arith.constant 0.000000e+00 : f32
    %195 = vector.broadcast %cst_202 : f32 to vector<16x32xf32>
    %196 = arith.maximumf %194, %195 : vector<16x32xf32>
    %197 = tpu.transpose %196, [1, 0] : vector<16x32xf32> -> vector<32x16xf32>
    %198 = vector.shape_cast %197 : vector<32x16xf32> to vector<1x32x16xf32>
    %c0_203 = arith.constant 0 : index
    %c0_204 = arith.constant 0 : index
    %c0_205 = arith.constant 0 : index
    %199 = vector.load %arg13[%c0_203, %c0_204, %c0_205] : memref<1x32x16xf32, #tpu.memory_space<vmem>>, vector<1x32x16xf32>
    tpu.vector_store %arg13[%c0_203, %c0_204, %c0_205], %198 {strides = array<i32>} : memref<1x32x16xf32, #tpu.memory_space<vmem>>, vector<1x32x16xf32>,
    return
  }
  func.func @transform_0(%arg0: i32) -> (i32, i32, i32, i32) {
    %c0_i32 = arith.constant 0 : i32
    %c0_i32_0 = arith.constant 0 : i32
    %c0_i32_1 = arith.constant 0 : i32
    %c0_i32_2 = arith.constant 0 : i32
    return %arg0, %c0_i32, %c0_i32_0, %c0_i32_1 : i32, i32, i32, i32
  }
  func.func @transform_1(%arg0: i32) -> (i32, i32) {
    %c0_i32 = arith.constant 0 : i32
    %c0_i32_0 = arith.constant 0 : i32
    %c0_i32_1 = arith.constant 0 : i32
    return %c0_i32, %c0_i32_0 : i32, i32
  }
  func.func @transform_2(%arg0: i32) -> (i32, i32) {
    %c0_i32 = arith.constant 0 : i32
    %c0_i32_0 = arith.constant 0 : i32
    %c0_i32_1 = arith.constant 0 : i32
    return %c0_i32, %c0_i32_0 : i32, i32
  }
  func.func @transform_3(%arg0: i32) -> (i32, i32) {
    %c0_i32 = arith.constant 0 : i32
    %c0_i32_0 = arith.constant 0 : i32
    %c0_i32_1 = arith.constant 0 : i32
    return %c0_i32, %c0_i32_0 : i32, i32
  }
  func.func @transform_4(%arg0: i32) -> (i32, i32) {
    %c0_i32 = arith.constant 0 : i32
    %c0_i32_0 = arith.constant 0 : i32
    %c0_i32_1 = arith.constant 0 : i32
    return %c0_i32, %c0_i32_0 : i32, i32
  }
  func.func @transform_5(%arg0: i32) -> (i32, i32) {
    %c0_i32 = arith.constant 0 : i32
    %c0_i32_0 = arith.constant 0 : i32
    %c0_i32_1 = arith.constant 0 : i32
    return %c0_i32, %c0_i32_0 : i32, i32
  }
  func.func @transform_6(%arg0: i32) -> (i32, i32) {
    %c0_i32 = arith.constant 0 : i32
    %c0_i32_0 = arith.constant 0 : i32
    %c0_i32_1 = arith.constant 0 : i32
    return %c0_i32, %c0_i32_0 : i32, i32
  }
  func.func @transform_7(%arg0: i32) -> (i32, i32) {
    %c0_i32 = arith.constant 0 : i32
    %c0_i32_0 = arith.constant 0 : i32
    %c0_i32_1 = arith.constant 0 : i32
    return %c0_i32, %c0_i32_0 : i32, i32
  }
  func.func @transform_8(%arg0: i32) -> (i32, i32) {
    %c0_i32 = arith.constant 0 : i32
    %c0_i32_0 = arith.constant 0 : i32
    %c0_i32_1 = arith.constant 0 : i32
    return %c0_i32, %c0_i32_0 : i32, i32
  }
  func.func @transform_9(%arg0: i32) -> (i32, i32) {
    %c0_i32 = arith.constant 0 : i32
    %c0_i32_0 = arith.constant 0 : i32
    %c0_i32_1 = arith.constant 0 : i32
    return %c0_i32, %c0_i32_0 : i32, i32
  }
  func.func @transform_10(%arg0: i32) -> (i32, i32, i32) {
    %c0_i32 = arith.constant 0 : i32
    %c0_i32_0 = arith.constant 0 : i32
    %c0_i32_1 = arith.constant 0 : i32
    return %arg0, %c0_i32, %c0_i32_0 : i32, i32, i32
  }
  func.func @transform_11(%arg0: i32) -> (i32, i32, i32) {
    %c0_i32 = arith.constant 0 : i32
    %c0_i32_0 = arith.constant 0 : i32
    %c0_i32_1 = arith.constant 0 : i32
    return %arg0, %c0_i32, %c0_i32_0 : i32, i32, i32
  }
  func.func @transform_12(%arg0: i32) -> (i32, i32, i32) {
    %c0_i32 = arith.constant 0 : i32
    %c0_i32_0 = arith.constant 0 : i32
    %c0_i32_1 = arith.constant 0 : i32
    return %arg0, %c0_i32, %c0_i32_0 : i32, i32, i32
  }
}

</mosaic_0001>

<bundles_post_ra>
// kernel: encoder_forward.1
= control target key start
LH: loop header
LB: loop body
LE: loop exit
PB: predicated region body
PF: predicated region fallthrough
CT: control target
= control target key end

     0   :  { %s4573_s21 = smov 0   ;;  %s6636_s0 = inlined_call_operand.vmem [shape: f32[2,16,16,4], index: 0, kind: input, shape index: {}]   ;;  %s6637_s1 = inlined_call_operand.vmem [shape: f32[36,8], index: 1, kind: input, shape index: {}]   ;;  %s6638_s2 = inlined_call_operand.vmem [shape: f32[1,8], index: 2, kind: input, shape index: {}]   ;;  %s6639_s3 = inlined_call_operand.vmem [shape: f32[1,8], index: 3, kind: input, shape index: {}]   ;;  %s6640_s4 = inlined_call_operand.vmem [shape: f32[72,16], index: 4, kind: input, shape index: {}]   ;;  %s6641_s5 = inlined_call_operand.vmem [shape: f32[1,16], index: 5, kind: input, shape index: {}]   ;;  %s6642_s6 = inlined_call_operand.vmem [shape: f32[1,16], index: 6, kind: input, shape index: {}]   ;;  %s6643_s7 = inlined_call_operand.vmem [shape: f32[144,32], index: 7, kind: input, shape index: {}]   ;;  %s6644_s8 = inlined_call_operand.vmem [shape: f32[1,32], index: 8, kind: input, shape index: {}]   ;;  %s6645_s9 = inlined_call_operand.vmem [shape: f32[1,32], index: 9, kind: input, shape index: {}]   ;;  %s6646_s10 = inlined_call_operand.vmem [shape: f32[2,8,256], index: 10, kind: output, shape index: {0}]   ;;  %s6647_s11 = inlined_call_operand.vmem [shape: f32[2,16,64], index: 11, kind: output, shape index: {1}]   ;;  %s6648_s12 = inlined_call_operand.vmem [shape: f32[2,32,16], index: 12, kind: output, shape index: {2}]  }
   0x1 LB: > { %s4226_s22 = sadd.s32 4294967295, %s4490_s21   ;;  %p4230_p0 = scmp.ge.s32.totalorder %s4490_s21, 1  ;;  %s4490_s21 = sphi %s4573_s21, %s23_s21  }
   0x2   : > { %p367_p1 = scmp.lt.s32.totalorder %s4490_s21, 3 }
   0x4   : > { %p368_p2 = pnand %p4230_p0, %p367_p1 }
   0x5   : > { %p419_p3 = scmp.lt.s32.totalorder (!%p368_p2), %s4226_s22, 1  ;;  %s4493_s27 = smov (!%p368_p2), 8  }
   0x6   : > { %371 = sbr.rel (%p368_p2) target bundleno = 2098 (0x832), region = 60  ;;  %s4494_s28 = smov (!%p368_p2), 4  }
   0x7   : > { %s4495_s29 = smov (!%p368_p2), 12   ;;  %s4496_s30 = smov (!%p368_p2), 16  }
   0x8   : > { %s4497_s13 = smov (!%p368_p2), 20   ;;  %s4498_s14 = smov (!%p368_p2), 24  }
   0x9   : > { %s4499_s15 = smov (!%p368_p2), 28   ;;  %s4500_s16 = smov (!%p368_p2), 32  }
   0xa   : > { %s4504_s18 = smov (!%p368_p2), 64   ;;  %s4505_s20 = smov (!%p368_p2), 80  }
   0xb   : > { %vm471_vm0 = vcmask 31744   ;;  %vm474_vm1 = vcmask 25600   ;;  %v4492_v0 = vmov 0.0   ;;  %s6694_s22 = smov (!%p419_p3, %s4226_s22), 1  ;;  %v2205_v36 = vld [vmem:[%s6637_s1 + $0x20] sm:$0xf] }
   0xc   : > { %472 = vst.msk [vmem:[#allocation2] sm:$0xff] %vm471_vm0, %v4492_v0  ;;  %473 = vst.msk [vmem:[#allocation2 + $0x8] sm:$0xff] %vm471_vm0, %v4492_v0  ;;  %s4290_s23 = sshll.u32 %s6694_s22, 8  ;;  %vm2303_vm2 = vcmask 1043456   ;;  %v2204_v37 = vld [vmem:[%s6637_s1 + $0x18] sm:$0xff]  ;;  %v2203_v38 = vld [vmem:[%s6637_s1 + $0x10] sm:$0xff] }
   0xd   : > { %476 = vst.msk [vmem:[#allocation2 + $0x18] sm:$0xff] %vm471_vm0, %v4492_v0  ;;  %477 = vst.msk [vmem:[#allocation2 + $0x20] sm:$0xff] %vm471_vm0, %v4492_v0  ;;  %s4699_s26 = scalar_lea.vmem %s6636_s0, %s4290_s23  ;;  %4348 = vmatprep.subr.msk.mxu0 %vm2303_vm2, %v2205_v36  ;;  %v2202_v41 = vld [vmem:[%s6637_s1 + $0x8] sm:$0xff]  ;;  %v2201_v42 = vld [vmem:[%s6637_s1] sm:$0xff]  ;;  %vm784_vm3 = vcmask 64544   ;;  %vm977_vm4 = vcmask 97344  }
   0xe   : > { %479 = vst.msk [vmem:[#allocation2 + $0x30] sm:$0xff] %vm471_vm0, %v4492_v0  ;;  %480 = vst.msk [vmem:[#allocation2 + $0x38] sm:$0xff] %vm471_vm0, %v4492_v0  ;;  %v439_v1 = vld [vmem:[%s4699_s26] sm:$0xff]  ;;  %v440_v2 = vld [vmem:[%s4699_s26 + $0x8] sm:$0xff]  ;;  %4349 = vmatpush3.msk.msra.mxu0 %vm2303_vm2, %v2205_v36  ;;  %vm1170_vm5 = vcmask 130144   ;;  %vm1363_vm6 = vcmask 162944  }
   0xf   : > { %482 = vst.msk [vmem:[#allocation2 + $0x48] sm:$0xff] %vm471_vm0, %v4492_v0  ;;  %483 = vst.msk [vmem:[#allocation2 + $0x50] sm:$0xff] %vm471_vm0, %v4492_v0  ;;  %v441_v3 = vld [vmem:[%s4699_s26 + $0x10] sm:$0xff]  ;;  %v442_v8 = vld [vmem:[%s4699_s26 + $0x18] sm:$0xff]  ;;  %4350 = vmatprep.subr.mxu0 %v2204_v37  ;;  %vm1556_vm7 = vcmask 195744   ;;  %vm1750_vm8 = vcmask 228544  }
  0x10   : > { %485 = vst.msk [vmem:[#allocation2 + $0x60] sm:$0xff] %vm471_vm0, %v4492_v0  ;;  %486 = vst.msk [vmem:[#allocation2 + $0x68] sm:$0xff] %vm471_vm0, %v4492_v0  ;;  %v443_v9 = vld [vmem:[%s4699_s26 + $0x20] sm:$0xff]  ;;  %v444_v10 = vld [vmem:[%s4699_s26 + $0x28] sm:$0xff]  ;;  %4351 = vmatpush3.msra.mxu0 %v2204_v37  ;;  %vm1943_vm9 = vcmask 261344   ;;  %vm2136_vm10 = vcmask 294144  }
  0x11   : > { %488 = vst.msk [vmem:[#allocation2 + $0x78] sm:$0xff] %vm471_vm0, %v4492_v0  ;;  %489 = vst.msk [vmem:[#allocation2 + $0x80] sm:$0xff] %vm471_vm0, %v4492_v0  ;;  %v445_v11 = vld [vmem:[%s4699_s26 + $0x30] sm:$0xff]  ;;  %v446_v12 = vld [vmem:[%s4699_s26 + $0x38] sm:$0xff]  ;;  %4352 = vmatprep.subr.mxu0 %v2203_v38  ;;  %vm2206_vm11 = vcmask 293888   ;;  %vm2532_vm12 = vcmask 64512  }
  0x12   : > { %491 = vst.msk [vmem:[#allocation2 + $0x90] sm:$0xff] %vm471_vm0, %v4492_v0  ;;  %492 = vst.msk [vmem:[#allocation2 + $0x98] sm:$0xff] %vm471_vm0, %v4492_v0  ;;  %v447_v15 = vld [vmem:[%s4699_s26 + $0x40] sm:$0xff]  ;;  %v448_v16 = vld [vmem:[%s4699_s26 + $0x48] sm:$0xff]  ;;  %4353 = vmatpush3.msra.mxu0 %v2203_v38  ;;  %vm2996_vm13 = vcmask 58368   ;;  %vm3081_vm14 = vcmask 130112  }
  0x13   : > { %494 = vst.msk [vmem:[#allocation2 + $0xa8] sm:$0xff] %vm471_vm0, %v4492_v0  ;;  %495 = vst.msk [vmem:[#allocation2 + $0xb0] sm:$0xff] %vm471_vm0, %v4492_v0  ;;  %v817_v4 = vld [vmem:[#allocation2 + $0x2] sm:$0xff]  ;;  %v449_v30 = vld [vmem:[%s4699_s26 + $0x50] sm:$0xff]  ;;  %4354 = vmatprep.subr.mxu0 %v2202_v41  ;;  %vm3130_vm15 = vcmask 195712   ;;  %s4502_s23 = smov 48  }
  0x14   : > { %497 = vst.msk [vmem:[#allocation2 + $0xc0] sm:$0xff] %vm471_vm0, %v4492_v0  ;;  %498 = vst.msk [vmem:[#allocation2 + $0xc8] sm:$0xff] %vm471_vm0, %v4492_v0  ;;  %v624_v5 = vld [vmem:[#allocation2 + $0x1] sm:$0xff]  ;;  %881 = vrot.lane.b32.xlu1 %v817_v4, %s4493_s27  ;;  %v450_v32 = vld [vmem:[%s4699_s26 + $0x58] sm:$0xff]  ;;  %4355 = vmatpush3.msra.mxu0 %v2202_v41  ;;  %vm3277_vm2 = vcmask 392512   ;;  %s4506_s24 = smov 96  }
  0x15   : > { %500 = vst.msk [vmem:[#allocation2 + $0xd8] sm:$0xff] %vm471_vm0, %v4492_v0  ;;  %501 = vst.msk [vmem:[#allocation2 + $0xe0] sm:$0xff] %vm471_vm0, %v4492_v0  ;;  %688 = vrot.lane.b32.xlu0 %v624_v5, %s4494_s28  ;;  %v560_v13 = vld [vmem:[#allocation2] sm:$0xff]  ;;  %v561_v14 = vld [vmem:[#allocation2 + $0x8] sm:$0xff]  ;;  %4356 = vmatprep.subr.mxu0 %v2201_v42 }
  0x16   : > { %503 = vst.msk [vmem:[#allocation2 + $0xf0] sm:$0xff] %vm471_vm0, %v4492_v0  ;;  %504 = vst.msk [vmem:[#allocation2 + $0xf8] sm:$0xff] %vm471_vm0, %v4492_v0  ;;  %4357 = vmatpush3.msra.mxu0 %v2201_v42  ;;  %v451_v44 = vld [vmem:[%s4699_s26 + $0x60] sm:$0xff]  ;;  %v452_v46 = vld [vmem:[%s4699_s26 + $0x68] sm:$0xff] }
  0x17   : > { %506 = vst.msk [vmem:[#allocation2 + $0x108] sm:$0xff] %vm471_vm0, %v4492_v0  ;;  %507 = vst.msk [vmem:[#allocation2 + $0x110] sm:$0xff] %vm471_vm0, %v4492_v0  ;;  %v453_v52 = vld [vmem:[%s4699_s26 + $0x70] sm:$0xff]  ;;  %v454_v54 = vld [vmem:[%s4699_s26 + $0x78] sm:$0xff] }
  0x18   : > { %509 = vst.msk [vmem:[#allocation2 + $0x120] sm:$0xff] %vm471_vm0, %v4492_v0  ;;  %510 = vst.msk [vmem:[#allocation2 + $0x128] sm:$0xff] %vm471_vm0, %v4492_v0  ;;  %v455_v60 = vld [vmem:[%s4699_s26 + $0x80] sm:$0xff] }
  0x19   : > { %512 = vst.msk [vmem:[#allocation2 + $0x138] sm:$0xff] %vm471_vm0, %v4492_v0  ;;  %513 = vst.msk [vmem:[#allocation2 + $0x140] sm:$0xff] %vm471_vm0, %v4492_v0 }
  0x1a   : > { %515 = vst.msk [vmem:[#allocation2 + $0x150] sm:$0xff] %vm471_vm0, %v4492_v0  ;;  %516 = vst.msk [vmem:[#allocation2 + $0x158] sm:$0xff] %vm471_vm0, %v4492_v0 }
  0x1b   : > { %518 = vst.msk [vmem:[#allocation2 + $0x168] sm:$0xff] %vm471_vm0, %v4492_v0  ;;  %519 = vst.msk [vmem:[#allocation2 + $0x170] sm:$0xff] %vm471_vm0, %v4492_v0 }
  0x1c   : > { %521 = vst.msk [vmem:[#allocation2 + $0x180] sm:$0xff] %vm471_vm0, %v4492_v0  ;;  %522 = vst.msk [vmem:[#allocation2 + $0x188] sm:$0xff] %vm471_vm0, %v4492_v0 }
  0x1d   : > { %524 = vst.msk [vmem:[#allocation2 + $0x198] sm:$0xff] %vm471_vm0, %v4492_v0  ;;  %525 = vst.msk [vmem:[#allocation2 + $0x1a0] sm:$0xff] %vm471_vm0, %v4492_v0 }
  0x1e   : > { %475 = vst.msk [vmem:[#allocation2 + $0x10] sm:$0x3] %vm474_vm1, %v4492_v0  ;;  %478 = vst.msk [vmem:[#allocation2 + $0x28] sm:$0x3] %vm474_vm1, %v4492_v0 }
  0x1f   : > { %481 = vst.msk [vmem:[#allocation2 + $0x40] sm:$0x3] %vm474_vm1, %v4492_v0  ;;  %484 = vst.msk [vmem:[#allocation2 + $0x58] sm:$0x3] %vm474_vm1, %v4492_v0 }
  0x20   : > { %487 = vst.msk [vmem:[#allocation2 + $0x70] sm:$0x3] %vm474_vm1, %v4492_v0  ;;  %490 = vst.msk [vmem:[#allocation2 + $0x88] sm:$0x3] %vm474_vm1, %v4492_v0 }
  0x21   : > { %493 = vst.msk [vmem:[#allocation2 + $0xa0] sm:$0x3] %vm474_vm1, %v4492_v0  ;;  %496 = vst.msk [vmem:[#allocation2 + $0xb8] sm:$0x3] %vm474_vm1, %v4492_v0 }
  0x22   : > { %499 = vst.msk [vmem:[#allocation2 + $0xd0] sm:$0x3] %vm474_vm1, %v4492_v0  ;;  %502 = vst.msk [vmem:[#allocation2 + $0xe8] sm:$0x3] %vm474_vm1, %v4492_v0 }
  0x23   : > { %505 = vst.msk [vmem:[#allocation2 + $0x100] sm:$0x3] %vm474_vm1, %v4492_v0  ;;  %508 = vst.msk [vmem:[#allocation2 + $0x118] sm:$0x3] %vm474_vm1, %v4492_v0 }
  0x24   : > { %511 = vst.msk [vmem:[#allocation2 + $0x130] sm:$0x3] %vm474_vm1, %v4492_v0  ;;  %514 = vst.msk [vmem:[#allocation2 + $0x148] sm:$0x3] %vm474_vm1, %v4492_v0 }
  0x25   : > { %517 = vst.msk [vmem:[#allocation2 + $0x160] sm:$0x3] %vm474_vm1, %v4492_v0  ;;  %520 = vst.msk [vmem:[#allocation2 + $0x178] sm:$0x3] %vm474_vm1, %v4492_v0  ;;  %v818_v6 = vld [vmem:[#allocation2 + $0xa] sm:$0xff] }
  0x26   : > { %523 = vst.msk [vmem:[#allocation2 + $0x190] sm:$0x3] %vm474_vm1, %v4492_v0  ;;  %526 = vst.msk [vmem:[#allocation2 + $0x1a8] sm:$0x3] %vm474_vm1, %v4492_v0  ;;  %v625_v7 = vld [vmem:[#allocation2 + $0x9] sm:$0xff]  ;;  %883 = vrot.lane.b32.xlu1 %v818_v6, %s4493_s27  ;;  %vm3228_vm1 = vcmask 326912  }
  0x27   : > { %528 = vst.msk [vmem:[#allocation2 + $0x19] sm:$0xff] %vm471_vm0, %v439_v1  ;;  %529 = vst.msk [vmem:[#allocation2 + $0x21] sm:$0xff] %vm471_vm0, %v440_v2  ;;  %690 = vrot.lane.b32.xlu0 %v625_v7, %s4494_s28 }
  0x28   : > { %530 = vst.msk [vmem:[#allocation2 + $0x31] sm:$0xff] %vm471_vm0, %v441_v3  ;;  %531 = vst.msk [vmem:[#allocation2 + $0x39] sm:$0xff] %vm471_vm0, %v442_v8  ;;  %v456_v3 = vld [vmem:[%s4699_s26 + $0x88] sm:$0xff] }
  0x29   : > { %532 = vst.msk [vmem:[#allocation2 + $0x49] sm:$0xff] %vm471_vm0, %v443_v9  ;;  %533 = vst.msk [vmem:[#allocation2 + $0x51] sm:$0xff] %vm471_vm0, %v444_v10 }
  0x2a   : > { %534 = vst.msk [vmem:[#allocation2 + $0x61] sm:$0xff] %vm471_vm0, %v445_v11  ;;  %535 = vst.msk [vmem:[#allocation2 + $0x69] sm:$0xff] %vm471_vm0, %v446_v12 }
  0x2b   : > { %592 = vst.msk [vmem:[#allocation3] sm:$0xff] %vm471_vm0, %v560_v13  ;;  %593 = vst.msk [vmem:[#allocation3 + $0x8] sm:$0xff] %vm471_vm0, %v561_v14 }
  0x2c   : > { %536 = vst.msk [vmem:[#allocation2 + $0x79] sm:$0xff] %vm471_vm0, %v447_v15  ;;  %537 = vst.msk [vmem:[#allocation2 + $0x81] sm:$0xff] %vm471_vm0, %v448_v16 }
  0x2d   : > { %538 = vst.msk [vmem:[#allocation2 + $0x91] sm:$0xff] %vm471_vm0, %v449_v30  ;;  %539 = vst.msk [vmem:[#allocation2 + $0x99] sm:$0xff] %vm471_vm0, %v450_v32 }
  0x2e   : > { %v1011_v17 = vld [vmem:[#allocation2 + $0x20] sm:$0xff]  ;;  %v1010_v18 = vld [vmem:[#allocation2 + $0x18] sm:$0xff]  ;;  %540 = vst.msk [vmem:[#allocation2 + $0xa9] sm:$0xff] %vm471_vm0, %v451_v44  ;;  %541 = vst.msk [vmem:[#allocation2 + $0xb1] sm:$0xff] %vm471_vm0, %v452_v46 }
  0x2f   : > { %594 = vst.msk [vmem:[#allocation3 + $0x10] sm:$0xff] %vm471_vm0, %v1010_v18  ;;  %595 = vst.msk [vmem:[#allocation3 + $0x18] sm:$0xff] %vm471_vm0, %v1011_v17  ;;  %1076 = vrot.lane.b32.xlu1 %v1011_v17, %s4495_s29  ;;  %1074 = vrot.lane.b32.xlu0 %v1010_v18, %s4495_s29  ;;  %v1590_v19 = vld [vmem:[#allocation2 + $0x30] sm:$0xff]  ;;  %v1591_v20 = vld [vmem:[#allocation2 + $0x38] sm:$0xff] }
  0x30   : > { %v1203_v21 = vld [vmem:[#allocation2 + $0x19] sm:$0xff]  ;;  %596 = vst.msk [vmem:[#allocation3 + $0x20] sm:$0xff] %vm471_vm0, %v1590_v19  ;;  %597 = vst.msk [vmem:[#allocation3 + $0x28] sm:$0xff] %vm471_vm0, %v1591_v20  ;;  %v4733_v22 = vld [vmem:[#allocation2 + $0x48] sm:$0xff] }
  0x31   : > { %v4735_v23 = vld [vmem:[#allocation2 + $0x50] sm:$0xff]  ;;  %598 = vst.msk [vmem:[#allocation3 + $0x30] sm:$0xff] %vm471_vm0, %v4733_v22  ;;  %v4743_v24 = vld [vmem:[#allocation2 + $0x60] sm:$0xff]  ;;  %v4745_v25 = vld [vmem:[#allocation2 + $0x68] sm:$0xff] }
  0x32   : > { %599 = vst.msk [vmem:[#allocation3 + $0x38] sm:$0xff] %vm471_vm0, %v4735_v23  ;;  %v1204_v26 = vld [vmem:[#allocation2 + $0x21] sm:$0xff]  ;;  %600 = vst.msk [vmem:[#allocation3 + $0x40] sm:$0xff] %vm471_vm0, %v4743_v24  ;;  %v1783_v34 = vld [vmem:[#allocation2 + $0x31] sm:$0xff] }
  0x33   : > { %1267 = vrot.lane.b32.xlu0 %v1203_v21, %s4496_s30  ;;  %692 = vrot.lane.b32.xlu1 %v1203_v21, %s4494_s28  ;;  %v1396_v27 = vld [vmem:[#allocation2 + $0x1a] sm:$0xff]  ;;  %601 = vst.msk [vmem:[#allocation3 + $0x48] sm:$0xff] %vm471_vm0, %v4745_v25  ;;  %v1397_v31 = vld [vmem:[#allocation2 + $0x22] sm:$0xff]  ;;  %v1976_v40 = vld [vmem:[#allocation2 + $0x32] sm:$0xff] }
  0x34   : > { %v4751_v28 = vld [vmem:[#allocation2 + $0x78] sm:$0xff]  ;;  %v4753_v29 = vld [vmem:[#allocation2 + $0x80] sm:$0xff]  ;;  %v4768_v33 = vld [vmem:[#allocation2 + $0x90] sm:$0xff]  ;;  %542 = vst.msk [vmem:[#allocation2 + $0xc1] sm:$0xff] %vm471_vm0, %v453_v52 }
  0x35   : > { %602 = vst.msk [vmem:[#allocation3 + $0x50] sm:$0xff] %vm471_vm0, %v4751_v28  ;;  %603 = vst.msk [vmem:[#allocation3 + $0x58] sm:$0xff] %vm471_vm0, %v4753_v29  ;;  %v4775_v35 = vld [vmem:[#allocation2 + $0x98] sm:$0xff]  ;;  %v4808_v45 = vld [vmem:[#allocation2 + $0xa8] sm:$0xff] }
  0x36   : > { %604 = vst.msk [vmem:[#allocation3 + $0x60] sm:$0xff] %vm471_vm0, %v4768_v33  ;;  %605 = vst.msk [vmem:[#allocation3 + $0x68] sm:$0xff] %vm471_vm0, %v4775_v35  ;;  %v1784_v39 = vld [vmem:[#allocation2 + $0x39] sm:$0xff]  ;;  %v1785_v47 = vld [vmem:[#allocation2 + $0x49] sm:$0xff] }
  0x37   : > { %1269 = vrot.lane.b32.xlu0 %v1204_v26, %s4496_s30  ;;  %1460 = vrot.lane.b32.xlu1 %v1396_v27, %s4497_s13  ;;  %v1977_v43 = vld [vmem:[#allocation2 + $0x3a] sm:$0xff]  ;;  %606 = vst.msk [vmem:[#allocation3 + $0x70] sm:$0xff] %vm471_vm0, %v4808_v45  ;;  %v4820_v48 = vld [vmem:[#allocation2 + $0xb0] sm:$0xff]  ;;  %543 = vst.msk [vmem:[#allocation2 + $0xc9] sm:$0xff] %vm471_vm0, %v454_v54 }
  0x38   : > { %607 = vst.msk [vmem:[#allocation3 + $0x78] sm:$0xff] %vm471_vm0, %v4820_v48  ;;  %v1786_v49 = vld [vmem:[#allocation2 + $0x51] sm:$0xff]  ;;  %v1787_v55 = vld [vmem:[#allocation2 + $0x61] sm:$0xff]  ;;  %v1788_v57 = vld [vmem:[#allocation2 + $0x69] sm:$0xff] }
  0x39   : > { %v1978_v50 = vld [vmem:[#allocation2 + $0x4a] sm:$0xff]  ;;  %v1979_v51 = vld [vmem:[#allocation2 + $0x52] sm:$0xff]  ;;  %v1980_v58 = vld [vmem:[#allocation2 + $0x62] sm:$0xff]  ;;  %544 = vst.msk [vmem:[#allocation2 + $0xd9] sm:$0xff] %vm471_vm0, %v455_v60 }
  0x3a   : > { %v1981_v59 = vld [vmem:[#allocation2 + $0x6a] sm:$0xff]  ;;  %545 = vst.msk [vmem:[#allocation2 + $0xe1] sm:$0xff] %vm471_vm0, %v456_v3  ;;  %v1789_v6 = vld [vmem:[#allocation2 + $0x79] sm:$0xff]  ;;  %v1790_v12 = vld [vmem:[#allocation2 + $0x81] sm:$0xff] }
  0x3b   : > { %694 = vrot.lane.b32.xlu0 %v1204_v26, %s4494_s28  ;;  %885 = vrot.lane.b32.xlu1 %v1396_v27, %s4493_s27  ;;  %v4840_v53 = vld [vmem:[#allocation2 + $0xc0] sm:$0xff]  ;;  %v457_v21 = vld [vmem:[%s4699_s26 + $0x90] sm:$0xff]  ;;  %v458_v27 = vld [vmem:[%s4699_s26 + $0x98] sm:$0xff]  ;;  %2995 = vst.msk [vmem:[#allocation5] sm:$0xff] %vm2532_vm12, %v4492_v0 }
  0x3c   : > { %608 = vst.msk [vmem:[#allocation3 + $0x80] sm:$0xff] %vm471_vm0, %v4840_v53  ;;  %v1982_v13 = vld [vmem:[#allocation2 + $0x7a] sm:$0xff]  ;;  %v1983_v18 = vld [vmem:[#allocation2 + $0x82] sm:$0xff]  ;;  %546 = vst.msk [vmem:[#allocation2 + $0xf1] sm:$0xff] %vm471_vm0, %v457_v21 }
  0x3d   : > { %547 = vst.msk [vmem:[#allocation2 + $0xf9] sm:$0xff] %vm471_vm0, %v458_v27  ;;  %v1791_v30 = vld [vmem:[#allocation2 + $0x91] sm:$0xff]  ;;  %v1792_v38 = vld [vmem:[#allocation2 + $0x99] sm:$0xff]  ;;  %v1793_v60 = vld [vmem:[#allocation2 + $0xa9] sm:$0xff] }
  0x3e   : > { %v4852_v56 = vld [vmem:[#allocation2 + $0xc8] sm:$0xff]  ;;  %2998 = vst.msk [vmem:[#allocation5 + $0x10] sm:$0xff] %vm2532_vm12, %v4492_v0  ;;  %3000 = vst.msk [vmem:[#allocation5 + $0x20] sm:$0xff] %vm2532_vm12, %v4492_v0 }
  0x3f   : > { %1462 = vrot.lane.b32.xlu0 %v1397_v31, %s4497_s13  ;;  %1654 = vrot.lane.b32.xlu1 %v1590_v19, %s4498_s14  ;;  %609 = vst.msk [vmem:[#allocation3 + $0x88] sm:$0xff] %vm471_vm0, %v4852_v56 }
  0x40   : > { %v4875_v2 = vld [vmem:[#allocation2 + $0xd8] sm:$0xff]  ;;  %3002 = vst.msk [vmem:[#allocation5 + $0x30] sm:$0xff] %vm2532_vm12, %v4492_v0  ;;  %3004 = vst.msk [vmem:[#allocation5 + $0x40] sm:$0xff] %vm2532_vm12, %v4492_v0 }
  0x41   : > { %610 = vst.msk [vmem:[#allocation3 + $0x90] sm:$0xff] %vm471_vm0, %v4875_v2  ;;  %v4892_v9 = vld [vmem:[#allocation2 + $0xe0] sm:$0xff] }
  0x42   : > { %611 = vst.msk [vmem:[#allocation3 + $0x98] sm:$0xff] %vm471_vm0, %v4892_v9 }
  0x43   : > { %887 = vrot.lane.b32.xlu0 %v1397_v31, %s4493_s27  ;;  %1078 = vrot.lane.b32.xlu1 %v1590_v19, %s4495_s29  ;;  %v4924_v26 = vld [vmem:[#allocation2 + $0xf0] sm:$0xff]  ;;  %3006 = vst.msk [vmem:[#allocation5 + $0x50] sm:$0xff] %vm2532_vm12, %v4492_v0  ;;  %3008 = vst.msk [vmem:[#allocation5 + $0x60] sm:$0xff] %vm2532_vm12, %v4492_v0 }
  0x44   : > { %612 = vst.msk [vmem:[#allocation3 + $0xa0] sm:$0xff] %vm471_vm0, %v4924_v26 }
  0x45   : > { %3010 = vst.msk [vmem:[#allocation5 + $0x70] sm:$0xff] %vm2532_vm12, %v4492_v0  ;;  %3012 = vst.msk [vmem:[#allocation5 + $0x80] sm:$0xff] %vm2532_vm12, %v4492_v0 }
  0x46   : > { %3014 = vst.msk [vmem:[#allocation5 + $0x90] sm:$0xff] %vm2532_vm12, %v4492_v0 }
  0x47   : > { %1656 = vrot.lane.b32.xlu0 %v1591_v20, %s4498_s14  ;;  %1847 = vrot.lane.b32.xlu1 %v1783_v34, %s4499_s15  ;;  %2997 = vst.msk [vmem:[#allocation5 + $0x8] sm:$0x3] %vm2996_vm13, %v4492_v0  ;;  %2999 = vst.msk [vmem:[#allocation5 + $0x18] sm:$0x3] %vm2996_vm13, %v4492_v0 }
  0x48   : > { %3001 = vst.msk [vmem:[#allocation5 + $0x28] sm:$0x3] %vm2996_vm13, %v4492_v0  ;;  %3003 = vst.msk [vmem:[#allocation5 + $0x38] sm:$0x3] %vm2996_vm13, %v4492_v0 }
  0x49   : > { %3005 = vst.msk [vmem:[#allocation5 + $0x48] sm:$0x3] %vm2996_vm13, %v4492_v0  ;;  %3007 = vst.msk [vmem:[#allocation5 + $0x58] sm:$0x3] %vm2996_vm13, %v4492_v0 }
  0x4a   : > { %3009 = vst.msk [vmem:[#allocation5 + $0x68] sm:$0x3] %vm2996_vm13, %v4492_v0  ;;  %3011 = vst.msk [vmem:[#allocation5 + $0x78] sm:$0x3] %vm2996_vm13, %v4492_v0 }
  0x4b   : > { %1080 = vrot.lane.b32.xlu0 %v1591_v20, %s4495_s29  ;;  %1271 = vrot.lane.b32.xlu1 %v1783_v34, %s4496_s30  ;;  %3013 = vst.msk [vmem:[#allocation5 + $0x88] sm:$0x3] %vm2996_vm13, %v4492_v0  ;;  %3015 = vst.msk [vmem:[#allocation5 + $0x98] sm:$0x3] %vm2996_vm13, %v4492_v0  ;;  %vm3841_vm13 = vcmask 654848  }
  0x4f   : > { %1849 = vrot.lane.b32.xlu0 %v1784_v39, %s4499_s15  ;;  %2040 = vrot.lane.b32.xlu1 %v1976_v40, %s4500_s16 }
  0x53   : > { %696 = vrot.lane.b32.xlu0 %v1783_v34, %s4494_s28  ;;  %1273 = vrot.lane.b32.xlu1 %v1784_v39, %s4496_s30  ;;  %v4940_v34 = vld [vmem:[#allocation2 + $0xf8] sm:$0xff] }
  0x54   : > { %613 = vst.msk [vmem:[#allocation3 + $0xa8] sm:$0xff] %vm471_vm0, %v4940_v34 }
  0x57   : > { %1464 = vrot.lane.b32.xlu0 %v1976_v40, %s4497_s13  ;;  %2042 = vrot.lane.b32.xlu1 %v1977_v43, %s4500_s16 }
  0x5b   : > { %698 = vrot.lane.b32.xlu0 %v1784_v39, %s4494_s28  ;;  %889 = vrot.lane.b32.xlu1 %v1976_v40, %s4493_s27  ;;  %v1984_v39 = vld [vmem:[#allocation2 + $0x92] sm:$0xff] }
  0x5f   : > { %1466 = vrot.lane.b32.xlu0 %v1977_v43, %s4497_s13  ;;  %1658 = vrot.lane.b32.xlu1 %v4733_v22, %s4498_s14 }
  0x63   : > { %891 = vrot.lane.b32.xlu0 %v1977_v43, %s4493_s27  ;;  %1082 = vrot.lane.b32.xlu1 %v4733_v22, %s4495_s29 }
  0x67   : > { %1660 = vrot.lane.b32.xlu0 %v4735_v23, %s4498_s14  ;;  %1851 = vrot.lane.b32.xlu1 %v1785_v47, %s4499_s15 }
  0x6b   : > { %1084 = vrot.lane.b32.xlu0 %v4735_v23, %s4495_s29  ;;  %1275 = vrot.lane.b32.xlu1 %v1785_v47, %s4496_s30 }
  0x6f   : > { %1853 = vrot.lane.b32.xlu0 %v1786_v49, %s4499_s15  ;;  %2044 = vrot.lane.b32.xlu1 %v1978_v50, %s4500_s16 }
  0x73   : > { %700 = vrot.lane.b32.xlu0 %v1785_v47, %s4494_s28  ;;  %1277 = vrot.lane.b32.xlu1 %v1786_v49, %s4496_s30 }
  0x77   : > { %1468 = vrot.lane.b32.xlu0 %v1978_v50, %s4497_s13  ;;  %2046 = vrot.lane.b32.xlu1 %v1979_v51, %s4500_s16 }
  0x7b   : > { %702 = vrot.lane.b32.xlu0 %v1786_v49, %s4494_s28  ;;  %893 = vrot.lane.b32.xlu1 %v1978_v50, %s4493_s27  ;;  %v459_v49 = vld [vmem:[%s4699_s26 + $0xa0] sm:$0xff] }
  0x7c   : > { %548 = vst.msk [vmem:[#allocation2 + $0x109] sm:$0xff] %vm471_vm0, %v459_v49 }
  0x7f   : > { %1470 = vrot.lane.b32.xlu0 %v1979_v51, %s4497_s13  ;;  %1662 = vrot.lane.b32.xlu1 %v4743_v24, %s4498_s14 }
  0x83   : > { %895 = vrot.lane.b32.xlu0 %v1979_v51, %s4493_s27  ;;  %1086 = vrot.lane.b32.xlu1 %v4743_v24, %s4495_s29 }
  0x86   : > { %v882_v61 = vpop.permute.xlu1 %881 }
  0x87   : > { %1664 = vrot.lane.b32.xlu0 %v4745_v25, %s4498_s14  ;;  %1855 = vrot.lane.b32.xlu1 %v1787_v55, %s4499_s15  ;;  %v689_v62 = vpop.permute.xlu0 %688 }
  0x88   : > { %785 = vst.msk [vmem:[#allocation3] sm:$0xff] %vm784_vm3, %v689_v62 }
  0x89   : > { %978 = vst.msk [vmem:[#allocation3] sm:$0xff] %vm977_vm4, %v882_v61 }
  0x8b   : > { %1088 = vrot.lane.b32.xlu0 %v4745_v25, %s4495_s29  ;;  %1279 = vrot.lane.b32.xlu1 %v1787_v55, %s4496_s30 }
  0x8f   : > { %1857 = vrot.lane.b32.xlu0 %v1788_v57, %s4499_s15  ;;  %2048 = vrot.lane.b32.xlu1 %v1980_v58, %s4500_s16 }
  0x93   : > { %704 = vrot.lane.b32.xlu0 %v1787_v55, %s4494_s28  ;;  %1281 = vrot.lane.b32.xlu1 %v1788_v57, %s4496_s30  ;;  %v4974_v55 = vld [vmem:[#allocation2 + $0x108] sm:$0xff] }
  0x94   : > { %614 = vst.msk [vmem:[#allocation3 + $0xb0] sm:$0xff] %vm471_vm0, %v4974_v55 }
  0x97   : > { %1472 = vrot.lane.b32.xlu0 %v1980_v58, %s4497_s13  ;;  %2050 = vrot.lane.b32.xlu1 %v1981_v59, %s4500_s16 }
  0x98   : > { %v884_v63 = vpop.permute.xlu1 %883 }
  0x99   : > { %v691_v1 = vpop.permute.xlu0 %690 }
  0x9a   : > { %786 = vst.msk [vmem:[#allocation3 + $0x8] sm:$0xff] %vm784_vm3, %v691_v1 }
  0x9b   : > { %706 = vrot.lane.b32.xlu0 %v1788_v57, %s4494_s28  ;;  %897 = vrot.lane.b32.xlu1 %v1980_v58, %s4493_s27  ;;  %979 = vst.msk [vmem:[#allocation3 + $0x8] sm:$0xff] %vm977_vm4, %v884_v63  ;;  %v460_v57 = vld [vmem:[%s4699_s26 + $0xa8] sm:$0xff] }
  0x9c   : > { %549 = vst.msk [vmem:[#allocation2 + $0x111] sm:$0xff] %vm471_vm0, %v460_v57 }
  0x9f   : > { %1474 = vrot.lane.b32.xlu0 %v1981_v59, %s4497_s13  ;;  %1666 = vrot.lane.b32.xlu1 %v4751_v28, %s4498_s14 }
  0xa1   : > { %v1077_v4 = vpop.permute.xlu1 %1076  ;;  %v1075_v5 = vpop.permute.xlu0 %1074 }
  0xa2   : > { %1172 = vst.msk [vmem:[#allocation3 + $0x8] sm:$0xff] %vm1170_vm5, %v1077_v4  ;;  %1171 = vst.msk [vmem:[#allocation3] sm:$0xff] %vm1170_vm5, %v1075_v5  ;;  %v1794_v4 = vld [vmem:[#allocation2 + $0xb1] sm:$0xff] }
  0xa3   : > { %899 = vrot.lane.b32.xlu0 %v1981_v59, %s4493_s27  ;;  %1090 = vrot.lane.b32.xlu1 %v4751_v28, %s4495_s29  ;;  %v4990_v63 = vld [vmem:[#allocation2 + $0x110] sm:$0xff] }
  0xa4   : > { %615 = vst.msk [vmem:[#allocation3 + $0xb8] sm:$0xff] %vm471_vm0, %v4990_v63  ;;  %v1986_v5 = vld [vmem:[#allocation2 + $0xaa] sm:$0xff] }
  0xa5   : > { %v1268_v7 = vpop.permute.xlu0 %1267  ;;  %v693_v8 = vpop.permute.xlu1 %692 }
  0xa6   : > { %1364 = vst.msk [vmem:[#allocation3] sm:$0xff] %vm1363_vm6, %v1268_v7 }
  0xa7   : > { %787 = vst.msk [vmem:[#allocation3 + $0x10] sm:$0xff] %vm784_vm3, %v693_v8  ;;  %1668 = vrot.lane.b32.xlu0 %v4753_v29, %s4498_s14  ;;  %1859 = vrot.lane.b32.xlu1 %v1789_v6, %s4499_s15 }
  0xa9   : > { %v1270_v10 = vpop.permute.xlu0 %1269  ;;  %v1461_v11 = vpop.permute.xlu1 %1460 }
  0xaa   : > { %1365 = vst.msk [vmem:[#allocation3 + $0x8] sm:$0xff] %vm1363_vm6, %v1270_v10 }
  0xab   : > { %1557 = vst.msk [vmem:[#allocation3] sm:$0xff] %vm1556_vm7, %v1461_v11  ;;  %1092 = vrot.lane.b32.xlu0 %v4753_v29, %s4495_s29  ;;  %1283 = vrot.lane.b32.xlu1 %v1789_v6, %s4496_s30 }
  0xad   : > { %v695_v14 = vpop.permute.xlu0 %694  ;;  %v886_v15 = vpop.permute.xlu1 %885 }
  0xae   : > { %788 = vst.msk [vmem:[#allocation3 + $0x18] sm:$0xff] %vm784_vm3, %v695_v14  ;;  %v461_v14 = vld [vmem:[%s4699_s26 + $0xb0] sm:$0xff] }
  0xaf   : > { %980 = vst.msk [vmem:[#allocation3 + $0x10] sm:$0xff] %vm977_vm4, %v886_v15  ;;  %1861 = vrot.lane.b32.xlu0 %v1790_v12, %s4499_s15  ;;  %2052 = vrot.lane.b32.xlu1 %v1982_v13, %s4500_s16 }
  0xb0   : > { %550 = vst.msk [vmem:[#allocation2 + $0x121] sm:$0xff] %vm471_vm0, %v461_v14 }
  0xb1   : > { %v1463_v16 = vpop.permute.xlu0 %1462  ;;  %v1655_v17 = vpop.permute.xlu1 %1654 }
  0xb2   : > { %1558 = vst.msk [vmem:[#allocation3 + $0x8] sm:$0xff] %vm1556_vm7, %v1463_v16 }
  0xb3   : > { %1751 = vst.msk [vmem:[#allocation3] sm:$0xff] %vm1750_vm8, %v1655_v17  ;;  %708 = vrot.lane.b32.xlu0 %v1789_v6, %s4494_s28  ;;  %1285 = vrot.lane.b32.xlu1 %v1790_v12, %s4496_s30 }
  0xb5   : > { %v888_v19 = vpop.permute.xlu0 %887  ;;  %v1079_v20 = vpop.permute.xlu1 %1078 }
  0xb6   : > { %981 = vst.msk [vmem:[#allocation3 + $0x18] sm:$0xff] %vm977_vm4, %v888_v19 }
  0xb7   : > { %1173 = vst.msk [vmem:[#allocation3 + $0x10] sm:$0xff] %vm1170_vm5, %v1079_v20  ;;  %1476 = vrot.lane.b32.xlu0 %v1982_v13, %s4497_s13  ;;  %2054 = vrot.lane.b32.xlu1 %v1983_v18, %s4500_s16  ;;  %v5024_v19 = vld [vmem:[#allocation2 + $0x120] sm:$0xff]  ;;  %v462_v20 = vld [vmem:[%s4699_s26 + $0xb8] sm:$0xff] }
  0xb8   : > { %551 = vst.msk [vmem:[#allocation2 + $0x129] sm:$0xff] %vm471_vm0, %v462_v20  ;;  %616 = vst.msk [vmem:[#allocation3 + $0xc0] sm:$0xff] %vm471_vm0, %v5024_v19 }
  0xb9   : > { %v1657_v22 = vpop.permute.xlu0 %1656  ;;  %v1848_v23 = vpop.permute.xlu1 %1847 }
  0xba   : > { %1752 = vst.msk [vmem:[#allocation3 + $0x8] sm:$0xff] %vm1750_vm8, %v1657_v22 }
  0xbb   : > { %1944 = vst.msk [vmem:[#allocation3] sm:$0xff] %vm1943_vm9, %v1848_v23  ;;  %710 = vrot.lane.b32.xlu0 %v1790_v12, %s4494_s28  ;;  %901 = vrot.lane.b32.xlu1 %v1982_v13, %s4493_s27  ;;  %v1795_v23 = vld [vmem:[#allocation2 + $0xc1] sm:$0xff] }
  0xbd   : > { %v1081_v24 = vpop.permute.xlu0 %1080  ;;  %v1272_v25 = vpop.permute.xlu1 %1271 }
  0xbe   : > { %1174 = vst.msk [vmem:[#allocation3 + $0x18] sm:$0xff] %vm1170_vm5, %v1081_v24 }
  0xbf   : > { %1366 = vst.msk [vmem:[#allocation3 + $0x10] sm:$0xff] %vm1363_vm6, %v1272_v25  ;;  %1478 = vrot.lane.b32.xlu0 %v1983_v18, %s4497_s13  ;;  %1670 = vrot.lane.b32.xlu1 %v4768_v33, %s4498_s14  ;;  %v5040_v27 = vld [vmem:[#allocation2 + $0x128] sm:$0xff] }
  0xc0   : > { %617 = vst.msk [vmem:[#allocation3 + $0xc8] sm:$0xff] %vm471_vm0, %v5040_v27 }
  0xc1   : > { %v1850_v28 = vpop.permute.xlu0 %1849  ;;  %v2041_v29 = vpop.permute.xlu1 %2040 }
  0xc2   : > { %1945 = vst.msk [vmem:[#allocation3 + $0x8] sm:$0xff] %vm1943_vm9, %v1850_v28 }
  0xc3   : > { %2137 = vst.msk [vmem:[#allocation3] sm:$0xff] %vm2136_vm10, %v2041_v29  ;;  %903 = vrot.lane.b32.xlu0 %v1983_v18, %s4493_s27  ;;  %1094 = vrot.lane.b32.xlu1 %v4768_v33, %s4495_s29 }
  0xc5   : > { %v697_v31 = vpop.permute.xlu0 %696  ;;  %v1274_v32 = vpop.permute.xlu1 %1273 }
  0xc6   : > { %789 = vst.msk [vmem:[#allocation3 + $0x20] sm:$0xff] %vm784_vm3, %v697_v31  ;;  %v1988_v31 = vld [vmem:[#allocation2 + $0xc2] sm:$0xff] }
  0xc7   : > { %1367 = vst.msk [vmem:[#allocation3 + $0x18] sm:$0xff] %vm1363_vm6, %v1274_v32  ;;  %1672 = vrot.lane.b32.xlu0 %v4775_v35, %s4498_s14  ;;  %1863 = vrot.lane.b32.xlu1 %v1791_v30, %s4499_s15 }
  0xc9   : > { %v1465_v36 = vpop.permute.xlu0 %1464  ;;  %v2043_v33 = vpop.permute.xlu1 %2042 }
  0xca   : > { %v2169_v37 = vld [vmem:[#allocation3] sm:$0xff]  ;;  %1559 = vst.msk [vmem:[#allocation3 + $0x10] sm:$0xff] %vm1556_vm7, %v1465_v36 }
  0xcb   : > { %2138 = vst.msk [vmem:[#allocation3 + $0x8] sm:$0xff] %vm2136_vm10, %v2043_v33  ;;  %4358 = vmatprep.mubr.msk.f32.mxu0 %vm2206_vm11, %v2169_v37  ;;  %1096 = vrot.lane.b32.xlu0 %v4775_v35, %s4495_s29  ;;  %v1985_v35 = vld [vmem:[#allocation2 + $0x9a] sm:$0xff] }
  0xcc   : > { %1287 = vrot.lane.b32.xlu1 %v1791_v30, %s4496_s30 }
  0xcd   : > { %v699_v40 = vpop.permute.xlu0 %698  ;;  %v890_v41 = vpop.permute.xlu1 %889 }
  0xce   : > { %790 = vst.msk [vmem:[#allocation3 + $0x28] sm:$0xff] %vm784_vm3, %v699_v40 }
  0xcf   : > { %982 = vst.msk [vmem:[#allocation3 + $0x20] sm:$0xff] %vm977_vm4, %v890_v41  ;;  %1865 = vrot.lane.b32.xlu0 %v1792_v38, %s4499_s15  ;;  %v463_v41 = vld [vmem:[%s4699_s26 + $0xc0] sm:$0xff] }
  0xd0   : > { %2056 = vrot.lane.b32.xlu1 %v1984_v39, %s4500_s16  ;;  %552 = vst.msk [vmem:[#allocation2 + $0x139] sm:$0xff] %vm471_vm0, %v463_v41 }
  0xd1   : > { %v1467_v42 = vpop.permute.xlu0 %1466  ;;  %v1659_v43 = vpop.permute.xlu1 %1658 }
  0xd2   : > { %v2170_v44 = vld [vmem:[#allocation3 + $0x8] sm:$0xff]  ;;  %1560 = vst.msk [vmem:[#allocation3 + $0x18] sm:$0xff] %vm1556_vm7, %v1467_v42 }
  0xd3   : > { %1753 = vst.msk [vmem:[#allocation3 + $0x10] sm:$0xff] %vm1750_vm8, %v1659_v43  ;;  %4359 = vmatmul.mubr.msk.f32.vlgmr.msra.gmra.mxu0 %vm2206_vm11, %v2170_v44  ;;  %712 = vrot.lane.b32.xlu0 %v1791_v30, %s4494_s28  ;;  %v1796_v30 = vld [vmem:[#allocation2 + $0xc9] sm:$0xff] }
  0xd4   : > { %1289 = vrot.lane.b32.xlu1 %v1792_v38, %s4496_s30 }
  0xd5   : > { %v892_v46 = vpop.permute.xlu0 %891  ;;  %v1083_v47 = vpop.permute.xlu1 %1082 }
  0xd6   : > { %983 = vst.msk [vmem:[#allocation3 + $0x28] sm:$0xff] %vm977_vm4, %v892_v46 }
  0xd7   : > { %1175 = vst.msk [vmem:[#allocation3 + $0x20] sm:$0xff] %vm1170_vm5, %v1083_v47  ;;  %1480 = vrot.lane.b32.xlu0 %v1984_v39, %s4497_s13  ;;  %v5094_v46 = vld [vmem:[#allocation2 + $0x138] sm:$0xff]  ;;  %v464_v47 = vld [vmem:[%s4699_s26 + $0xc8] sm:$0xff] }
  0xd8   : > { %2058 = vrot.lane.b32.xlu1 %v1985_v35, %s4500_s16  ;;  %553 = vst.msk [vmem:[#allocation2 + $0x141] sm:$0xff] %vm471_vm0, %v464_v47  ;;  %618 = vst.msk [vmem:[#allocation3 + $0xd0] sm:$0xff] %vm471_vm0, %v5094_v46 }
  0xd9   : > { %v1661_v50 = vpop.permute.xlu0 %1660  ;;  %v1852_v51 = vpop.permute.xlu1 %1851 }
  0xda   : > { %1754 = vst.msk [vmem:[#allocation3 + $0x18] sm:$0xff] %vm1750_vm8, %v1661_v50 }
  0xdb   : > { %1946 = vst.msk [vmem:[#allocation3 + $0x10] sm:$0xff] %vm1943_vm9, %v1852_v51  ;;  %714 = vrot.lane.b32.xlu0 %v1792_v38, %s4494_s28  ;;  %v1797_v51 = vld [vmem:[#allocation2 + $0xd9] sm:$0xff] }
  0xdc   : > { %905 = vrot.lane.b32.xlu1 %v1984_v39, %s4493_s27 }
  0xdd   : > { %v1085_v52 = vpop.permute.xlu0 %1084  ;;  %v1276_v54 = vpop.permute.xlu1 %1275 }
  0xde   : > { %1176 = vst.msk [vmem:[#allocation3 + $0x28] sm:$0xff] %vm1170_vm5, %v1085_v52 }
  0xdf   : > { %1368 = vst.msk [vmem:[#allocation3 + $0x20] sm:$0xff] %vm1363_vm6, %v1276_v54  ;;  %1482 = vrot.lane.b32.xlu0 %v1985_v35, %s4497_s13  ;;  %v5110_v57 = vld [vmem:[#allocation2 + $0x140] sm:$0xff] }
  0xe0   : > { %1674 = vrot.lane.b32.xlu1 %v4808_v45, %s4498_s14  ;;  %619 = vst.msk [vmem:[#allocation3 + $0xd8] sm:$0xff] %vm471_vm0, %v5110_v57 }
  0xe1   : > { %v1854_v58 = vpop.permute.xlu0 %1853  ;;  %v2045_v59 = vpop.permute.xlu1 %2044 }
  0xe2   : > { %1947 = vst.msk [vmem:[#allocation3 + $0x18] sm:$0xff] %vm1943_vm9, %v1854_v58 }
  0xe3   : > { %2139 = vst.msk [vmem:[#allocation3 + $0x10] sm:$0xff] %vm2136_vm10, %v2045_v59  ;;  %907 = vrot.lane.b32.xlu0 %v1985_v35, %s4493_s27 }
  0xe4   : > { %1098 = vrot.lane.b32.xlu1 %v4808_v45, %s4495_s29 }
  0xe5   : > { %v701_v61 = vpop.permute.xlu0 %700  ;;  %v1278_v62 = vpop.permute.xlu1 %1277 }
  0xe6   : > { %791 = vst.msk [vmem:[#allocation3 + $0x30] sm:$0xff] %vm784_vm3, %v701_v61  ;;  %v1990_v61 = vld [vmem:[#allocation2 + $0xda] sm:$0xff] }
  0xe7   : > { %1369 = vst.msk [vmem:[#allocation3 + $0x28] sm:$0xff] %vm1363_vm6, %v1278_v62  ;;  %1676 = vrot.lane.b32.xlu0 %v4820_v48, %s4498_s14 }
  0xe8   : > { %1867 = vrot.lane.b32.xlu1 %v1793_v60, %s4499_s15 }
  0xe9   : > { %v1469_v1 = vpop.permute.xlu0 %1468  ;;  %v2047_v3 = vpop.permute.xlu1 %2046 }
  0xea   : > { %v2171_v45 = vld [vmem:[#allocation3 + $0x10] sm:$0xff]  ;;  %1561 = vst.msk [vmem:[#allocation3 + $0x20] sm:$0xff] %vm1556_vm7, %v1469_v1 }
  0xeb   : > { %2140 = vst.msk [vmem:[#allocation3 + $0x18] sm:$0xff] %vm2136_vm10, %v2047_v3  ;;  %4361 = vmatprep.mubr.msk.f32.mxu0 %vm2206_vm11, %v2171_v45  ;;  %1100 = vrot.lane.b32.xlu0 %v4820_v48, %s4495_s29  ;;  %v1987_v48 = vld [vmem:[#allocation2 + $0xb2] sm:$0xff] }
  0xec   : > { %1291 = vrot.lane.b32.xlu1 %v1793_v60, %s4496_s30 }
  0xed   : > { %v703_v6 = vpop.permute.xlu0 %702  ;;  %v894_v7 = vpop.permute.xlu1 %893 }
  0xee   : > { %792 = vst.msk [vmem:[#allocation3 + $0x38] sm:$0xff] %vm784_vm3, %v703_v6 }
  0xef   : > { %984 = vst.msk [vmem:[#allocation3 + $0x30] sm:$0xff] %vm977_vm4, %v894_v7  ;;  %1869 = vrot.lane.b32.xlu0 %v1794_v4, %s4499_s15  ;;  %v465_v7 = vld [vmem:[%s4699_s26 + $0xd0] sm:$0xff] }
  0xf0   : > { %2060 = vrot.lane.b32.xlu1 %v1986_v5, %s4500_s16  ;;  %554 = vst.msk [vmem:[#allocation2 + $0x151] sm:$0xff] %vm471_vm0, %v465_v7 }
  0xf1   : > { %v1471_v8 = vpop.permute.xlu0 %1470  ;;  %v1663_v10 = vpop.permute.xlu1 %1662 }
  0xf2   : > { %v2172_v11 = vld [vmem:[#allocation3 + $0x18] sm:$0xff]  ;;  %1562 = vst.msk [vmem:[#allocation3 + $0x28] sm:$0xff] %vm1556_vm7, %v1471_v8 }
  0xf3   : > { %1755 = vst.msk [vmem:[#allocation3 + $0x20] sm:$0xff] %vm1750_vm8, %v1663_v10  ;;  %4362 = vmatmul.mubr.msk.f32.gmra.mxu0 %vm2206_vm11, %v2172_v11  ;;  %716 = vrot.lane.b32.xlu0 %v1793_v60, %s4494_s28  ;;  %v1798_v60 = vld [vmem:[#allocation2 + $0xe1] sm:$0xff] }
  0xf4   : > { %1293 = vrot.lane.b32.xlu1 %v1794_v4, %s4496_s30 }
  0xf5   : > { %v896_v12 = vpop.permute.xlu0 %895  ;;  %v1087_v13 = vpop.permute.xlu1 %1086 }
  0xf6   : > { %985 = vst.msk [vmem:[#allocation3 + $0x38] sm:$0xff] %vm977_vm4, %v896_v12 }
  0xf7   : > { %1177 = vst.msk [vmem:[#allocation3 + $0x30] sm:$0xff] %vm1170_vm5, %v1087_v13  ;;  %1484 = vrot.lane.b32.xlu0 %v1986_v5, %s4497_s13  ;;  %v5144_v12 = vld [vmem:[#allocation2 + $0x150] sm:$0xff]  ;;  %v466_v13 = vld [vmem:[%s4699_s26 + $0xd8] sm:$0xff] }
  0xf8   : > { %2062 = vrot.lane.b32.xlu1 %v1987_v48, %s4500_s16  ;;  %555 = vst.msk [vmem:[#allocation2 + $0x159] sm:$0xff] %vm471_vm0, %v466_v13  ;;  %620 = vst.msk [vmem:[#allocation3 + $0xe0] sm:$0xff] %vm471_vm0, %v5144_v12 }
  0xf9   : > { %v1665_v15 = vpop.permute.xlu0 %1664  ;;  %v1856_v16 = vpop.permute.xlu1 %1855 }
  0xfa   : > { %1756 = vst.msk [vmem:[#allocation3 + $0x28] sm:$0xff] %vm1750_vm8, %v1665_v15 }
  0xfb   : > { %1948 = vst.msk [vmem:[#allocation3 + $0x20] sm:$0xff] %vm1943_vm9, %v1856_v16  ;;  %718 = vrot.lane.b32.xlu0 %v1794_v4, %s4494_s28  ;;  %v1799_v16 = vld [vmem:[#allocation2 + $0xf1] sm:$0xff] }
  0xfc   : > { %909 = vrot.lane.b32.xlu1 %v1986_v5, %s4493_s27 }
  0xfd   : > { %v1089_v17 = vpop.permute.xlu0 %1088  ;;  %v1280_v18 = vpop.permute.xlu1 %1279 }
  0xfe   : > { %1178 = vst.msk [vmem:[#allocation3 + $0x38] sm:$0xff] %vm1170_vm5, %v1089_v17 }
  0xff   : > { %1370 = vst.msk [vmem:[#allocation3 + $0x30] sm:$0xff] %vm1363_vm6, %v1280_v18  ;;  %1486 = vrot.lane.b32.xlu0 %v1987_v48, %s4497_s13  ;;  %v5160_v20 = vld [vmem:[#allocation2 + $0x158] sm:$0xff] }
 0x100   : > { %1678 = vrot.lane.b32.xlu1 %v4840_v53, %s4498_s14  ;;  %621 = vst.msk [vmem:[#allocation3 + $0xe8] sm:$0xff] %vm471_vm0, %v5160_v20 }
 0x101   : > { %v1858_v21 = vpop.permute.xlu0 %1857  ;;  %v2049_v22 = vpop.permute.xlu1 %2048 }
 0x102   : > { %1949 = vst.msk [vmem:[#allocation3 + $0x28] sm:$0xff] %vm1943_vm9, %v1858_v21 }
 0x103   : > { %2141 = vst.msk [vmem:[#allocation3 + $0x20] sm:$0xff] %vm2136_vm10, %v2049_v22  ;;  %911 = vrot.lane.b32.xlu0 %v1987_v48, %s4493_s27 }
 0x104   : > { %1102 = vrot.lane.b32.xlu1 %v4840_v53, %s4495_s29 }
 0x105   : > { %v705_v24 = vpop.permute.xlu0 %704  ;;  %v1282_v25 = vpop.permute.xlu1 %1281 }
 0x106   : > { %793 = vst.msk [vmem:[#allocation3 + $0x40] sm:$0xff] %vm784_vm3, %v705_v24  ;;  %v1992_v24 = vld [vmem:[#allocation2 + $0xf2] sm:$0xff] }
 0x107   : > { %1371 = vst.msk [vmem:[#allocation3 + $0x38] sm:$0xff] %vm1363_vm6, %v1282_v25  ;;  %1680 = vrot.lane.b32.xlu0 %v4852_v56, %s4498_s14 }
 0x108   : > { %1871 = vrot.lane.b32.xlu1 %v1795_v23, %s4499_s15 }
 0x109   : > { %v1473_v28 = vpop.permute.xlu0 %1472  ;;  %v2051_v29 = vpop.permute.xlu1 %2050 }
 0x10a   : > { %v2173_v53 = vld [vmem:[#allocation3 + $0x20] sm:$0xff]  ;;  %1563 = vst.msk [vmem:[#allocation3 + $0x30] sm:$0xff] %vm1556_vm7, %v1473_v28 }
 0x10b   : > { %2142 = vst.msk [vmem:[#allocation3 + $0x28] sm:$0xff] %vm2136_vm10, %v2051_v29  ;;  %4364 = vmatprep.mubr.msk.f32.mxu0 %vm2206_vm11, %v2173_v53  ;;  %1104 = vrot.lane.b32.xlu0 %v4852_v56, %s4495_s29  ;;  %v1989_v56 = vld [vmem:[#allocation2 + $0xca] sm:$0xff] }
 0x10c   : > { %1295 = vrot.lane.b32.xlu1 %v1795_v23, %s4496_s30 }
 0x10d   : > { %v707_v32 = vpop.permute.xlu0 %706  ;;  %v898_v36 = vpop.permute.xlu1 %897 }
 0x10e   : > { %794 = vst.msk [vmem:[#allocation3 + $0x48] sm:$0xff] %vm784_vm3, %v707_v32 }
 0x10f   : > { %986 = vst.msk [vmem:[#allocation3 + $0x40] sm:$0xff] %vm977_vm4, %v898_v36  ;;  %1873 = vrot.lane.b32.xlu0 %v1796_v30, %s4499_s15  ;;  %v467_v36 = vld [vmem:[%s4699_s26 + $0xe0] sm:$0xff] }
 0x110   : > { %2064 = vrot.lane.b32.xlu1 %v1988_v31, %s4500_s16  ;;  %556 = vst.msk [vmem:[#allocation2 + $0x169] sm:$0xff] %vm471_vm0, %v467_v36 }
 0x111   : > { %v1475_v33 = vpop.permute.xlu0 %1474  ;;  %v1667_v37 = vpop.permute.xlu1 %1666 }
 0x112   : > { %v2174_v38 = vld [vmem:[#allocation3 + $0x28] sm:$0xff]  ;;  %1564 = vst.msk [vmem:[#allocation3 + $0x38] sm:$0xff] %vm1556_vm7, %v1475_v33 }
 0x113   : > { %1757 = vst.msk [vmem:[#allocation3 + $0x30] sm:$0xff] %vm1750_vm8, %v1667_v37  ;;  %4365 = vmatmul.mubr.msk.f32.gmra.mxu0 %vm2206_vm11, %v2174_v38  ;;  %720 = vrot.lane.b32.xlu0 %v1795_v23, %s4494_s28  ;;  %v1800_v23 = vld [vmem:[#allocation2 + $0xf9] sm:$0xff] }
 0x114   : > { %1297 = vrot.lane.b32.xlu1 %v1796_v30, %s4496_s30 }
 0x115   : > { %v900_v39 = vpop.permute.xlu0 %899  ;;  %v1091_v40 = vpop.permute.xlu1 %1090 }
 0x116   : > { %987 = vst.msk [vmem:[#allocation3 + $0x48] sm:$0xff] %vm977_vm4, %v900_v39 }
 0x117   : > { %1179 = vst.msk [vmem:[#allocation3 + $0x40] sm:$0xff] %vm1170_vm5, %v1091_v40  ;;  %1488 = vrot.lane.b32.xlu0 %v1988_v31, %s4497_s13  ;;  %v5194_v39 = vld [vmem:[#allocation2 + $0x168] sm:$0xff] }
 0x118   : > { %2066 = vrot.lane.b32.xlu1 %v1989_v56, %s4500_s16  ;;  %v468_v40 = vld [vmem:[%s4699_s26 + $0xe8] sm:$0xff]  ;;  %622 = vst.msk [vmem:[#allocation3 + $0xf0] sm:$0xff] %vm471_vm0, %v5194_v39 }
 0x119   : > { %v1669_v42 = vpop.permute.xlu0 %1668  ;;  %v1860_v43 = vpop.permute.xlu1 %1859  ;;  %557 = vst.msk [vmem:[#allocation2 + $0x171] sm:$0xff] %vm471_vm0, %v468_v40 }
 0x11a   : > { %1758 = vst.msk [vmem:[#allocation3 + $0x38] sm:$0xff] %vm1750_vm8, %v1669_v42 }
 0x11b   : > { %1950 = vst.msk [vmem:[#allocation3 + $0x30] sm:$0xff] %vm1943_vm9, %v1860_v43  ;;  %722 = vrot.lane.b32.xlu0 %v1796_v30, %s4494_s28  ;;  %v1801_v43 = vld [vmem:[#allocation2 + $0x109] sm:$0xff] }
 0x11c   : > { %913 = vrot.lane.b32.xlu1 %v1988_v31, %s4493_s27 }
 0x11d   : > { %v1093_v44 = vpop.permute.xlu0 %1092  ;;  %v1284_v35 = vpop.permute.xlu1 %1283 }
 0x11e   : > { %1180 = vst.msk [vmem:[#allocation3 + $0x48] sm:$0xff] %vm1170_vm5, %v1093_v44 }
 0x11f   : > { %1372 = vst.msk [vmem:[#allocation3 + $0x40] sm:$0xff] %vm1363_vm6, %v1284_v35  ;;  %1490 = vrot.lane.b32.xlu0 %v1989_v56, %s4497_s13 }
 0x120   : > { %1682 = vrot.lane.b32.xlu1 %v4875_v2, %s4498_s14  ;;  %v5210_v47 = vld [vmem:[#allocation2 + $0x170] sm:$0xff] }
 0x121   : > { %v1862_v49 = vpop.permute.xlu0 %1861  ;;  %v2053_v50 = vpop.permute.xlu1 %2052  ;;  %623 = vst.msk [vmem:[#allocation3 + $0xf8] sm:$0xff] %vm471_vm0, %v5210_v47 }
 0x122   : > { %1951 = vst.msk [vmem:[#allocation3 + $0x38] sm:$0xff] %vm1943_vm9, %v1862_v49 }
 0x123   : > { %2143 = vst.msk [vmem:[#allocation3 + $0x30] sm:$0xff] %vm2136_vm10, %v2053_v50  ;;  %915 = vrot.lane.b32.xlu0 %v1989_v56, %s4493_s27 }
 0x124   : > { %1106 = vrot.lane.b32.xlu1 %v4875_v2, %s4495_s29 }
 0x125   : > { %v709_v52 = vpop.permute.xlu0 %708  ;;  %v1286_v54 = vpop.permute.xlu1 %1285 }
 0x126   : > { %795 = vst.msk [vmem:[#allocation3 + $0x50] sm:$0xff] %vm784_vm3, %v709_v52  ;;  %v1994_v52 = vld [vmem:[#allocation2 + $0x10a] sm:$0xff] }
 0x127   : > { %1373 = vst.msk [vmem:[#allocation3 + $0x48] sm:$0xff] %vm1363_vm6, %v1286_v54  ;;  %1684 = vrot.lane.b32.xlu0 %v4892_v9, %s4498_s14 }
 0x128   : > { %1875 = vrot.lane.b32.xlu1 %v1797_v51, %s4499_s15 }
 0x129   : > { %v1477_v58 = vpop.permute.xlu0 %1476  ;;  %v2055_v59 = vpop.permute.xlu1 %2054 }
 0x12a   : > { %v2175_v2 = vld [vmem:[#allocation3 + $0x30] sm:$0xff]  ;;  %1565 = vst.msk [vmem:[#allocation3 + $0x40] sm:$0xff] %vm1556_vm7, %v1477_v58 }
 0x12b   : > { %2144 = vst.msk [vmem:[#allocation3 + $0x38] sm:$0xff] %vm2136_vm10, %v2055_v59  ;;  %4367 = vmatprep.mubr.msk.f32.mxu0 %vm2206_vm11, %v2175_v2  ;;  %1108 = vrot.lane.b32.xlu0 %v4892_v9, %s4495_s29  ;;  %v1991_v9 = vld [vmem:[#allocation2 + $0xe2] sm:$0xff] }
 0x12c   : > { %1299 = vrot.lane.b32.xlu1 %v1797_v51, %s4496_s30 }
 0x12d   : > { %v711_v62 = vpop.permute.xlu0 %710  ;;  %v902_v1 = vpop.permute.xlu1 %901 }
 0x12e   : > { %796 = vst.msk [vmem:[#allocation3 + $0x58] sm:$0xff] %vm784_vm3, %v711_v62 }
 0x12f   : > { %988 = vst.msk [vmem:[#allocation3 + $0x50] sm:$0xff] %vm977_vm4, %v902_v1  ;;  %1877 = vrot.lane.b32.xlu0 %v1798_v60, %s4499_s15  ;;  %v469_v1 = vld [vmem:[%s4699_s26 + $0xf0] sm:$0xff] }
 0x130   : > { %2068 = vrot.lane.b32.xlu1 %v1990_v61, %s4500_s16  ;;  %558 = vst.msk [vmem:[#allocation2 + $0x181] sm:$0xff] %vm471_vm0, %v469_v1 }
 0x131   : > { %v1479_v3 = vpop.permute.xlu0 %1478  ;;  %v1671_v45 = vpop.permute.xlu1 %1670 }
 0x132   : > { %v2176_v4 = vld [vmem:[#allocation3 + $0x38] sm:$0xff]  ;;  %1566 = vst.msk [vmem:[#allocation3 + $0x48] sm:$0xff] %vm1556_vm7, %v1479_v3 }
 0x133   : > { %1759 = vst.msk [vmem:[#allocation3 + $0x40] sm:$0xff] %vm1750_vm8, %v1671_v45  ;;  %4368 = vmatmul.mubr.msk.f32.gmra.mxu0 %vm2206_vm11, %v2176_v4  ;;  %724 = vrot.lane.b32.xlu0 %v1797_v51, %s4494_s28  ;;  %v1802_v51 = vld [vmem:[#allocation2 + $0x111] sm:$0xff] }
 0x134   : > { %1301 = vrot.lane.b32.xlu1 %v1798_v60, %s4496_s30 }
 0x135   : > { %v904_v5 = vpop.permute.xlu0 %903  ;;  %v1095_v6 = vpop.permute.xlu1 %1094 }
 0x136   : > { %989 = vst.msk [vmem:[#allocation3 + $0x58] sm:$0xff] %vm977_vm4, %v904_v5  ;;  %v470_v5 = vld [vmem:[%s4699_s26 + $0xf8] sm:$0xff] }
 0x137   : > { %1181 = vst.msk [vmem:[#allocation3 + $0x50] sm:$0xff] %vm1170_vm5, %v1095_v6  ;;  %1492 = vrot.lane.b32.xlu0 %v1990_v61, %s4497_s13 }
 0x138   : > { %2070 = vrot.lane.b32.xlu1 %v1991_v9, %s4500_s16  ;;  %559 = vst.msk [vmem:[#allocation2 + $0x189] sm:$0xff] %vm471_vm0, %v470_v5  ;;  %vm3179_vm0 = vcmask 261312  }
 0x139   : > { %v1673_v8 = vpop.permute.xlu0 %1672  ;;  %v1864_v10 = vpop.permute.xlu1 %1863 }
 0x13a   : > { %1760 = vst.msk [vmem:[#allocation3 + $0x48] sm:$0xff] %vm1750_vm8, %v1673_v8  ;;  %v1803_v8 = vld [vmem:[#allocation2 + $0x121] sm:$0xff] }
 0x13b   : > { %1952 = vst.msk [vmem:[#allocation3 + $0x40] sm:$0xff] %vm1943_vm9, %v1864_v10  ;;  %726 = vrot.lane.b32.xlu0 %v1798_v60, %s4494_s28 }
 0x13c   : > { %917 = vrot.lane.b32.xlu1 %v1990_v61, %s4493_s27 }
 0x13d   : > { %v1097_v11 = vpop.permute.xlu0 %1096 }
 0x13e   : > { %v1288_v48 = vpop.permute.xlu1 %1287  ;;  %1182 = vst.msk [vmem:[#allocation3 + $0x58] sm:$0xff] %vm1170_vm5, %v1097_v11 }
 0x13f   : > { %1374 = vst.msk [vmem:[#allocation3 + $0x50] sm:$0xff] %vm1363_vm6, %v1288_v48  ;;  %1494 = vrot.lane.b32.xlu0 %v1991_v9, %s4497_s13 }
 0x140   : > { %1686 = vrot.lane.b32.xlu1 %v4924_v26, %s4498_s14 }
 0x141   : > { %v1866_v14 = vpop.permute.xlu0 %1865 }
 0x142   : > { %v2057_v15 = vpop.permute.xlu1 %2056  ;;  %1953 = vst.msk [vmem:[#allocation3 + $0x48] sm:$0xff] %vm1943_vm9, %v1866_v14 }
 0x143   : > { %2145 = vst.msk [vmem:[#allocation3 + $0x40] sm:$0xff] %vm2136_vm10, %v2057_v15  ;;  %919 = vrot.lane.b32.xlu0 %v1991_v9, %s4493_s27  ;;  %v1996_v15 = vld [vmem:[#allocation2 + $0x122] sm:$0xff] }
 0x144   : > { %1110 = vrot.lane.b32.xlu1 %v4924_v26, %s4495_s29 }
 0x145   : > { %v713_v17 = vpop.permute.xlu0 %712 }
 0x146   : > { %v1290_v18 = vpop.permute.xlu1 %1289  ;;  %797 = vst.msk [vmem:[#allocation3 + $0x60] sm:$0xff] %vm784_vm3, %v713_v17 }
 0x147   : > { %1375 = vst.msk [vmem:[#allocation3 + $0x58] sm:$0xff] %vm1363_vm6, %v1290_v18  ;;  %1688 = vrot.lane.b32.xlu0 %v4940_v34, %s4498_s14 }
 0x148   : > { %1879 = vrot.lane.b32.xlu1 %v1799_v16, %s4499_s15 }
 0x149   : > { %v1481_v21 = vpop.permute.xlu0 %1480 }
 0x14a   : > { %v2059_v22 = vpop.permute.xlu1 %2058  ;;  %v2177_v26 = vld [vmem:[#allocation3 + $0x40] sm:$0xff]  ;;  %1567 = vst.msk [vmem:[#allocation3 + $0x50] sm:$0xff] %vm1556_vm7, %v1481_v21 }
 0x14b   : > { %2146 = vst.msk [vmem:[#allocation3 + $0x48] sm:$0xff] %vm2136_vm10, %v2059_v22  ;;  %4370 = vmatprep.mubr.msk.f32.mxu0 %vm2206_vm11, %v2177_v26  ;;  %1112 = vrot.lane.b32.xlu0 %v4940_v34, %s4495_s29  ;;  %v1993_v34 = vld [vmem:[#allocation2 + $0xfa] sm:$0xff] }
 0x14c   : > { %1303 = vrot.lane.b32.xlu1 %v1799_v16, %s4496_s30 }
 0x14d   : > { %v715_v25 = vpop.permute.xlu0 %714 }
 0x14e   : > { %v906_v28 = vpop.permute.xlu1 %905  ;;  %798 = vst.msk [vmem:[#allocation3 + $0x68] sm:$0xff] %vm784_vm3, %v715_v25 }
 0x14f   : > { %990 = vst.msk [vmem:[#allocation3 + $0x60] sm:$0xff] %vm977_vm4, %v906_v28  ;;  %1881 = vrot.lane.b32.xlu0 %v1800_v23, %s4499_s15 }
 0x150   : > { %2072 = vrot.lane.b32.xlu1 %v1992_v24, %s4500_s16 }
 0x151   : > { %v1483_v29 = vpop.permute.xlu0 %1482 }
 0x152   : > { %v1675_v53 = vpop.permute.xlu1 %1674  ;;  %v2178_v30 = vld [vmem:[#allocation3 + $0x48] sm:$0xff]  ;;  %1568 = vst.msk [vmem:[#allocation3 + $0x58] sm:$0xff] %vm1556_vm7, %v1483_v29 }
 0x153   : > { %1761 = vst.msk [vmem:[#allocation3 + $0x50] sm:$0xff] %vm1750_vm8, %v1675_v53  ;;  %4371 = vmatmul.mubr.msk.f32.gmra.mxu0 %vm2206_vm11, %v2178_v30  ;;  %728 = vrot.lane.b32.xlu0 %v1799_v16, %s4494_s28 }
 0x154   : > { %1305 = vrot.lane.b32.xlu1 %v1800_v23, %s4496_s30 }
 0x155   : > { %v908_v31 = vpop.permute.xlu0 %907 }
 0x156   : > { %v1099_v32 = vpop.permute.xlu1 %1098  ;;  %991 = vst.msk [vmem:[#allocation3 + $0x68] sm:$0xff] %vm977_vm4, %v908_v31 }
 0x157   : > { %1183 = vst.msk [vmem:[#allocation3 + $0x60] sm:$0xff] %vm1170_vm5, %v1099_v32  ;;  %1496 = vrot.lane.b32.xlu0 %v1992_v24, %s4497_s13 }
 0x158   : > { %2074 = vrot.lane.b32.xlu1 %v1993_v34, %s4500_s16 }
 0x159   : > { %v1677_v33 = vpop.permute.xlu0 %1676 }
 0x15a   : > { %v1868_v37 = vpop.permute.xlu1 %1867  ;;  %1762 = vst.msk [vmem:[#allocation3 + $0x58] sm:$0xff] %vm1750_vm8, %v1677_v33 }
 0x15b   : > { %1954 = vst.msk [vmem:[#allocation3 + $0x50] sm:$0xff] %vm1943_vm9, %v1868_v37  ;;  %730 = vrot.lane.b32.xlu0 %v1800_v23, %s4494_s28 }
 0x15c   : > { %921 = vrot.lane.b32.xlu1 %v1992_v24, %s4493_s27 }
 0x15d   : > { %v1101_v38 = vpop.permute.xlu0 %1100 }
 0x15e   : > { %v1292_v56 = vpop.permute.xlu1 %1291  ;;  %1184 = vst.msk [vmem:[#allocation3 + $0x68] sm:$0xff] %vm1170_vm5, %v1101_v38  ;;  %v1998_v38 = vld [vmem:[#allocation2 + $0x13a] sm:$0xff] }
 0x15f   : > { %1376 = vst.msk [vmem:[#allocation3 + $0x60] sm:$0xff] %vm1363_vm6, %v1292_v56  ;;  %1498 = vrot.lane.b32.xlu0 %v1993_v34, %s4497_s13 }
 0x160   : > { %1690 = vrot.lane.b32.xlu1 %v4974_v55, %s4498_s14 }
 0x161   : > { %v1870_v41 = vpop.permute.xlu0 %1869 }
 0x162   : > { %v2061_v42 = vpop.permute.xlu1 %2060  ;;  %1955 = vst.msk [vmem:[#allocation3 + $0x58] sm:$0xff] %vm1943_vm9, %v1870_v41 }
 0x163   : > { %2147 = vst.msk [vmem:[#allocation3 + $0x50] sm:$0xff] %vm2136_vm10, %v2061_v42  ;;  %923 = vrot.lane.b32.xlu0 %v1993_v34, %s4493_s27  ;;  %v1805_v34 = vld [vmem:[#allocation2 + $0x139] sm:$0xff] }
 0x164   : > { %1114 = vrot.lane.b32.xlu1 %v4974_v55, %s4495_s29 }
 0x165   : > { %v717_v44 = vpop.permute.xlu0 %716 }
 0x166   : > { %v1294_v35 = vpop.permute.xlu1 %1293  ;;  %799 = vst.msk [vmem:[#allocation3 + $0x70] sm:$0xff] %vm784_vm3, %v717_v44 }
 0x167   : > { %1377 = vst.msk [vmem:[#allocation3 + $0x68] sm:$0xff] %vm1363_vm6, %v1294_v35  ;;  %1692 = vrot.lane.b32.xlu0 %v4990_v63, %s4498_s14 }
 0x168   : > { %1883 = vrot.lane.b32.xlu1 %v1801_v43, %s4499_s15 }
 0x169   : > { %v1485_v49 = vpop.permute.xlu0 %1484 }
 0x16a   : > { %v2063_v50 = vpop.permute.xlu1 %2062  ;;  %v2179_v55 = vld [vmem:[#allocation3 + $0x50] sm:$0xff]  ;;  %1569 = vst.msk [vmem:[#allocation3 + $0x60] sm:$0xff] %vm1556_vm7, %v1485_v49 }
 0x16b   : > { %2148 = vst.msk [vmem:[#allocation3 + $0x58] sm:$0xff] %vm2136_vm10, %v2063_v50  ;;  %4373 = vmatprep.mubr.msk.f32.mxu0 %vm2206_vm11, %v2179_v55  ;;  %1116 = vrot.lane.b32.xlu0 %v4990_v63, %s4495_s29  ;;  %v1995_v63 = vld [vmem:[#allocation2 + $0x112] sm:$0xff] }
 0x16c   : > { %1307 = vrot.lane.b32.xlu1 %v1801_v43, %s4496_s30 }
 0x16d   : > { %v719_v54 = vpop.permute.xlu0 %718 }
 0x16e   : > { %v910_v58 = vpop.permute.xlu1 %909  ;;  %800 = vst.msk [vmem:[#allocation3 + $0x78] sm:$0xff] %vm784_vm3, %v719_v54 }
 0x16f   : > { %992 = vst.msk [vmem:[#allocation3 + $0x70] sm:$0xff] %vm977_vm4, %v910_v58  ;;  %1885 = vrot.lane.b32.xlu0 %v1802_v51, %s4499_s15  ;;  %v1807_v58 = vld [vmem:[#allocation2 + $0x151] sm:$0xff] }
 0x170   : > { %2076 = vrot.lane.b32.xlu1 %v1994_v52, %s4500_s16 }
 0x171   : > { %v1487_v59 = vpop.permute.xlu0 %1486 }
 0x172   : > { %v1679_v2 = vpop.permute.xlu1 %1678  ;;  %v2180_v60 = vld [vmem:[#allocation3 + $0x58] sm:$0xff]  ;;  %1570 = vst.msk [vmem:[#allocation3 + $0x68] sm:$0xff] %vm1556_vm7, %v1487_v59 }
 0x173   : > { %1763 = vst.msk [vmem:[#allocation3 + $0x60] sm:$0xff] %vm1750_vm8, %v1679_v2  ;;  %4374 = vmatmul.mubr.msk.f32.gmra.mxu0 %vm2206_vm11, %v2180_v60  ;;  %732 = vrot.lane.b32.xlu0 %v1801_v43, %s4494_s28 }
 0x174   : > { %1309 = vrot.lane.b32.xlu1 %v1802_v51, %s4496_s30 }
 0x175   : > { %v912_v61 = vpop.permute.xlu0 %911 }
 0x176   : > { %v1103_v62 = vpop.permute.xlu1 %1102  ;;  %993 = vst.msk [vmem:[#allocation3 + $0x78] sm:$0xff] %vm977_vm4, %v912_v61 }
 0x177   : > { %1185 = vst.msk [vmem:[#allocation3 + $0x70] sm:$0xff] %vm1170_vm5, %v1103_v62  ;;  %1500 = vrot.lane.b32.xlu0 %v1994_v52, %s4497_s13  ;;  %v2000_v62 = vld [vmem:[#allocation2 + $0x152] sm:$0xff] }
 0x178   : > { %2078 = vrot.lane.b32.xlu1 %v1995_v63, %s4500_s16 }
 0x179   : > { %v1681_v3 = vpop.permute.xlu0 %1680 }
 0x17a   : > { %v1872_v45 = vpop.permute.xlu1 %1871  ;;  %1764 = vst.msk [vmem:[#allocation3 + $0x68] sm:$0xff] %vm1750_vm8, %v1681_v3 }
 0x17b   : > { %1956 = vst.msk [vmem:[#allocation3 + $0x60] sm:$0xff] %vm1943_vm9, %v1872_v45  ;;  %734 = vrot.lane.b32.xlu0 %v1802_v51, %s4494_s28 }
 0x17c   : > { %925 = vrot.lane.b32.xlu1 %v1994_v52, %s4493_s27 }
 0x17d   : > { %v1105_v4 = vpop.permute.xlu0 %1104 }
 0x17e   : > { %v1296_v9 = vpop.permute.xlu1 %1295  ;;  %1186 = vst.msk [vmem:[#allocation3 + $0x78] sm:$0xff] %vm1170_vm5, %v1105_v4 }
 0x17f   : > { %1378 = vst.msk [vmem:[#allocation3 + $0x70] sm:$0xff] %vm1363_vm6, %v1296_v9  ;;  %1502 = vrot.lane.b32.xlu0 %v1995_v63, %s4497_s13 }
 0x180   : > { %1694 = vrot.lane.b32.xlu1 %v5024_v19, %s4498_s14 }
 0x181   : > { %v1874_v6 = vpop.permute.xlu0 %1873 }
 0x182   : > { %v2065_v7 = vpop.permute.xlu1 %2064  ;;  %1957 = vst.msk [vmem:[#allocation3 + $0x68] sm:$0xff] %vm1943_vm9, %v1874_v6 }
 0x183   : > { %2149 = vst.msk [vmem:[#allocation3 + $0x60] sm:$0xff] %vm2136_vm10, %v2065_v7  ;;  %927 = vrot.lane.b32.xlu0 %v1995_v63, %s4493_s27 }
 0x184   : > { %1118 = vrot.lane.b32.xlu1 %v5024_v19, %s4495_s29  ;;  %v1804_v19 = vld [vmem:[#allocation2 + $0x129] sm:$0xff] }
 0x185   : > { %v721_v10 = vpop.permute.xlu0 %720 }
 0x186   : > { %v1298_v11 = vpop.permute.xlu1 %1297  ;;  %801 = vst.msk [vmem:[#allocation3 + $0x80] sm:$0xff] %vm784_vm3, %v721_v10 }
 0x187   : > { %1379 = vst.msk [vmem:[#allocation3 + $0x78] sm:$0xff] %vm1363_vm6, %v1298_v11  ;;  %1696 = vrot.lane.b32.xlu0 %v5040_v27, %s4498_s14 }
 0x188   : > { %1887 = vrot.lane.b32.xlu1 %v1803_v8, %s4499_s15 }
 0x189   : > { %v1489_v48 = vpop.permute.xlu0 %1488 }
 0x18a   : > { %v2067_v13 = vpop.permute.xlu1 %2066  ;;  %v2181_v14 = vld [vmem:[#allocation3 + $0x60] sm:$0xff]  ;;  %1571 = vst.msk [vmem:[#allocation3 + $0x70] sm:$0xff] %vm1556_vm7, %v1489_v48 }
 0x18b   : > { %2150 = vst.msk [vmem:[#allocation3 + $0x68] sm:$0xff] %vm2136_vm10, %v2067_v13  ;;  %4376 = vmatprep.mubr.msk.f32.mxu0 %vm2206_vm11, %v2181_v14  ;;  %1120 = vrot.lane.b32.xlu0 %v5040_v27, %s4495_s29  ;;  %v1997_v27 = vld [vmem:[#allocation2 + $0x12a] sm:$0xff] }
 0x18c   : > { %1311 = vrot.lane.b32.xlu1 %v1803_v8, %s4496_s30  ;;  %v1809_v14 = vld [vmem:[#allocation2 + $0x169] sm:$0xff] }
 0x18d   : > { %v723_v16 = vpop.permute.xlu0 %722 }
 0x18e   : > { %v914_v17 = vpop.permute.xlu1 %913  ;;  %802 = vst.msk [vmem:[#allocation3 + $0x88] sm:$0xff] %vm784_vm3, %v723_v16 }
 0x18f   : > { %994 = vst.msk [vmem:[#allocation3 + $0x80] sm:$0xff] %vm977_vm4, %v914_v17  ;;  %1889 = vrot.lane.b32.xlu0 %v1804_v19, %s4499_s15 }
 0x190   : > { %2080 = vrot.lane.b32.xlu1 %v1996_v15, %s4500_s16 }
 0x191   : > { %v1491_v18 = vpop.permute.xlu0 %1490 }
 0x192   : > { %v1683_v21 = vpop.permute.xlu1 %1682  ;;  %v2182_v22 = vld [vmem:[#allocation3 + $0x68] sm:$0xff]  ;;  %1572 = vst.msk [vmem:[#allocation3 + $0x78] sm:$0xff] %vm1556_vm7, %v1491_v18 }
 0x193   : > { %1765 = vst.msk [vmem:[#allocation3 + $0x70] sm:$0xff] %vm1750_vm8, %v1683_v21  ;;  %4377 = vmatmul.mubr.msk.f32.gmra.mxu0 %vm2206_vm11, %v2182_v22  ;;  %736 = vrot.lane.b32.xlu0 %v1803_v8, %s4494_s28  ;;  %v2002_v21 = vld [vmem:[#allocation2 + $0x16a] sm:$0xff] }
 0x194   : > { %1313 = vrot.lane.b32.xlu1 %v1804_v19, %s4496_s30 }
 0x195   : > { %v916_v26 = vpop.permute.xlu0 %915 }
 0x196   : > { %v1107_v23 = vpop.permute.xlu1 %1106  ;;  %995 = vst.msk [vmem:[#allocation3 + $0x88] sm:$0xff] %vm977_vm4, %v916_v26 }
 0x197   : > { %1187 = vst.msk [vmem:[#allocation3 + $0x80] sm:$0xff] %vm1170_vm5, %v1107_v23  ;;  %1504 = vrot.lane.b32.xlu0 %v1996_v15, %s4497_s13 }
 0x198   : > { %2082 = vrot.lane.b32.xlu1 %v1997_v27, %s4500_s16 }
 0x199   : > { %v1685_v24 = vpop.permute.xlu0 %1684 }
 0x19a   : > { %v1876_v25 = vpop.permute.xlu1 %1875  ;;  %1766 = vst.msk [vmem:[#allocation3 + $0x78] sm:$0xff] %vm1750_vm8, %v1685_v24 }
 0x19b   : > { %1958 = vst.msk [vmem:[#allocation3 + $0x70] sm:$0xff] %vm1943_vm9, %v1876_v25  ;;  %738 = vrot.lane.b32.xlu0 %v1804_v19, %s4494_s28 }
 0x19c   : > { %929 = vrot.lane.b32.xlu1 %v1996_v15, %s4493_s27 }
 0x19d   : > { %v1109_v28 = vpop.permute.xlu0 %1108 }
 0x19e   : > { %v1300_v29 = vpop.permute.xlu1 %1299  ;;  %1188 = vst.msk [vmem:[#allocation3 + $0x88] sm:$0xff] %vm1170_vm5, %v1109_v28 }
 0x19f   : > { %1380 = vst.msk [vmem:[#allocation3 + $0x80] sm:$0xff] %vm1363_vm6, %v1300_v29  ;;  %1506 = vrot.lane.b32.xlu0 %v1997_v27, %s4497_s13 }
 0x1a0   : > { %1698 = vrot.lane.b32.xlu1 %v5094_v46, %s4498_s14 }
 0x1a1   : > { %v1878_v53 = vpop.permute.xlu0 %1877 }
 0x1a2   : > { %v2069_v30 = vpop.permute.xlu1 %2068  ;;  %1959 = vst.msk [vmem:[#allocation3 + $0x78] sm:$0xff] %vm1943_vm9, %v1878_v53 }
 0x1a3   : > { %2151 = vst.msk [vmem:[#allocation3 + $0x70] sm:$0xff] %vm2136_vm10, %v2069_v30  ;;  %931 = vrot.lane.b32.xlu0 %v1997_v27, %s4493_s27  ;;  %v1618_v30 = vld [vmem:[#allocation2 + $0x180] sm:$0xff] }
 0x1a4   : > { %1122 = vrot.lane.b32.xlu1 %v5094_v46, %s4495_s29  ;;  %v1806_v46 = vld [vmem:[#allocation2 + $0x141] sm:$0xff] }
 0x1a5   : > { %v725_v31 = vpop.permute.xlu0 %724 }
 0x1a6   : > { %v1302_v32 = vpop.permute.xlu1 %1301  ;;  %803 = vst.msk [vmem:[#allocation3 + $0x90] sm:$0xff] %vm784_vm3, %v725_v31 }
 0x1a7   : > { %1381 = vst.msk [vmem:[#allocation3 + $0x88] sm:$0xff] %vm1363_vm6, %v1302_v32  ;;  %1700 = vrot.lane.b32.xlu0 %v5110_v57, %s4498_s14 }
 0x1a8   : > { %1891 = vrot.lane.b32.xlu1 %v1805_v34, %s4499_s15 }
 0x1a9   : > { %v1493_v36 = vpop.permute.xlu0 %1492 }
 0x1aa   : > { %v2071_v33 = vpop.permute.xlu1 %2070  ;;  %v2183_v37 = vld [vmem:[#allocation3 + $0x70] sm:$0xff]  ;;  %1573 = vst.msk [vmem:[#allocation3 + $0x80] sm:$0xff] %vm1556_vm7, %v1493_v36 }
 0x1ab   : > { %2152 = vst.msk [vmem:[#allocation3 + $0x78] sm:$0xff] %vm2136_vm10, %v2071_v33  ;;  %4379 = vmatprep.mubr.msk.f32.mxu0 %vm2206_vm11, %v2183_v37  ;;  %1124 = vrot.lane.b32.xlu0 %v5110_v57, %s4495_s29  ;;  %v1999_v57 = vld [vmem:[#allocation2 + $0x142] sm:$0xff] }
 0x1ac   : > { %1315 = vrot.lane.b32.xlu1 %v1805_v34, %s4496_s30  ;;  %v1619_v33 = vld [vmem:[#allocation2 + $0x188] sm:$0xff] }
 0x1ad   : > { %v727_v56 = vpop.permute.xlu0 %726  ;;  %v1811_v37 = vld [vmem:[#allocation2 + $0x181] sm:$0xff] }
 0x1ae   : > { %v918_v40 = vpop.permute.xlu1 %917  ;;  %804 = vst.msk [vmem:[#allocation3 + $0x98] sm:$0xff] %vm784_vm3, %v727_v56 }
 0x1af   : > { %996 = vst.msk [vmem:[#allocation3 + $0x90] sm:$0xff] %vm977_vm4, %v918_v40  ;;  %1893 = vrot.lane.b32.xlu0 %v1806_v46, %s4499_s15 }
 0x1b0   : > { %2084 = vrot.lane.b32.xlu1 %v1998_v38, %s4500_s16 }
 0x1b1   : > { %v1495_v41 = vpop.permute.xlu0 %1494 }
 0x1b2   : > { %v1687_v42 = vpop.permute.xlu1 %1686  ;;  %v2184_v43 = vld [vmem:[#allocation3 + $0x78] sm:$0xff]  ;;  %1574 = vst.msk [vmem:[#allocation3 + $0x88] sm:$0xff] %vm1556_vm7, %v1495_v41 }
 0x1b3   : > { %1767 = vst.msk [vmem:[#allocation3 + $0x80] sm:$0xff] %vm1750_vm8, %v1687_v42  ;;  %4380 = vmatmul.mubr.msk.f32.gmra.mxu0 %vm2206_vm11, %v2184_v43  ;;  %740 = vrot.lane.b32.xlu0 %v1805_v34, %s4494_s28  ;;  %v1812_v42 = vld [vmem:[#allocation2 + $0x189] sm:$0xff] }
 0x1b4   : > { %1317 = vrot.lane.b32.xlu1 %v1806_v46, %s4496_s30  ;;  %v2004_v43 = vld [vmem:[#allocation2 + $0x182] sm:$0xff] }
 0x1b5   : > { %v920_v44 = vpop.permute.xlu0 %919 }
 0x1b6   : > { %v1111_v35 = vpop.permute.xlu1 %1110  ;;  %997 = vst.msk [vmem:[#allocation3 + $0x98] sm:$0xff] %vm977_vm4, %v920_v44 }
 0x1b7   : > { %1189 = vst.msk [vmem:[#allocation3 + $0x90] sm:$0xff] %vm1170_vm5, %v1111_v35  ;;  %1508 = vrot.lane.b32.xlu0 %v1998_v38, %s4497_s13 }
 0x1b8   : > { %2086 = vrot.lane.b32.xlu1 %v1999_v57, %s4500_s16 }
 0x1b9   : > { %v1689_v49 = vpop.permute.xlu0 %1688 }
 0x1ba   : > { %v1880_v50 = vpop.permute.xlu1 %1879  ;;  %1768 = vst.msk [vmem:[#allocation3 + $0x88] sm:$0xff] %vm1750_vm8, %v1689_v49 }
 0x1bb   : > { %1960 = vst.msk [vmem:[#allocation3 + $0x80] sm:$0xff] %vm1943_vm9, %v1880_v50  ;;  %742 = vrot.lane.b32.xlu0 %v1806_v46, %s4494_s28 }
 0x1bc   : > { %933 = vrot.lane.b32.xlu1 %v1998_v38, %s4493_s27 }
 0x1bd   : > { %v1113_v55 = vpop.permute.xlu0 %1112 }
 0x1be   : > { %v1304_v51 = vpop.permute.xlu1 %1303  ;;  %1190 = vst.msk [vmem:[#allocation3 + $0x98] sm:$0xff] %vm1170_vm5, %v1113_v55  ;;  %v2005_v55 = vld [vmem:[#allocation2 + $0x18a] sm:$0xff] }
 0x1bf   : > { %1382 = vst.msk [vmem:[#allocation3 + $0x90] sm:$0xff] %vm1363_vm6, %v1304_v51  ;;  %1510 = vrot.lane.b32.xlu0 %v1999_v57, %s4497_s13 }
 0x1c0   : > { %1702 = vrot.lane.b32.xlu1 %v5144_v12, %s4498_s14 }
 0x1c1   : > { %v1882_v52 = vpop.permute.xlu0 %1881 }
 0x1c2   : > { %v2073_v54 = vpop.permute.xlu1 %2072  ;;  %1961 = vst.msk [vmem:[#allocation3 + $0x88] sm:$0xff] %vm1943_vm9, %v1882_v52 }
 0x1c3   : > { %2153 = vst.msk [vmem:[#allocation3 + $0x80] sm:$0xff] %vm2136_vm10, %v2073_v54  ;;  %935 = vrot.lane.b32.xlu0 %v1999_v57, %s4493_s27  ;;  %v1620_v54 = vld [vmem:[#allocation2 + $0x198] sm:$0xff] }
 0x1c4   : > { %1126 = vrot.lane.b32.xlu1 %v5144_v12, %s4495_s29  ;;  %v1808_v12 = vld [vmem:[#allocation2 + $0x159] sm:$0xff] }
 0x1c5   : > { %v729_v59 = vpop.permute.xlu0 %728 }
 0x1c6   : > { %v1306_v2 = vpop.permute.xlu1 %1305  ;;  %805 = vst.msk [vmem:[#allocation3 + $0xa0] sm:$0xff] %vm784_vm3, %v729_v59 }
 0x1c7   : > { %1383 = vst.msk [vmem:[#allocation3 + $0x98] sm:$0xff] %vm1363_vm6, %v1306_v2  ;;  %1704 = vrot.lane.b32.xlu0 %v5160_v20, %s4498_s14 }
 0x1c8   : > { %1895 = vrot.lane.b32.xlu1 %v1807_v58, %s4499_s15 }
 0x1c9   : > { %v1497_v60 = vpop.permute.xlu0 %1496 }
 0x1ca   : > { %v2075_v63 = vpop.permute.xlu1 %2074  ;;  %v2185_v61 = vld [vmem:[#allocation3 + $0x80] sm:$0xff]  ;;  %1575 = vst.msk [vmem:[#allocation3 + $0x90] sm:$0xff] %vm1556_vm7, %v1497_v60  ;;  %v1813_v60 = vld [vmem:[#allocation2 + $0x199] sm:$0xff] }
 0x1cb   : > { %2154 = vst.msk [vmem:[#allocation3 + $0x88] sm:$0xff] %vm2136_vm10, %v2075_v63  ;;  %4382 = vmatprep.mubr.msk.f32.mxu0 %vm2206_vm11, %v2185_v61  ;;  %1128 = vrot.lane.b32.xlu0 %v5160_v20, %s4495_s29  ;;  %v2001_v20 = vld [vmem:[#allocation2 + $0x15a] sm:$0xff] }
 0x1cc   : > { %1319 = vrot.lane.b32.xlu1 %v1807_v58, %s4496_s30  ;;  %v1814_v63 = vld [vmem:[#allocation2 + $0x1a1] sm:$0xff] }
 0x1cd   : > { %v731_v1 = vpop.permute.xlu0 %730 }
 0x1ce   : > { %v922_v3 = vpop.permute.xlu1 %921  ;;  %806 = vst.msk [vmem:[#allocation3 + $0xa8] sm:$0xff] %vm784_vm3, %v731_v1  ;;  %v2007_v1 = vld [vmem:[#allocation2 + $0x1a2] sm:$0xff] }
 0x1cf   : > { %998 = vst.msk [vmem:[#allocation3 + $0xa0] sm:$0xff] %vm977_vm4, %v922_v3  ;;  %1897 = vrot.lane.b32.xlu0 %v1808_v12, %s4499_s15 }
 0x1d0   : > { %2088 = vrot.lane.b32.xlu1 %v2000_v62, %s4500_s16 }
 0x1d1   : > { %v1499_v45 = vpop.permute.xlu0 %1498 }
 0x1d2   : > { %v1691_v4 = vpop.permute.xlu1 %1690  ;;  %v2186_v9 = vld [vmem:[#allocation3 + $0x88] sm:$0xff]  ;;  %1576 = vst.msk [vmem:[#allocation3 + $0x98] sm:$0xff] %vm1556_vm7, %v1499_v45 }
 0x1d3   : > { %1769 = vst.msk [vmem:[#allocation3 + $0x90] sm:$0xff] %vm1750_vm8, %v1691_v4  ;;  %4383 = vmatmul.mubr.msk.f32.gmra.mxu0 %vm2206_vm11, %v2186_v9  ;;  %744 = vrot.lane.b32.xlu0 %v1807_v58, %s4494_s28  ;;  %v1621_v58 = vld [vmem:[#allocation2 + $0x1a0] sm:$0xff] }
 0x1d4   : > { %1321 = vrot.lane.b32.xlu1 %v1808_v12, %s4496_s30 }
 0x1d5   : > { %v924_v5 = vpop.permute.xlu0 %923 }
 0x1d6   : > { %v1115_v6 = vpop.permute.xlu1 %1114  ;;  %999 = vst.msk [vmem:[#allocation3 + $0xa8] sm:$0xff] %vm977_vm4, %v924_v5 }
 0x1d7   : > { %1191 = vst.msk [vmem:[#allocation3 + $0xa0] sm:$0xff] %vm1170_vm5, %v1115_v6  ;;  %1512 = vrot.lane.b32.xlu0 %v2000_v62, %s4497_s13 }
 0x1d8   : > { %2090 = vrot.lane.b32.xlu1 %v2001_v20, %s4500_s16 }
 0x1d9   : > { %v1693_v7 = vpop.permute.xlu0 %1692 }
 0x1da   : > { %v1884_v8 = vpop.permute.xlu1 %1883  ;;  %1770 = vst.msk [vmem:[#allocation3 + $0x98] sm:$0xff] %vm1750_vm8, %v1693_v7 }
 0x1db   : > { %1962 = vst.msk [vmem:[#allocation3 + $0x90] sm:$0xff] %vm1943_vm9, %v1884_v8  ;;  %746 = vrot.lane.b32.xlu0 %v1808_v12, %s4494_s28 }
 0x1dc   : > { %937 = vrot.lane.b32.xlu1 %v2000_v62, %s4493_s27  ;;  %v2006_v62 = vld [vmem:[#allocation2 + $0x19a] sm:$0xff] }
 0x1dd   : > { %v1117_v10 = vpop.permute.xlu0 %1116 }
 0x1de   : > { %v1308_v11 = vpop.permute.xlu1 %1307  ;;  %1192 = vst.msk [vmem:[#allocation3 + $0xa8] sm:$0xff] %vm1170_vm5, %v1117_v10 }
 0x1df   : > { %1384 = vst.msk [vmem:[#allocation3 + $0xa0] sm:$0xff] %vm1363_vm6, %v1308_v11  ;;  %1514 = vrot.lane.b32.xlu0 %v2001_v20, %s4497_s13 }
 0x1e0   : > { %1706 = vrot.lane.b32.xlu1 %v5194_v39, %s4498_s14 }
 0x1e1   : > { %v1886_v48 = vpop.permute.xlu0 %1885 }
 0x1e2   : > { %v2077_v13 = vpop.permute.xlu1 %2076  ;;  %1963 = vst.msk [vmem:[#allocation3 + $0x98] sm:$0xff] %vm1943_vm9, %v1886_v48 }
 0x1e3   : > { %2155 = vst.msk [vmem:[#allocation3 + $0x90] sm:$0xff] %vm2136_vm10, %v2077_v13  ;;  %939 = vrot.lane.b32.xlu0 %v2001_v20, %s4493_s27 }
 0x1e4   : > { %1130 = vrot.lane.b32.xlu1 %v5194_v39, %s4495_s29  ;;  %v1810_v39 = vld [vmem:[#allocation2 + $0x171] sm:$0xff] }
 0x1e5   : > { %v733_v19 = vpop.permute.xlu0 %732 }
 0x1e6   : > { %v1310_v15 = vpop.permute.xlu1 %1309  ;;  %807 = vst.msk [vmem:[#allocation3 + $0xb0] sm:$0xff] %vm784_vm3, %v733_v19 }
 0x1e7   : > { %1385 = vst.msk [vmem:[#allocation3 + $0xa8] sm:$0xff] %vm1363_vm6, %v1310_v15  ;;  %1708 = vrot.lane.b32.xlu0 %v5210_v47, %s4498_s14 }
 0x1e8   : > { %1899 = vrot.lane.b32.xlu1 %v1809_v14, %s4499_s15 }
 0x1e9   : > { %v1501_v16 = vpop.permute.xlu0 %1500 }
 0x1ea   : > { %v2079_v17 = vpop.permute.xlu1 %2078  ;;  %v2187_v18 = vld [vmem:[#allocation3 + $0x90] sm:$0xff]  ;;  %1577 = vst.msk [vmem:[#allocation3 + $0xa0] sm:$0xff] %vm1556_vm7, %v1501_v16 }
 0x1eb   : > { %2156 = vst.msk [vmem:[#allocation3 + $0x98] sm:$0xff] %vm2136_vm10, %v2079_v17  ;;  %4385 = vmatprep.mubr.msk.f32.mxu0 %vm2206_vm11, %v2187_v18  ;;  %1132 = vrot.lane.b32.xlu0 %v5210_v47, %s4495_s29  ;;  %v2003_v47 = vld [vmem:[#allocation2 + $0x172] sm:$0xff] }
 0x1ec   : > { %1323 = vrot.lane.b32.xlu1 %v1809_v14, %s4496_s30 }
 0x1ed   : > { %v735_v22 = vpop.permute.xlu0 %734 }
 0x1ee   : > { %v926_v27 = vpop.permute.xlu1 %925  ;;  %808 = vst.msk [vmem:[#allocation3 + $0xb8] sm:$0xff] %vm784_vm3, %v735_v22 }
 0x1ef   : > { %1000 = vst.msk [vmem:[#allocation3 + $0xb0] sm:$0xff] %vm977_vm4, %v926_v27  ;;  %1901 = vrot.lane.b32.xlu0 %v1810_v39, %s4499_s15 }
 0x1f0   : > { %2092 = vrot.lane.b32.xlu1 %v2002_v21, %s4500_s16 }
 0x1f1   : > { %v1503_v26 = vpop.permute.xlu0 %1502 }
 0x1f2   : > { %v1695_v23 = vpop.permute.xlu1 %1694  ;;  %v2188_v24 = vld [vmem:[#allocation3 + $0x98] sm:$0xff]  ;;  %1578 = vst.msk [vmem:[#allocation3 + $0xa8] sm:$0xff] %vm1556_vm7, %v1503_v26 }
 0x1f3   : > { %1771 = vst.msk [vmem:[#allocation3 + $0xa0] sm:$0xff] %vm1750_vm8, %v1695_v23  ;;  %4386 = vmatmul.mubr.msk.f32.gmra.mxu0 %vm2206_vm11, %v2188_v24  ;;  %748 = vrot.lane.b32.xlu0 %v1809_v14, %s4494_s28 }
 0x1f4   : > { %1325 = vrot.lane.b32.xlu1 %v1810_v39, %s4496_s30 }
 0x1f5   : > { %v928_v25 = vpop.permute.xlu0 %927 }
 0x1f6   : > { %v1119_v28 = vpop.permute.xlu1 %1118  ;;  %1001 = vst.msk [vmem:[#allocation3 + $0xb8] sm:$0xff] %vm977_vm4, %v928_v25 }
 0x1f7   : > { %1193 = vst.msk [vmem:[#allocation3 + $0xb0] sm:$0xff] %vm1170_vm5, %v1119_v28  ;;  %1516 = vrot.lane.b32.xlu0 %v2002_v21, %s4497_s13 }
 0x1f8   : > { %2094 = vrot.lane.b32.xlu1 %v2003_v47, %s4500_s16 }
 0x1f9   : > { %v1697_v29 = vpop.permute.xlu0 %1696 }
 0x1fa   : > { %v1888_v53 = vpop.permute.xlu1 %1887  ;;  %1772 = vst.msk [vmem:[#allocation3 + $0xa8] sm:$0xff] %vm1750_vm8, %v1697_v29 }
 0x1fb   : > { %1964 = vst.msk [vmem:[#allocation3 + $0xa0] sm:$0xff] %vm1943_vm9, %v1888_v53  ;;  %750 = vrot.lane.b32.xlu0 %v1810_v39, %s4494_s28 }
 0x1fc   : > { %941 = vrot.lane.b32.xlu1 %v2002_v21, %s4493_s27 }
 0x1fd   : > { %v1121_v34 = vpop.permute.xlu0 %1120 }
 0x1fe   : > { %v1312_v31 = vpop.permute.xlu1 %1311  ;;  %1194 = vst.msk [vmem:[#allocation3 + $0xb8] sm:$0xff] %vm1170_vm5, %v1121_v34 }
 0x1ff   : > { %1386 = vst.msk [vmem:[#allocation3 + $0xb0] sm:$0xff] %vm1363_vm6, %v1312_v31  ;;  %1518 = vrot.lane.b32.xlu0 %v2003_v47, %s4497_s13 }
 0x200   : > { %1710 = vrot.lane.b32.xlu1 %v1618_v30, %s4498_s14 }
 0x201   : > { %v1890_v32 = vpop.permute.xlu0 %1889 }
 0x202   : > { %v2081_v36 = vpop.permute.xlu1 %2080  ;;  %1965 = vst.msk [vmem:[#allocation3 + $0xa8] sm:$0xff] %vm1943_vm9, %v1890_v32 }
 0x203   : > { %2157 = vst.msk [vmem:[#allocation3 + $0xa0] sm:$0xff] %vm2136_vm10, %v2081_v36  ;;  %943 = vrot.lane.b32.xlu0 %v2003_v47, %s4493_s27 }
 0x204   : > { %1134 = vrot.lane.b32.xlu1 %v1618_v30, %s4495_s29 }
 0x205   : > { %v737_v46 = vpop.permute.xlu0 %736 }
 0x206   : > { %v1314_v38 = vpop.permute.xlu1 %1313  ;;  %809 = vst.msk [vmem:[#allocation3 + $0xc0] sm:$0xff] %vm784_vm3, %v737_v46 }
 0x207   : > { %1387 = vst.msk [vmem:[#allocation3 + $0xb8] sm:$0xff] %vm1363_vm6, %v1314_v38  ;;  %1712 = vrot.lane.b32.xlu0 %v1619_v33, %s4498_s14 }
 0x208   : > { %1903 = vrot.lane.b32.xlu1 %v1811_v37, %s4499_s15 }
 0x209   : > { %v1505_v56 = vpop.permute.xlu0 %1504 }
 0x20a   : > { %v2083_v40 = vpop.permute.xlu1 %2082  ;;  %v2189_v41 = vld [vmem:[#allocation3 + $0xa0] sm:$0xff]  ;;  %1579 = vst.msk [vmem:[#allocation3 + $0xb0] sm:$0xff] %vm1556_vm7, %v1505_v56 }
 0x20b   : > { %2158 = vst.msk [vmem:[#allocation3 + $0xa8] sm:$0xff] %vm2136_vm10, %v2083_v40  ;;  %4388 = vmatprep.mubr.msk.f32.mxu0 %vm2206_vm11, %v2189_v41  ;;  %1136 = vrot.lane.b32.xlu0 %v1619_v33, %s4495_s29  ;;  %s4503_s29 = smov 56  }
 0x20c   : > { %1327 = vrot.lane.b32.xlu1 %v1811_v37, %s4496_s30 }
 0x20d   : > { %v739_v57 = vpop.permute.xlu0 %738 }
 0x20e   : > { %v930_v44 = vpop.permute.xlu1 %929  ;;  %810 = vst.msk [vmem:[#allocation3 + $0xc8] sm:$0xff] %vm784_vm3, %v739_v57 }
 0x20f   : > { %1002 = vst.msk [vmem:[#allocation3 + $0xc0] sm:$0xff] %vm977_vm4, %v930_v44  ;;  %1905 = vrot.lane.b32.xlu0 %v1812_v42, %s4499_s15 }
 0x210   : > { %2096 = vrot.lane.b32.xlu1 %v2004_v43, %s4500_s16 }
 0x211   : > { %v1507_v35 = vpop.permute.xlu0 %1506 }
 0x212   : > { %v1699_v49 = vpop.permute.xlu1 %1698  ;;  %v2190_v50 = vld [vmem:[#allocation3 + $0xa8] sm:$0xff]  ;;  %1580 = vst.msk [vmem:[#allocation3 + $0xb8] sm:$0xff] %vm1556_vm7, %v1507_v35 }
 0x213   : > { %1773 = vst.msk [vmem:[#allocation3 + $0xb0] sm:$0xff] %vm1750_vm8, %v1699_v49  ;;  %4389 = vmatmul.mubr.msk.f32.gmra.mxu0 %vm2206_vm11, %v2190_v50  ;;  %1329 = vrot.lane.b32.xlu0 %v1812_v42, %s4496_s30 }
 0x214   : > { %1520 = vrot.lane.b32.xlu1 %v2004_v43, %s4497_s13 }
 0x215   : > { %v932_v51 = vpop.permute.xlu0 %931 }
 0x216   : > { %v1123_v52 = vpop.permute.xlu1 %1122  ;;  %1003 = vst.msk [vmem:[#allocation3 + $0xc8] sm:$0xff] %vm977_vm4, %v932_v51 }
 0x217   : > { %1195 = vst.msk [vmem:[#allocation3 + $0xc0] sm:$0xff] %vm1170_vm5, %v1123_v52  ;;  %2098 = vrot.lane.b32.xlu0 %v2005_v55, %s4500_s16 }
 0x218   : > { %1522 = vrot.lane.b32.xlu1 %v2005_v55, %s4497_s13  ;;  %s4507_s13 = smov 112  }
 0x219   : > { %v1701_v59 = vpop.permute.xlu0 %1700 }
 0x21a   : > { %v1892_v2 = vpop.permute.xlu1 %1891  ;;  %1774 = vst.msk [vmem:[#allocation3 + $0xb8] sm:$0xff] %vm1750_vm8, %v1701_v59 }
 0x21b   : > { %1966 = vst.msk [vmem:[#allocation3 + $0xb0] sm:$0xff] %vm1943_vm9, %v1892_v2  ;;  %1714 = vrot.lane.b32.xlu0 %v1620_v54, %s4498_s14 }
 0x21c   : > { %1716 = vrot.lane.b32.xlu1 %v1621_v58, %s4498_s14 }
 0x21d   : > { %v1125_v61 = vpop.permute.xlu0 %1124 }
 0x21e   : > { %v1316_v12 = vpop.permute.xlu1 %1315  ;;  %1196 = vst.msk [vmem:[#allocation3 + $0xc8] sm:$0xff] %vm1170_vm5, %v1125_v61 }
 0x21f   : > { %1388 = vst.msk [vmem:[#allocation3 + $0xc0] sm:$0xff] %vm1363_vm6, %v1316_v12  ;;  %1907 = vrot.lane.b32.xlu0 %v1813_v60, %s4499_s15 }
 0x220   : > { %1909 = vrot.lane.b32.xlu1 %v1814_v63, %s4499_s15  ;;  %s4501_s15 = smov 40  }
 0x221   : > { %v1894_v3 = vpop.permute.xlu0 %1893 }
 0x222   : > { %v2085_v45 = vpop.permute.xlu1 %2084  ;;  %1967 = vst.msk [vmem:[#allocation3 + $0xb8] sm:$0xff] %vm1943_vm9, %v1894_v3 }
 0x223   : > { %2159 = vst.msk [vmem:[#allocation3 + $0xb0] sm:$0xff] %vm2136_vm10, %v2085_v45  ;;  %2100 = vrot.lane.b32.xlu0 %v2006_v62, %s4500_s16 }
 0x224   : > { %2102 = vrot.lane.b32.xlu1 %v2007_v1, %s4500_s16 }
 0x225   : > { %v741_v4 = vpop.permute.xlu0 %740 }
 0x226   : > { %v1318_v9 = vpop.permute.xlu1 %1317  ;;  %811 = vst.msk [vmem:[#allocation3 + $0xd0] sm:$0xff] %vm784_vm3, %v741_v4 }
 0x227   : > { %1389 = vst.msk [vmem:[#allocation3 + $0xc8] sm:$0xff] %vm1363_vm6, %v1318_v9 }
 0x229   : > { %v1509_v20 = vpop.permute.xlu0 %1508 }
 0x22a   : > { %v2087_v5 = vpop.permute.xlu1 %2086  ;;  %v2191_v6 = vld [vmem:[#allocation3 + $0xb0] sm:$0xff]  ;;  %1581 = vst.msk [vmem:[#allocation3 + $0xc0] sm:$0xff] %vm1556_vm7, %v1509_v20 }
 0x22b   : > { %2160 = vst.msk [vmem:[#allocation3 + $0xb8] sm:$0xff] %vm2136_vm10, %v2087_v5  ;;  %4391 = vmatprep.mubr.msk.f32.mxu0 %vm2206_vm11, %v2191_v6 }
 0x22d   : > { %v743_v7 = vpop.permute.xlu0 %742 }
 0x22e   : > { %v934_v8 = vpop.permute.xlu1 %933  ;;  %812 = vst.msk [vmem:[#allocation3 + $0xd8] sm:$0xff] %vm784_vm3, %v743_v7  ;;  %v5506_v7 = vpop.f32.mrf.mxu0 }
 0x22f   : > { %1004 = vst.msk [vmem:[#allocation3 + $0xd0] sm:$0xff] %vm977_vm4, %v934_v8 }
 0x230   : > { %v5508_v8 = vpop.f32.mrf.mxu0 }
 0x231   : > { %v1511_v10 = vpop.permute.xlu0 %1510 }
 0x232   : > { %v1703_v11 = vpop.permute.xlu1 %1702  ;;  %v2192_v48 = vld [vmem:[#allocation3 + $0xb8] sm:$0xff]  ;;  %1582 = vst.msk [vmem:[#allocation3 + $0xc8] sm:$0xff] %vm1556_vm7, %v1511_v10  ;;  %v5510_v10 = vpop.f32.mrf.mxu0 }
 0x233   : > { %1775 = vst.msk [vmem:[#allocation3 + $0xc0] sm:$0xff] %vm1750_vm8, %v1703_v11  ;;  %4392 = vmatmul.mubr.msk.f32.gmra.mxu0 %vm2206_vm11, %v2192_v48  ;;  %v2534_v48 = vsel %vm2532_vm12, %v5506_v7, 0.0 }
 0x234   : > { %v5512_v11 = vpop.f32.mrf.mxu0 }
 0x235   : > { %v936_v13 = vpop.permute.xlu0 %935 }
 0x236   : > { %v1127_v14 = vpop.permute.xlu1 %1126  ;;  %1005 = vst.msk [vmem:[#allocation3 + $0xd8] sm:$0xff] %vm977_vm4, %v936_v13  ;;  %v2533_v13 = vsel %vm2532_vm12, %v5508_v8, 0.0 }
 0x237   : > { %1197 = vst.msk [vmem:[#allocation3 + $0xd0] sm:$0xff] %vm1170_vm5, %v1127_v14  ;;  %v5518_v14 = vpop.f32.mrf.mxu0 }
 0x239   : > { %v1705_v19 = vpop.permute.xlu0 %1704 }
 0x23a   : > { %v1896_v15 = vpop.permute.xlu1 %1895  ;;  %1776 = vst.msk [vmem:[#allocation3 + $0xc8] sm:$0xff] %vm1750_vm8, %v1705_v19  ;;  %v2536_v19 = vsel %vm2532_vm12, %v5512_v11, 0.0 }
 0x23b   : > { %1968 = vst.msk [vmem:[#allocation3 + $0xc0] sm:$0xff] %vm1943_vm9, %v1896_v15  ;;  %v2535_v15 = vadd.f32 %v2534_v48, %v2533_v13 }
 0x23d   : > { %v1129_v16 = vpop.permute.xlu0 %1128 }
 0x23e   : > { %v1320_v17 = vpop.permute.xlu1 %1319  ;;  %1198 = vst.msk [vmem:[#allocation3 + $0xd8] sm:$0xff] %vm1170_vm5, %v1129_v16  ;;  %v2537_v16 = vadd.f32 %v2536_v19, %v2535_v15 }
 0x23f   : > { %1390 = vst.msk [vmem:[#allocation3 + $0xd0] sm:$0xff] %vm1363_vm6, %v1320_v17  ;;  %v5522_v17 = vpop.f32.mrf.mxu0 }
 0x241   : > { %v1898_v18 = vpop.permute.xlu0 %1897 }
 0x242   : > { %v2089_v39 = vpop.permute.xlu1 %2088  ;;  %1969 = vst.msk [vmem:[#allocation3 + $0xc8] sm:$0xff] %vm1943_vm9, %v1898_v18  ;;  %v5524_v18 = vpop.f32.mrf.mxu0 }
 0x243   : > { %2161 = vst.msk [vmem:[#allocation3 + $0xc0] sm:$0xff] %vm2136_vm10, %v2089_v39  ;;  %v2538_v39 = vsel %vm2532_vm12, %v5510_v10, 0.0 }
 0x245   : > { %v745_v21 = vpop.permute.xlu0 %744 }
 0x246   : > { %v1322_v22 = vpop.permute.xlu1 %1321  ;;  %813 = vst.msk [vmem:[#allocation3 + $0xe0] sm:$0xff] %vm784_vm3, %v745_v21  ;;  %v2540_v21 = vsel %vm2532_vm12, %v5522_v17, 0.0 }
 0x247   : > { %1391 = vst.msk [vmem:[#allocation3 + $0xd8] sm:$0xff] %vm1363_vm6, %v1322_v22  ;;  %v2539_v22 = vadd.f32 %v2538_v39, %v2537_v16 }
 0x249   : > { %v1513_v27 = vpop.permute.xlu0 %1512 }
 0x24a   : > { %v2091_v26 = vpop.permute.xlu1 %2090  ;;  %v2193_v23 = vld [vmem:[#allocation3 + $0xc0] sm:$0xff]  ;;  %1583 = vst.msk [vmem:[#allocation3 + $0xd0] sm:$0xff] %vm1556_vm7, %v1513_v27  ;;  %v2541_v27 = vadd.f32 %v2540_v21, %v2539_v22 }
 0x24b   : > { %2162 = vst.msk [vmem:[#allocation3 + $0xc8] sm:$0xff] %vm2136_vm10, %v2091_v26  ;;  %4394 = vmatprep.mubr.msk.f32.mxu0 %vm2206_vm11, %v2193_v23  ;;  %v5530_v26 = vpop.f32.mrf.mxu0 }
 0x24d   : > { %v747_v24 = vpop.permute.xlu0 %746  ;;  %v5532_v23 = vpop.f32.mrf.mxu0 }
 0x24e   : > { %v938_v47 = vpop.permute.xlu1 %937  ;;  %814 = vst.msk [vmem:[#allocation3 + $0xe8] sm:$0xff] %vm784_vm3, %v747_v24  ;;  %v2542_v24 = vsel %vm2532_vm12, %v5518_v14, 0.0 }
 0x24f   : > { %1006 = vst.msk [vmem:[#allocation3 + $0xe0] sm:$0xff] %vm977_vm4, %v938_v47  ;;  %v2544_v47 = vsel %vm2532_vm12, %v5530_v26, 0.0 }
 0x251   : > { %v1515_v25 = vpop.permute.xlu0 %1514 }
 0x252   : > { %v1707_v28 = vpop.permute.xlu1 %1706  ;;  %v2194_v29 = vld [vmem:[#allocation3 + $0xc8] sm:$0xff]  ;;  %1584 = vst.msk [vmem:[#allocation3 + $0xd8] sm:$0xff] %vm1556_vm7, %v1515_v25  ;;  %v2543_v25 = vadd.f32 %v2542_v24, %v2541_v27 }
 0x253   : > { %1777 = vst.msk [vmem:[#allocation3 + $0xd0] sm:$0xff] %vm1750_vm8, %v1707_v28  ;;  %4395 = vmatmul.mubr.msk.f32.gmra.mxu0 %vm2206_vm11, %v2194_v29  ;;  %v5538_v29 = vpop.f32.mrf.mxu0 }
 0x254   : > { %v2545_v28 = vadd.f32 %v2544_v47, %v2543_v25 }
 0x255   : > { %v940_v53 = vpop.permute.xlu0 %939 }
 0x256   : > { %v1131_v30 = vpop.permute.xlu1 %1130  ;;  %1007 = vst.msk [vmem:[#allocation3 + $0xe8] sm:$0xff] %vm977_vm4, %v940_v53  ;;  %v5540_v53 = vpop.f32.mrf.mxu0 }
 0x257   : > { %1199 = vst.msk [vmem:[#allocation3 + $0xe0] sm:$0xff] %vm1170_vm5, %v1131_v30  ;;  %v2546_v30 = vsel %vm2532_vm12, %v5524_v18, 0.0 }
 0x259   : > { %v1709_v34 = vpop.permute.xlu0 %1708 }
 0x25a   : > { %v1900_v31 = vpop.permute.xlu1 %1899  ;;  %1778 = vst.msk [vmem:[#allocation3 + $0xd8] sm:$0xff] %vm1750_vm8, %v1709_v34  ;;  %v2548_v34 = vsel %vm2532_vm12, %v5538_v29, 0.0 }
 0x25b   : > { %1970 = vst.msk [vmem:[#allocation3 + $0xd0] sm:$0xff] %vm1943_vm9, %v1900_v31  ;;  %v2547_v31 = vadd.f32 %v2546_v30, %v2545_v28 }
 0x25d   : > { %v1133_v32 = vpop.permute.xlu0 %1132 }
 0x25e   : > { %v1324_v36 = vpop.permute.xlu1 %1323  ;;  %1200 = vst.msk [vmem:[#allocation3 + $0xe8] sm:$0xff] %vm1170_vm5, %v1133_v32  ;;  %v2549_v32 = vadd.f32 %v2548_v34, %v2547_v31 }
 0x25f   : > { %1392 = vst.msk [vmem:[#allocation3 + $0xe0] sm:$0xff] %vm1363_vm6, %v1324_v36  ;;  %v5546_v36 = vpop.f32.mrf.mxu0 }
 0x261   : > { %v1902_v33 = vpop.permute.xlu0 %1901 }
 0x262   : > { %v2093_v37 = vpop.permute.xlu1 %2092  ;;  %1971 = vst.msk [vmem:[#allocation3 + $0xd8] sm:$0xff] %vm1943_vm9, %v1902_v33  ;;  %v5548_v33 = vpop.f32.mrf.mxu0 }
 0x263   : > { %2163 = vst.msk [vmem:[#allocation3 + $0xd0] sm:$0xff] %vm2136_vm10, %v2093_v37  ;;  %v2550_v37 = vsel %vm2532_vm12, %v5532_v23, 0.0 }
 0x265   : > { %v749_v46 = vpop.permute.xlu0 %748 }
 0x266   : > { %v1326_v38 = vpop.permute.xlu1 %1325  ;;  %815 = vst.msk [vmem:[#allocation3 + $0xf0] sm:$0xff] %vm784_vm3, %v749_v46  ;;  %v2552_v46 = vsel %vm2532_vm12, %v5546_v36, 0.0 }
 0x267   : > { %1393 = vst.msk [vmem:[#allocation3 + $0xe8] sm:$0xff] %vm1363_vm6, %v1326_v38  ;;  %v2551_v38 = vadd.f32 %v2550_v37, %v2549_v32 }
 0x269   : > { %v1517_v56 = vpop.permute.xlu0 %1516 }
 0x26a   : > { %v2095_v40 = vpop.permute.xlu1 %2094  ;;  %v2195_v41 = vld [vmem:[#allocation3 + $0xd0] sm:$0xff]  ;;  %1585 = vst.msk [vmem:[#allocation3 + $0xe0] sm:$0xff] %vm1556_vm7, %v1517_v56  ;;  %v2553_v56 = vadd.f32 %v2552_v46, %v2551_v38 }
 0x26b   : > { %2164 = vst.msk [vmem:[#allocation3 + $0xd8] sm:$0xff] %vm2136_vm10, %v2095_v40  ;;  %4397 = vmatprep.mubr.msk.f32.mxu0 %vm2206_vm11, %v2195_v41  ;;  %v5554_v40 = vpop.f32.mrf.mxu0 }
 0x26d   : > { %v751_v42 = vpop.permute.xlu0 %750 }
 0x26e   : > { %v942_v43 = vpop.permute.xlu1 %941  ;;  %816 = vst.msk [vmem:[#allocation3 + $0xf8] sm:$0xff] %vm784_vm3, %v751_v42  ;;  %v2554_v42 = vsel %vm2532_vm12, %v5540_v53, 0.0  ;;  %vm3327_vm3 = vcmask 458112  }
 0x26f   : > { %1008 = vst.msk [vmem:[#allocation3 + $0xf0] sm:$0xff] %vm977_vm4, %v942_v43  ;;  %v2556_v43 = vsel %vm2532_vm12, %v5554_v40, 0.0 }
 0x271   : > { %v1519_v57 = vpop.permute.xlu0 %1518 }
 0x272   : > { %v1711_v44 = vpop.permute.xlu1 %1710  ;;  %v2196_v35 = vld [vmem:[#allocation3 + $0xd8] sm:$0xff]  ;;  %1586 = vst.msk [vmem:[#allocation3 + $0xe8] sm:$0xff] %vm1556_vm7, %v1519_v57  ;;  %v2555_v57 = vadd.f32 %v2554_v42, %v2553_v56 }
 0x273   : > { %1779 = vst.msk [vmem:[#allocation3 + $0xe0] sm:$0xff] %vm1750_vm8, %v1711_v44  ;;  %4398 = vmatmul.mubr.msk.f32.gmra.mxu0 %vm2206_vm11, %v2196_v35  ;;  %v5556_v41 = vpop.f32.mrf.mxu0 }
 0x274   : > { %v2557_v44 = vadd.f32 %v2556_v43, %v2555_v57 }
 0x275   : > { %v944_v49 = vpop.permute.xlu0 %943  ;;  %v5562_v35 = vpop.f32.mrf.mxu0 }
 0x276   : > { %v1135_v50 = vpop.permute.xlu1 %1134  ;;  %1009 = vst.msk [vmem:[#allocation3 + $0xf8] sm:$0xff] %vm977_vm4, %v944_v49  ;;  %vm3376_vm4 = vcmask 523712  }
 0x277   : > { %1201 = vst.msk [vmem:[#allocation3 + $0xf0] sm:$0xff] %vm1170_vm5, %v1135_v50  ;;  %v2558_v50 = vsel %vm2532_vm12, %v5548_v33, 0.0 }
 0x279   : > { %v1713_v55 = vpop.permute.xlu0 %1712 }
 0x27a   : > { %v1904_v51 = vpop.permute.xlu1 %1903  ;;  %1780 = vst.msk [vmem:[#allocation3 + $0xe8] sm:$0xff] %vm1750_vm8, %v1713_v55  ;;  %v2560_v55 = vsel %vm2532_vm12, %v5562_v35, 0.0 }
 0x27b   : > { %1972 = vst.msk [vmem:[#allocation3 + $0xe0] sm:$0xff] %vm1943_vm9, %v1904_v51  ;;  %v2559_v51 = vadd.f32 %v2558_v50, %v2557_v44 }
 0x27d   : > { %v1137_v52 = vpop.permute.xlu0 %1136 }
 0x27e   : > { %v1328_v54 = vpop.permute.xlu1 %1327  ;;  %1202 = vst.msk [vmem:[#allocation3 + $0xf8] sm:$0xff] %vm1170_vm5, %v1137_v52  ;;  %v2561_v52 = vadd.f32 %v2560_v55, %v2559_v51  ;;  %vm3425_vm5 = vcmask 589312  }
 0x27f   : > { %1394 = vst.msk [vmem:[#allocation3 + $0xf0] sm:$0xff] %vm1363_vm6, %v1328_v54 }
 0x281   : > { %v1906_v58 = vpop.permute.xlu0 %1905 }
 0x282   : > { %v2097_v59 = vpop.permute.xlu1 %2096  ;;  %1973 = vst.msk [vmem:[#allocation3 + $0xe8] sm:$0xff] %vm1943_vm9, %v1906_v58 }
 0x283   : > { %2165 = vst.msk [vmem:[#allocation3 + $0xe0] sm:$0xff] %vm2136_vm10, %v2097_v59  ;;  %v2562_v59 = vsel %vm2532_vm12, %v5556_v41, 0.0 }
 0x285   : > { %v1330_v2 = vpop.permute.xlu0 %1329 }
 0x286   : > { %v1521_v60 = vpop.permute.xlu1 %1520  ;;  %1395 = vst.msk [vmem:[#allocation3 + $0xf8] sm:$0xff] %vm1363_vm6, %v1330_v2  ;;  %vm3451_vm6 = vcmask 588800  }
 0x287   : > { %1587 = vst.msk [vmem:[#allocation3 + $0xf0] sm:$0xff] %vm1556_vm7, %v1521_v60  ;;  %v2563_v60 = vadd.f32 %v2562_v59, %v2561_v52 }
 0x289   : > { %v2099_v63 = vpop.permute.xlu0 %2098 }
 0x28a   : > { %v1523_v61 = vpop.permute.xlu1 %1522  ;;  %v2197_v12 = vld [vmem:[#allocation3 + $0xe0] sm:$0xff]  ;;  %2166 = vst.msk [vmem:[#allocation3 + $0xe8] sm:$0xff] %vm2136_vm10, %v2099_v63 }
 0x28b   : > { %1588 = vst.msk [vmem:[#allocation3 + $0xf8] sm:$0xff] %vm1556_vm7, %v1523_v61  ;;  %4400 = vmatprep.mubr.msk.f32.mxu0 %vm2206_vm11, %v2197_v12  ;;  %vm3741_vm7 = vcmask 128000  }
 0x28c   : > { %3742 = vst.msk [vmem:[#allocation8] sm:$0x3f] %vm3741_vm7, %v4492_v0  ;;  %3743 = vst.msk [vmem:[#allocation8 + $0x8] sm:$0x3f] %vm3741_vm7, %v4492_v0 }
 0x28d   : > { %v1715_v62 = vpop.permute.xlu0 %1714  ;;  %3745 = vst.msk [vmem:[#allocation8 + $0x18] sm:$0x3f] %vm3741_vm7, %v4492_v0  ;;  %3744 = vst.msk [vmem:[#allocation8 + $0x10] sm:$0x3f] %vm3741_vm7, %v4492_v0 }
 0x28e   : > { %v1717_v1 = vpop.permute.xlu1 %1716  ;;  %1781 = vst.msk [vmem:[#allocation3 + $0xf0] sm:$0xff] %vm1750_vm8, %v1715_v62 }
 0x28f   : > { %1782 = vst.msk [vmem:[#allocation3 + $0xf8] sm:$0xff] %vm1750_vm8, %v1717_v1  ;;  %vm3581_vm8 = vcmask 130048  }
 0x290   : > { %3746 = vst.msk [vmem:[#allocation8 + $0x20] sm:$0x3f] %vm3741_vm7, %v4492_v0  ;;  %3747 = vst.msk [vmem:[#allocation8 + $0x28] sm:$0x3f] %vm3741_vm7, %v4492_v0 }
 0x291   : > { %v1908_v3 = vpop.permute.xlu0 %1907  ;;  %v2198_v4 = vld [vmem:[#allocation3 + $0xe8] sm:$0xff] }
 0x292   : > { %v1910_v45 = vpop.permute.xlu1 %1909  ;;  %1974 = vst.msk [vmem:[#allocation3 + $0xf0] sm:$0xff] %vm1943_vm9, %v1908_v3  ;;  %4401 = vmatmul.mubr.msk.f32.gmra.mxu0 %vm2206_vm11, %v2198_v4 }
 0x293   : > { %1975 = vst.msk [vmem:[#allocation3 + $0xf8] sm:$0xff] %vm1943_vm9, %v1910_v45  ;;  %v5564_v49 = vpop.f32.mrf.mxu0  ;;  %vm3749_vm9 = vcmask 125952  }
 0x294   : > { %v2566_v62 = vsel %vm2532_vm12, %v5564_v49, 0.0 }
 0x295   : > { %v2101_v9 = vpop.permute.xlu0 %2100  ;;  %v5570_v54 = vpop.f32.mrf.mxu0 }
 0x296   : > { %v2103_v20 = vpop.permute.xlu1 %2102  ;;  %2167 = vst.msk [vmem:[#allocation3 + $0xf0] sm:$0xff] %vm2136_vm10, %v2101_v9  ;;  %v2564_v2 = vsel %vm2532_vm12, %v5570_v54, 0.0 }
 0x297   : > { %2168 = vst.msk [vmem:[#allocation3 + $0xf8] sm:$0xff] %vm2136_vm10, %v2103_v20  ;;  %v2565_v63 = vadd.f32 %v2564_v2, %v2563_v60  ;;  %vm3784_vm10 = vcmask 261248  }
 0x299   : > { %v2567_v3 = vadd.f32 %v2566_v62, %v2565_v63 }
 0x29d   : > { %v2199_v5 = vld [vmem:[#allocation3 + $0xf0] sm:$0xff] }
 0x29e   : > { %v2200_v6 = vld [vmem:[#allocation3 + $0xf8] sm:$0xff]  ;;  %4403 = vmatprep.mubr.msk.f32.mxu0 %vm2206_vm11, %v2199_v5 }
 0x29f   : > { %4404 = vmatmul.mubr.msk.f32.gmra.mxu0 %vm2206_vm11, %v2200_v6  ;;  %vm3803_vm11 = vcmask 392448  }
 0x2b3   : > { %v5572_v58 = vpop.f32.mrf.mxu0 }
 0x2b4   : > { %v2570_v20 = vsel %vm2532_vm12, %v5572_v58, 0.0 }
 0x2b5   : > { %v5578_v61 = vpop.f32.mrf.mxu0 }
 0x2b6   : > { %v2568_v1 = vsel %vm2532_vm12, %v5578_v61, 0.0 }
 0x2b7   : > { %v2569_v45 = vadd.f32 %v2568_v1, %v2567_v3 }
 0x2b9   : > { %v2571_v6 = vadd.f32 %v2570_v20, %v2569_v45  ;;  %v3041_v20 = vld [vmem:[#allocation5 + $0x1] sm:$0xff] }
 0x2ba   : > { %3057 = vrot.lane.b32.xlu0 %v3041_v20, %s4493_s27 }
 0x2d3   : > { %v5580_v12 = vpop.f32.mrf.mxu0 }
 0x2d4   : > { %v2574_v15 = vsel %vm2532_vm12, %v5580_v12, 0.0 }
 0x2d5   : > { %v5586_v4 = vpop.f32.mrf.mxu0 }
 0x2d6   : > { %v2572_v5 = vsel %vm2532_vm12, %v5586_v4, 0.0 }
 0x2d7   : > { %v2573_v48 = vadd.f32 %v2572_v5, %v2571_v6  ;;  %v3090_v5 = vld [vmem:[#allocation5 + $0x2] sm:$0xff] }
 0x2d8   : > { %3106 = vrot.lane.b32.xlu0 %v3090_v5, %s4496_s30 }
 0x2d9   : > { %v2575_v39 = vadd.f32 %v2574_v15, %v2573_v48 }
 0x2f3   : > { %v5588_v9 = vpop.f32.mrf.mxu0 }
 0x2f4   : > { %v2578_v24 = vsel %vm2532_vm12, %v5588_v9, 0.0 }
 0x2f5   : > { %v5594_v13 = vpop.f32.mrf.mxu0 }
 0x2f6   : > { %v2576_v16 = vsel %vm2532_vm12, %v5594_v13, 0.0 }
 0x2f7   : > { %v2577_v21 = vadd.f32 %v2576_v16, %v2575_v39 }
 0x2f9   : > { %v2579_v25 = vadd.f32 %v2578_v24, %v2577_v21 }
 0x313   : > { %v5596_v19 = vpop.f32.mrf.mxu0 }
 0x314   : > { %v2582_v31 = vsel %vm2532_vm12, %v5596_v19, 0.0 }
 0x315   : > { %v5602_v22 = vpop.f32.mrf.mxu0 }
 0x316   : > { %v2580_v47 = vsel %vm2532_vm12, %v5602_v22, 0.0 }
 0x317   : > { %v2581_v28 = vadd.f32 %v2580_v47, %v2579_v25 }
 0x319   : > { %v2583_v37 = vadd.f32 %v2582_v31, %v2581_v28 }
 0x333   : > { %v5604_v27 = vpop.f32.mrf.mxu0 }
 0x334   : > { %v2586_v56 = vsel %vm2532_vm12, %v5604_v27, 0.0 }
 0x335   : > { %v5610_v30 = vpop.f32.mrf.mxu0 }
 0x336   : > { %v2584_v32 = vsel %vm2532_vm12, %v5610_v30, 0.0 }
 0x337   : > { %v2585_v46 = vadd.f32 %v2584_v32, %v2583_v37 }
 0x339   : > { %v2587_v43 = vadd.f32 %v2586_v56, %v2585_v46 }
 0x352   : > { %v5612_v34 = vpop.f32.mrf.mxu0 }
 0x353   : > { %v2590_v50 = vsel %vm2532_vm12, %v5612_v34, 0.0 }
 0x354   : > { %v5618_v38 = vpop.f32.mrf.mxu0 }
 0x355   : > { %v2588_v42 = vsel %vm2532_vm12, %v5618_v38, 0.0 }
 0x356   : > { %v2589_v57 = vadd.f32 %v2588_v42, %v2587_v43 }
 0x358   : > { %v2591_v51 = vadd.f32 %v2590_v50, %v2589_v57 }
 0x35f   : > { %v5624_v44 = vpop.f32.mrf.mxu0 }
 0x360   : > { %v2594_v2 = vsel %vm2532_vm12, %v5624_v44, 0.0 }
 0x361   : > { %v5628_v55 = vpop.f32.mrf.mxu0 }
 0x362   : > { %v2592_v52 = vsel %vm2532_vm12, %v5628_v55, 0.0 }
 0x363   : > { %v2593_v59 = vadd.f32 %v2592_v52, %v2591_v51 }
 0x365   : > { %v2595_v60 = vadd.f32 %v2594_v2, %v2593_v59 }
 0x367   : > { %v2596_v63 = vrot.slane %v2595_v60, 4 }
 0x369   : > { %v2597_v62 = vadd.f32 %v2596_v63, %v2595_v60 }
 0x36b   : > { %v2598_v1 = vrot.slane %v2597_v62, 2 }
 0x36d   : > { %v2599_v3 = vadd.f32 %v2598_v1, %v2597_v62 }
 0x36f   : > { %v2600_v45 = vrot.slane %v2599_v3, 1 }
 0x371   : > { %v2601_v6 = vadd.f32 %v2600_v45, %v2599_v3 }
 0x373   : > { %v5646_v48 = vmul.f32 0.00390625, %v2601_v6 }
 0x375   : > { %v5650_v15 = vsub.f32 %v5508_v8, %v5646_v48  ;;  %v5654_v16 = vsub.f32 %v5506_v7, %v5646_v48  ;;  %v5658_v39 = vsub.f32 %v5512_v11, %v5646_v48  ;;  %v5662_v21 = vsub.f32 %v5510_v10, %v5646_v48 }
 0x376   : > { %v5670_v8 = vsub.f32 %v5522_v17, %v5646_v48  ;;  %v5676_v11 = vsub.f32 %v5518_v14, %v5646_v48  ;;  %v5684_v32 = vsub.f32 %v5530_v26, %v5646_v48  ;;  %v5691_v14 = vsub.f32 %v5524_v18, %v5646_v48 }
 0x377   : > { %v2636_v24 = vmul.f32 %v5650_v15, %v5650_v15  ;;  %v2637_v47 = vmul.f32 %v5654_v16, %v5654_v16  ;;  %v2638_v7 = vmul.f32 %v5658_v39, %v5658_v39  ;;  %v2639_v10 = vmul.f32 %v5662_v21, %v5662_v21 }
 0x378   : > { %v2640_v17 = vmul.f32 %v5670_v8, %v5670_v8  ;;  %v2641_v56 = vmul.f32 %v5676_v11, %v5676_v11  ;;  %v5698_v26 = vsub.f32 %v5538_v29, %v5646_v48  ;;  %v2642_v57 = vmul.f32 %v5684_v32, %v5684_v32 }
 0x379   : > { %v2668_v25 = vsel %vm2532_vm12, %v2636_v24, 0.0  ;;  %v2669_v28 = vsel %vm2532_vm12, %v2637_v47, 0.0  ;;  %v2671_v37 = vsel %vm2532_vm12, %v2638_v7, 0.0  ;;  %v2673_v42 = vsel %vm2532_vm12, %v2639_v10, 0.0 }
 0x37a   : > { %v2670_v31 = vadd.f32 %v2669_v28, %v2668_v25  ;;  %v2675_v50 = vsel %vm2532_vm12, %v2640_v17, 0.0  ;;  %v5705_v18 = vsub.f32 %v5532_v23, %v5646_v48  ;;  %v2643_v52 = vmul.f32 %v5691_v14, %v5691_v14 }
 0x37b   : > { %v2677_v59 = vsel %vm2532_vm12, %v2641_v56, 0.0  ;;  %v5712_v29 = vsub.f32 %v5546_v36, %v5646_v48  ;;  %v2644_v60 = vmul.f32 %v5698_v26, %v5698_v26  ;;  %v2679_v63 = vsel %vm2532_vm12, %v2642_v57, 0.0 }
 0x37c   : > { %v2672_v46 = vadd.f32 %v2671_v37, %v2670_v31  ;;  %v5719_v23 = vsub.f32 %v5540_v53, %v5646_v48  ;;  %v2645_v1 = vmul.f32 %v5705_v18, %v5705_v18  ;;  %v2681_v3 = vsel %vm2532_vm12, %v2643_v52, 0.0 }
 0x37d   : > { %v5726_v36 = vsub.f32 %v5554_v40, %v5646_v48  ;;  %v2646_v20 = vmul.f32 %v5712_v29, %v5712_v29  ;;  %v2683_v5 = vsel %vm2532_vm12, %v2644_v60, 0.0  ;;  %v5733_v53 = vsub.f32 %v5548_v33, %v5646_v48 }
 0x37e   : > { %v2674_v43 = vadd.f32 %v2673_v42, %v2672_v46  ;;  %v2647_v24 = vmul.f32 %v5719_v23, %v5719_v23  ;;  %v2685_v47 = vsel %vm2532_vm12, %v2645_v1, 0.0  ;;  %v5740_v40 = vsub.f32 %v5562_v35, %v5646_v48 }
 0x37f   : > { %v2648_v10 = vmul.f32 %v5726_v36, %v5726_v36  ;;  %v2687_v25 = vsel %vm2532_vm12, %v2646_v20, 0.0  ;;  %v5747_v33 = vsub.f32 %v5556_v41, %v5646_v48  ;;  %v2649_v31 = vmul.f32 %v5733_v53, %v5733_v53 }
 0x380   : > { %v2676_v51 = vadd.f32 %v2675_v50, %v2674_v43  ;;  %v2689_v17 = vsel %vm2532_vm12, %v2647_v24, 0.0  ;;  %v5754_v35 = vsub.f32 %v5570_v54, %v5646_v48  ;;  %v2650_v46 = vmul.f32 %v5740_v40, %v5740_v40 }
 0x381   : > { %v2691_v56 = vsel %vm2532_vm12, %v2648_v10, 0.0  ;;  %v5761_v41 = vsub.f32 %v5564_v49, %v5646_v48  ;;  %v2651_v43 = vmul.f32 %v5747_v33, %v5747_v33  ;;  %v2693_v57 = vsel %vm2532_vm12, %v2649_v31, 0.0 }
 0x382   : > { %v2678_v2 = vadd.f32 %v2677_v59, %v2676_v51  ;;  %v5768_v54 = vsub.f32 %v5578_v61, %v5646_v48  ;;  %v2652_v51 = vmul.f32 %v5754_v35, %v5754_v35  ;;  %v2695_v52 = vsel %vm2532_vm12, %v2650_v46, 0.0 }
 0x383   : > { %v5775_v49 = vsub.f32 %v5572_v58, %v5646_v48  ;;  %v2697_v60 = vsel %vm2532_vm12, %v2651_v43, 0.0  ;;  %v5782_v61 = vsub.f32 %v5586_v4, %v5646_v48  ;;  %v5789_v58 = vsub.f32 %v5580_v12, %v5646_v48 }
 0x384   : > { %v2680_v62 = vadd.f32 %v2679_v63, %v2678_v2  ;;  %v2653_v2 = vmul.f32 %v5761_v41, %v5761_v41  ;;  %v2699_v1 = vsel %vm2532_vm12, %v2652_v51, 0.0  ;;  %v5796_v4 = vsub.f32 %v5594_v13, %v5646_v48 }
 0x385   : > { %v5803_v12 = vsub.f32 %v5588_v9, %v5646_v48  ;;  %v5810_v13 = vsub.f32 %v5602_v22, %v5646_v48  ;;  %v5817_v9 = vsub.f32 %v5596_v19, %v5646_v48  ;;  %v5824_v22 = vsub.f32 %v5610_v30, %v5646_v48 }
 0x386   : > { %v2682_v45 = vadd.f32 %v2681_v3, %v2680_v62  ;;  %v2654_v62 = vmul.f32 %v5768_v54, %v5768_v54  ;;  %v2701_v20 = vsel %vm2532_vm12, %v2653_v2, 0.0  ;;  %v5831_v19 = vsub.f32 %v5604_v27, %v5646_v48 }
 0x387   : > { %v5838_v30 = vsub.f32 %v5618_v38, %v5646_v48  ;;  %v2633_v27 = vsub.f32 %v5612_v34, %v5646_v48 }
 0x388   : > { %v2684_v6 = vadd.f32 %v2683_v5, %v2682_v45  ;;  %v2655_v45 = vmul.f32 %v5775_v49, %v5775_v49  ;;  %v2703_v24 = vsel %vm2532_vm12, %v2654_v62, 0.0 }
 0x389   : > { %v2664_v38 = vmul.f32 %v5838_v30, %v5838_v30 }
 0x38a   : > { %v2686_v7 = vadd.f32 %v2685_v47, %v2684_v6  ;;  %v2656_v6 = vmul.f32 %v5782_v61, %v5782_v61  ;;  %v2705_v10 = vsel %vm2532_vm12, %v2655_v45, 0.0 }
 0x38c   : > { %v2688_v28 = vadd.f32 %v2687_v25, %v2686_v7  ;;  %v2657_v7 = vmul.f32 %v5789_v58, %v5789_v58  ;;  %v2707_v31 = vsel %vm2532_vm12, %v2656_v6, 0.0  ;;  %v2665_v6 = vmul.f32 %v2633_v27, %v2633_v27 }
 0x38e   : > { %v2690_v37 = vadd.f32 %v2689_v17, %v2688_v28  ;;  %v2658_v28 = vmul.f32 %v5796_v4, %v5796_v4  ;;  %v2709_v46 = vsel %vm2532_vm12, %v2657_v7, 0.0  ;;  %v2723_v7 = vsel %vm2532_vm12, %v2664_v38, 0.0 }
 0x390   : > { %v2692_v42 = vadd.f32 %v2691_v56, %v2690_v37  ;;  %v2659_v37 = vmul.f32 %v5803_v12, %v5803_v12  ;;  %v2711_v43 = vsel %vm2532_vm12, %v2658_v28, 0.0 }
 0x392   : > { %v2694_v50 = vadd.f32 %v2693_v57, %v2692_v42  ;;  %v2660_v42 = vmul.f32 %v5810_v13, %v5810_v13  ;;  %v2713_v51 = vsel %vm2532_vm12, %v2659_v37, 0.0 }
 0x394   : > { %v2696_v59 = vadd.f32 %v2695_v52, %v2694_v50  ;;  %v2661_v50 = vmul.f32 %v5817_v9, %v5817_v9  ;;  %v2715_v2 = vsel %vm2532_vm12, %v2660_v42, 0.0 }
 0x396   : > { %v2698_v63 = vadd.f32 %v2697_v60, %v2696_v59  ;;  %v2662_v59 = vmul.f32 %v5824_v22, %v5824_v22  ;;  %v2717_v62 = vsel %vm2532_vm12, %v2661_v50, 0.0 }
 0x398   : > { %v2700_v3 = vadd.f32 %v2699_v1, %v2698_v63  ;;  %v2663_v63 = vmul.f32 %v5831_v19, %v5831_v19  ;;  %v2719_v45 = vsel %vm2532_vm12, %v2662_v59, 0.0  ;;  %v5863_v59 = vld [vmem:[%s6638_s2] ss:$0 sm:$0xff] }
 0x39a   : > { %v2702_v5 = vadd.f32 %v2701_v20, %v2700_v3  ;;  %v2634_v3 = vsub.f32 %v5628_v55, %v5646_v48  ;;  %v2721_v34 = vsel %vm2532_vm12, %v2663_v63, 0.0  ;;  %v2725_v55 = vsel %vm2532_vm12, %v2665_v6, 0.0 }
 0x39c   : > { %v2704_v47 = vadd.f32 %v2703_v24, %v2702_v5  ;;  %v2635_v5 = vsub.f32 %v5624_v44, %v5646_v48 }
 0x39e   : > { %v2706_v25 = vadd.f32 %v2705_v10, %v2704_v47  ;;  %v2666_v47 = vmul.f32 %v2634_v3, %v2634_v3 }
 0x3a0   : > { %v2708_v17 = vadd.f32 %v2707_v31, %v2706_v25  ;;  %v2667_v25 = vmul.f32 %v2635_v5, %v2635_v5  ;;  %v2727_v31 = vsel %vm2532_vm12, %v2666_v47, 0.0 }
 0x3a2   : > { %v2710_v56 = vadd.f32 %v2709_v46, %v2708_v17  ;;  %v2729_v37 = vsel %vm2532_vm12, %v2667_v25, 0.0 }
 0x3a4   : > { %v2712_v57 = vadd.f32 %v2711_v43, %v2710_v56 }
 0x3a6   : > { %v2714_v52 = vadd.f32 %v2713_v51, %v2712_v57 }
 0x3a8   : > { %v2716_v60 = vadd.f32 %v2715_v2, %v2714_v52 }
 0x3aa   : > { %v2718_v1 = vadd.f32 %v2717_v62, %v2716_v60 }
 0x3ac   : > { %v2720_v20 = vadd.f32 %v2719_v45, %v2718_v1 }
 0x3ae   : > { %v2722_v24 = vadd.f32 %v2721_v34, %v2720_v20 }
 0x3b0   : > { %v2724_v10 = vadd.f32 %v2723_v7, %v2722_v24 }
 0x3b2   : > { %v2726_v28 = vadd.f32 %v2725_v55, %v2724_v10 }
 0x3b4   : > { %v2728_v17 = vadd.f32 %v2727_v31, %v2726_v28 }
 0x3b6   : > { %v2730_v46 = vadd.f32 %v2729_v37, %v2728_v17  ;;  %v5937_v17 = vld [vmem:[%s6639_s3] ss:$0 sm:$0xff] }
 0x3b8   : > { %v2731_v56 = vrot.slane %v2730_v46, 4 }
 0x3ba   : > { %v2732_v44 = vadd.f32 %v2731_v56, %v2730_v46 }
 0x3bc   : > { %v2733_v48 = vrot.slane %v2732_v44, 2 }
 0x3be   : > { %v2734_v42 = vadd.f32 %v2733_v48, %v2732_v44 }
 0x3c0   : > { %v2735_v43 = vrot.slane %v2734_v42, 1 }
 0x3c2   : > { %v2736_v57 = vadd.f32 %v2735_v43, %v2734_v42 }
 0x3c4   : > { %v2737_v50 = vmul.f32 0.00390625, %v2736_v57 }
 0x3c6   : > { %v2738_v51 = vadd.f32 1e-05, %v2737_v50  ;;  %v3025_v50 = vld [vmem:[#allocation5] sm:$0xff] }
 0x3c7   : > { %3033 = vst.msk [vmem:[#allocation6] sm:$0xff] %vm2532_vm12, %v3025_v50 }
 0x3c8   : > { %4478 = vrsqrt.f32 %v2738_v51 }
 0x3d5   : > { %v4479_v52 = vpop.eup %4478 }
 0x3d6   : > { %v2770_v2 = vmul.f32 %v4479_v52, %v2634_v3  ;;  %v2740_v60 = vmul.f32 %v4479_v52, %v5650_v15  ;;  %v2741_v63 = vmul.f32 %v4479_v52, %v5654_v16  ;;  %v2742_v62 = vmul.f32 %v4479_v52, %v5658_v39 }
 0x3d7   : > { %v2743_v1 = vmul.f32 %v4479_v52, %v5662_v21  ;;  %v2744_v38 = vmul.f32 %v4479_v52, %v5670_v8  ;;  %v2745_v20 = vmul.f32 %v4479_v52, %v5676_v11  ;;  %v2746_v6 = vmul.f32 %v4479_v52, %v5684_v32 }
 0x3d8   : > { %v5871_v45 = vmul.f32 %v5863_v59, %v2770_v2  ;;  %v2747_v34 = vmul.f32 %v4479_v52, %v5691_v14  ;;  %v2748_v3 = vmul.f32 %v4479_v52, %v5698_v26  ;;  %v2749_v15 = vmul.f32 %v4479_v52, %v5705_v18 }
 0x3d9   : > { %v2750_v16 = vmul.f32 %v4479_v52, %v5712_v29  ;;  %v2751_v39 = vmul.f32 %v4479_v52, %v5719_v23  ;;  %v2752_v21 = vmul.f32 %v4479_v52, %v5726_v36  ;;  %v2753_v8 = vmul.f32 %v4479_v52, %v5733_v53 }
 0x3da   : > { %v2754_v24 = vmul.f32 %v4479_v52, %v5740_v40  ;;  %v2755_v11 = vmul.f32 %v4479_v52, %v5747_v33  ;;  %v2756_v32 = vmul.f32 %v4479_v52, %v5754_v35  ;;  %v2757_v14 = vmul.f32 %v4479_v52, %v5761_v41 }
 0x3db   : > { %v2758_v26 = vmul.f32 %v4479_v52, %v5768_v54  ;;  %v2759_v18 = vmul.f32 %v4479_v52, %v5775_v49  ;;  %v2760_v29 = vmul.f32 %v4479_v52, %v5782_v61  ;;  %v2761_v23 = vmul.f32 %v4479_v52, %v5789_v58 }
 0x3dc   : > { %v2762_v36 = vmul.f32 %v4479_v52, %v5796_v4  ;;  %v2763_v53 = vmul.f32 %v4479_v52, %v5803_v12  ;;  %v2764_v40 = vmul.f32 %v4479_v52, %v5810_v13  ;;  %v2765_v33 = vmul.f32 %v4479_v52, %v5817_v9 }
 0x3dd   : > { %v2768_v35 = vmul.f32 %v4479_v52, %v5838_v30  ;;  %v2769_v47 = vmul.f32 %v4479_v52, %v2633_v27  ;;  %v2766_v41 = vmul.f32 %v4479_v52, %v5824_v22  ;;  %v5897_v54 = vmul.f32 %v4479_v52, %v5831_v19 }
 0x3de   : > { %v5899_v49 = vmul.f32 %v4479_v52, %v2635_v5  ;;  %v2779_v61 = vmul.f32 %v5863_v59, %v2740_v60  ;;  %v2780_v58 = vmul.f32 %v5863_v59, %v2741_v63  ;;  %v5904_v4 = vmul.f32 %v5863_v59, %v2742_v62 }
 0x3df   : > { %v5907_v12 = vmul.f32 %v5863_v59, %v2743_v1  ;;  %v2783_v13 = vmul.f32 %v5863_v59, %v2744_v38  ;;  %v2784_v9 = vmul.f32 %v5863_v59, %v2745_v20  ;;  %v5912_v22 = vmul.f32 %v5863_v59, %v2746_v6 }
 0x3e0   : > { %v5915_v19 = vmul.f32 %v5863_v59, %v2747_v34  ;;  %v2787_v30 = vmul.f32 %v5863_v59, %v2748_v3  ;;  %v2788_v27 = vmul.f32 %v5863_v59, %v2749_v15  ;;  %v5920_v5 = vmul.f32 %v5863_v59, %v2750_v16 }
 0x3e1   : > { %v5923_v7 = vmul.f32 %v5863_v59, %v2751_v39  ;;  %v2791_v10 = vmul.f32 %v5863_v59, %v2752_v21  ;;  %v2792_v25 = vmul.f32 %v5863_v59, %v2753_v8  ;;  %v5928_v55 = vmul.f32 %v5863_v59, %v2754_v24 }
 0x3e2   : > { %v5931_v28 = vmul.f32 %v5863_v59, %v2755_v11  ;;  %v2795_v31 = vmul.f32 %v5863_v59, %v2756_v32  ;;  %v2796_v37 = vmul.f32 %v5863_v59, %v2757_v14  ;;  %v5941_v46 = vmul.f32 %v5863_v59, %v2758_v26  ;;  %v3058_v14 = vpop.permute.xlu0 %3057 }
 0x3e3   : > { %v5944_v56 = vmul.f32 %v5863_v59, %v2759_v18  ;;  %v2799_v44 = vmul.f32 %v5863_v59, %v2760_v29  ;;  %v2800_v48 = vmul.f32 %v5863_v59, %v2761_v23  ;;  %v5949_v42 = vmul.f32 %v5863_v59, %v2762_v36  ;;  %3082 = vst.msk [vmem:[#allocation6] sm:$0xff] %vm3081_vm14, %v3058_v14 }
 0x3e4   : > { %v5952_v43 = vmul.f32 %v5863_v59, %v2763_v53  ;;  %v2803_v57 = vmul.f32 %v5863_v59, %v2764_v40  ;;  %v2804_v51 = vmul.f32 %v5863_v59, %v2765_v33  ;;  %v5957_v52 = vmul.f32 %v5863_v59, %v2766_v41 }
 0x3e5   : > { %v2807_v2 = vmul.f32 %v5863_v59, %v2768_v35  ;;  %v2808_v60 = vmul.f32 %v5863_v59, %v2769_v47  ;;  %v5963_v63 = vadd.f32 %v5937_v17, %v2779_v61  ;;  %v5966_v62 = vadd.f32 %v5937_v17, %v2780_v58 }
 0x3e6   : > { %v5969_v1 = vadd.f32 %v5937_v17, %v2783_v13  ;;  %v5972_v38 = vadd.f32 %v5937_v17, %v2784_v9  ;;  %v5975_v20 = vadd.f32 %v5937_v17, %v2787_v30  ;;  %v5978_v6 = vadd.f32 %v5937_v17, %v2788_v27 }
 0x3e7   : > { %v5981_v34 = vadd.f32 %v5937_v17, %v2791_v10  ;;  %v5984_v3 = vadd.f32 %v5937_v17, %v2792_v25  ;;  %v5987_v15 = vadd.f32 %v5937_v17, %v2795_v31  ;;  %v5990_v16 = vadd.f32 %v5937_v17, %v2796_v37 }
 0x3e8   : > { %v5993_v39 = vadd.f32 %v5937_v17, %v2799_v44  ;;  %v5996_v21 = vadd.f32 %v5937_v17, %v2800_v48  ;;  %v5999_v8 = vadd.f32 %v5937_v17, %v2803_v57  ;;  %v6002_v24 = vadd.f32 %v5937_v17, %v2804_v51 }
 0x3e9   : > { %v6005_v11 = vadd.f32 %v5937_v17, %v2807_v2  ;;  %v6008_v32 = vadd.f32 %v5937_v17, %v2808_v60  ;;  %v2850_v26 = vmax.f32 %v5963_v63, 0.0  ;;  %v2851_v18 = vmax.f32 %v5966_v62, 0.0 }
 0x3ea   : > { %v6660_v29 = vmax.f32 %v5969_v1, 0.0  ;;  %v6659_v23 = vmax.f32 %v5972_v38, 0.0  ;;  %v6656_v36 = vmax.f32 %v5975_v20, 0.0  ;;  %v6655_v53 = vmax.f32 %v5978_v6, 0.0 }
 0x3eb   : > { %v6652_v40 = vmax.f32 %v5981_v34, 0.0  ;;  %v6651_v33 = vmax.f32 %v5984_v3, 0.0  ;;  %2948 = vst.msk [vmem:[#allocation4] sm:$0xff] %vm2532_vm12, %v2850_v26  ;;  %2949 = vst.msk [vmem:[#allocation4 + $0x8] sm:$0xff] %vm2532_vm12, %v2851_v18  ;;  %v6662_v35 = vmax.f32 %v5987_v15, 0.0  ;;  %v6661_v47 = vmax.f32 %v5990_v16, 0.0 }
 0x3ec   : > { %v6658_v41 = vmax.f32 %v5993_v39, 0.0  ;;  %v6657_v61 = vmax.f32 %v5996_v21, 0.0  ;;  %2952 = vst.msk [vmem:[#allocation4 + $0x20] sm:$0xff] %vm2532_vm12, %v6660_v29  ;;  %2953 = vst.msk [vmem:[#allocation4 + $0x28] sm:$0xff] %vm2532_vm12, %v6659_v23  ;;  %v6654_v58 = vmax.f32 %v5999_v8, 0.0  ;;  %v6653_v13 = vmax.f32 %v6002_v24, 0.0 }
 0x3ed   : > { %v6650_v9 = vmax.f32 %v6005_v11, 0.0  ;;  %v6649_v30 = vmax.f32 %v6008_v32, 0.0  ;;  %2956 = vst.msk [vmem:[#allocation4 + $0x40] sm:$0xff] %vm2532_vm12, %v6656_v36  ;;  %2957 = vst.msk [vmem:[#allocation4 + $0x48] sm:$0xff] %vm2532_vm12, %v6655_v53  ;;  %v2806_v27 = vmul.f32 %v5863_v59, %v5897_v54  ;;  %v6066_v54 = vadd.f32 %v5937_v17, %v5904_v4  ;;  %v3107_v4 = vpop.permute.xlu0 %3106 }
 0x3ee   : > { %2960 = vst.msk [vmem:[#allocation4 + $0x60] sm:$0xff] %vm2532_vm12, %v6652_v40  ;;  %2961 = vst.msk [vmem:[#allocation4 + $0x68] sm:$0xff] %vm2532_vm12, %v6651_v33  ;;  %v6083_v10 = vadd.f32 %v5937_v17, %v5907_v12  ;;  %v6087_v25 = vadd.f32 %v5937_v17, %v5941_v46  ;;  %v6091_v31 = vadd.f32 %v5937_v17, %v5944_v56  ;;  %v6669_v62 = vmax.f32 %v5972_v38, 0.0 }
 0x3ef   : > { %2964 = vst.msk [vmem:[#allocation4 + $0x80] sm:$0xff] %vm2532_vm12, %v6662_v35  ;;  %2965 = vst.msk [vmem:[#allocation4 + $0x88] sm:$0xff] %vm2532_vm12, %v6661_v47  ;;  %v6095_v37 = vadd.f32 %v5937_v17, %v5912_v22  ;;  %v2810_v44 = vmul.f32 %v5863_v59, %v5899_v49  ;;  %v6103_v48 = vadd.f32 %v5937_v17, %v5915_v19 }
 0x3f0   : > { %2968 = vst.msk [vmem:[#allocation4 + $0xa0] sm:$0xff] %vm2532_vm12, %v6658_v41  ;;  %2969 = vst.msk [vmem:[#allocation4 + $0xa8] sm:$0xff] %vm2532_vm12, %v6657_v61  ;;  %v6107_v46 = vadd.f32 %v5937_v17, %v5949_v42  ;;  %v6117_v19 = vadd.f32 %v5937_v17, %v5952_v43  ;;  %v6121_v42 = vadd.f32 %v5937_v17, %v5920_v5  ;;  %v6668_v63 = vmax.f32 %v6087_v25, 0.0 }
 0x3f1   : > { %2972 = vst.msk [vmem:[#allocation4 + $0xc0] sm:$0xff] %vm2532_vm12, %v6654_v58  ;;  %2973 = vst.msk [vmem:[#allocation4 + $0xc8] sm:$0xff] %vm2532_vm12, %v6653_v13  ;;  %v6125_v60 = vadd.f32 %v5937_v17, %v5923_v7  ;;  %v6129_v14 = vadd.f32 %v5937_v17, %v5957_v52  ;;  %v6136_v43 = vadd.f32 %v5937_v17, %v5928_v55  ;;  %v3450_v58 = vld [vmem:[%s6640_s4 + $0x40] sm:$0xff] }
 0x3f2   : > { %2976 = vst.msk [vmem:[#allocation4 + $0xe0] sm:$0xff] %vm2532_vm12, %v6650_v9  ;;  %2977 = vst.msk [vmem:[#allocation4 + $0xe8] sm:$0xff] %vm2532_vm12, %v6649_v30  ;;  %v2980_v51 = vld [vmem:[#allocation4] ss:$2 sm:$0xff]  ;;  %v6144_v52 = vadd.f32 %v5937_v17, %v5931_v28  ;;  %v6155_v40 = vadd.f32 %v5937_v17, %v2810_v44  ;;  %4406 = vmatprep.subr.mxu1 %v3450_v58  ;;  %v6676_v38 = vmax.f32 %v6107_v46, 0.0  ;;  %v6678_v25 = vmax.f32 %v6117_v19, 0.0 }
 0x3f3   : > { %3131 = vst.msk [vmem:[#allocation6] sm:$0xff] %vm3130_vm15, %v3107_v4  ;;  %v2982_v2 = vld [vmem:[#allocation4 + $0x20] ss:$2 sm:$0xff]  ;;  %v6132_v4 = vadd.f32 %v5937_v17, %v2806_v27  ;;  %v6148_v27 = vadd.f32 %v5937_v17, %v5871_v45  ;;  %4407 = vmatpush3.msra.mxu1 %v3450_v58  ;;  %v3447_v58 = vld [vmem:[%s6640_s4 + $0x28] sm:$0xff]  ;;  %v6688_v19 = vmax.f32 %v6005_v11, 0.0 }
 0x3f4   : > { %3017 = vst.msk [vmem:[#allocation5 + $0x11] sm:$0xff] %vm2532_vm12, %v2980_v51  ;;  %3018 = vst.msk [vmem:[#allocation5 + $0x21] sm:$0xff] %vm2532_vm12, %v2982_v2  ;;  %v2984_v5 = vld [vmem:[#allocation4 + $0x40] ss:$2 sm:$0xff] }
 0x3f5   : > { %v2986_v30 = vld [vmem:[#allocation4 + $0x60] ss:$2 sm:$0xff]  ;;  %3019 = vst.msk [vmem:[#allocation5 + $0x31] sm:$0xff] %vm2532_vm12, %v2984_v5  ;;  %v6686_v46 = vmax.f32 %v6132_v4, 0.0 }
 0x3f6   : > { %3020 = vst.msk [vmem:[#allocation5 + $0x41] sm:$0xff] %vm2532_vm12, %v2986_v30  ;;  %v2988_v55 = vld [vmem:[#allocation4 + $0x80] ss:$2 sm:$0xff] }
 0x3f7   : > { %v2990_v51 = vld [vmem:[#allocation4 + $0xa0] ss:$2 sm:$0xff]  ;;  %3021 = vst.msk [vmem:[#allocation5 + $0x51] sm:$0xff] %vm2532_vm12, %v2988_v55 }
 0x3f8   : > { %3022 = vst.msk [vmem:[#allocation5 + $0x61] sm:$0xff] %vm2532_vm12, %v2990_v51  ;;  %v2992_v28 = vld [vmem:[#allocation4 + $0xc0] ss:$2 sm:$0xff] }
 0x3f9   : > { %v2994_v45 = vld [vmem:[#allocation4 + $0xe0] ss:$2 sm:$0xff]  ;;  %3023 = vst.msk [vmem:[#allocation5 + $0x71] sm:$0xff] %vm2532_vm12, %v2992_v28 }
 0x3fa   : > { %3024 = vst.msk [vmem:[#allocation5 + $0x81] sm:$0xff] %vm2532_vm12, %v2994_v45  ;;  %v3448_v9 = vld [vmem:[%s6640_s4 + $0x30] sm:$0xff] }
 0x3fb   : > { %v3139_v44 = vld [vmem:[#allocation5 + $0x10] sm:$0xff]  ;;  %v3140_v51 = vld [vmem:[#allocation5 + $0x20] sm:$0xff] }
 0x3fc   : > { %v3042_v55 = vld [vmem:[#allocation5 + $0x11] sm:$0xff]  ;;  %3155 = vrot.lane.b32.xlu0 %v3139_v44, %s4498_s14  ;;  %3034 = vst.msk [vmem:[#allocation6 + $0x8] sm:$0xff] %vm2532_vm12, %v3139_v44  ;;  %3035 = vst.msk [vmem:[#allocation6 + $0x10] sm:$0xff] %vm2532_vm12, %v3140_v51  ;;  %v3189_v30 = vld [vmem:[#allocation5 + $0x21] sm:$0xff] }
 0x3fd   : > { %3059 = vrot.lane.b32.xlu1 %v3042_v55, %s4493_s27  ;;  %v3288_v5 = vld [vmem:[#allocation5 + $0x30] sm:$0xff]  ;;  %v6170_v28 = vld [vmem:[#allocation5 + $0x40] sm:$0xff] }
 0x3fe   : > { %3036 = vst.msk [vmem:[#allocation6 + $0x18] sm:$0xff] %vm2532_vm12, %v3288_v5  ;;  %v3091_v45 = vld [vmem:[#allocation5 + $0x12] sm:$0xff]  ;;  %3037 = vst.msk [vmem:[#allocation6 + $0x20] sm:$0xff] %vm2532_vm12, %v6170_v28  ;;  %v3238_v13 = vld [vmem:[#allocation5 + $0x22] sm:$0xff] }
 0x3ff   : > { %v6173_v33 = vld [vmem:[#allocation5 + $0x50] sm:$0xff]  ;;  %v6179_v17 = vld [vmem:[#allocation5 + $0x60] sm:$0xff] }
 0x400   : > { %3204 = vrot.lane.b32.xlu0 %v3042_v55, %s4500_s16  ;;  %3038 = vst.msk [vmem:[#allocation6 + $0x28] sm:$0xff] %vm2532_vm12, %v6173_v33  ;;  %v6183_v44 = vld [vmem:[#allocation5 + $0x70] sm:$0xff]  ;;  %3039 = vst.msk [vmem:[#allocation6 + $0x30] sm:$0xff] %vm2532_vm12, %v6179_v17 }
 0x401   : > { %3108 = vrot.lane.b32.xlu1 %v3091_v45, %s4496_s30  ;;  %3040 = vst.msk [vmem:[#allocation6 + $0x38] sm:$0xff] %vm2532_vm12, %v6183_v44  ;;  %v3044_v55 = vld [vmem:[#allocation5 + $0x31] sm:$0xff]  ;;  %vm3822_vm12 = vcmask 523648  }
 0x402   : > { %v3093_v2 = vld [vmem:[#allocation5 + $0x32] sm:$0xff] }
 0x404   : > { %3206 = vrot.lane.b32.xlu0 %v3189_v30, %s4500_s16 }
 0x405   : > { %3157 = vrot.lane.b32.xlu1 %v3140_v51, %s4498_s14 }
 0x408   : > { %3063 = vrot.lane.b32.xlu0 %v3044_v55, %s4493_s27 }
 0x409   : > { %3061 = vrot.lane.b32.xlu1 %v3189_v30, %s4493_s27 }
 0x40c   : > { %3255 = vrot.lane.b32.xlu0 %v3238_v13, %s4501_s15 }
 0x40d   : > { %3253 = vrot.lane.b32.xlu1 %v3091_v45, %s4501_s15  ;;  %v3449_v45 = vld [vmem:[%s6640_s4 + $0x38] sm:$0xff] }
 0x40e   : > { %4408 = vmatprep.subr.mxu1 %v3449_v45 }
 0x40f   : > { %4409 = vmatpush3.msra.mxu1 %v3449_v45  ;;  %v3445_v45 = vld [vmem:[%s6640_s4 + $0x18] sm:$0xff] }
 0x410   : > { %3112 = vrot.lane.b32.xlu0 %v3093_v2, %s4496_s30  ;;  %4410 = vmatprep.subr.mxu1 %v3448_v9 }
 0x411   : > { %3110 = vrot.lane.b32.xlu1 %v3238_v13, %s4496_s30  ;;  %4411 = vmatpush3.msra.mxu1 %v3448_v9  ;;  %v3444_v9 = vld [vmem:[%s6640_s4 + $0x10] sm:$0xff] }
 0x412   : > { %4412 = vmatprep.subr.mxu1 %v3447_v58 }
 0x413   : > { %4413 = vmatpush3.msra.mxu1 %v3447_v58  ;;  %v3442_v58 = vld [vmem:[%s6640_s4] sm:$0xff] }
 0x414   : > { %3305 = vrot.lane.b32.xlu0 %v3288_v5, %s4502_s23 }
 0x415   : > { %3303 = vrot.lane.b32.xlu1 %v3140_v51, %s4502_s23  ;;  %v3045_v51 = vld [vmem:[#allocation5 + $0x41] sm:$0xff] }
 0x418   : > { %3161 = vrot.lane.b32.xlu0 %v6170_v28, %s4498_s14 }
 0x419   : > { %3159 = vrot.lane.b32.xlu1 %v3288_v5, %s4498_s14  ;;  %v3446_v5 = vld [vmem:[%s6640_s4 + $0x20] sm:$0xff] }
 0x41a   : > { %4414 = vmatprep.subr.mxu1 %v3446_v5 }
 0x41b   : > { %4415 = vmatpush3.msra.mxu1 %v3446_v5  ;;  %v3240_v5 = vld [vmem:[#allocation5 + $0x42] sm:$0xff] }
 0x41c   : > { %3354 = vrot.lane.b32.xlu0 %v3044_v55, %s4503_s29  ;;  %4416 = vmatprep.subr.mxu1 %v3445_v45 }
 0x41d   : > { %3352 = vrot.lane.b32.xlu1 %v3189_v30, %s4503_s29  ;;  %4417 = vmatpush3.msra.mxu1 %v3445_v45  ;;  %v3443_v30 = vld [vmem:[%s6640_s4 + $0x8] sm:$0xff]  ;;  %v3242_v45 = vld [vmem:[#allocation5 + $0x62] sm:$0xff] }
 0x41e   : > { %4418 = vmatprep.subr.mxu1 %v3444_v9 }
 0x41f   : > { %4419 = vmatpush3.msra.mxu1 %v3444_v9  ;;  %v3195_v9 = vld [vmem:[#allocation5 + $0x81] sm:$0xff] }
 0x420   : > { %3065 = vrot.lane.b32.xlu0 %v3045_v51, %s4493_s27  ;;  %4420 = vmatprep.subr.mxu1 %v3443_v30 }
 0x421   : > { %3208 = vrot.lane.b32.xlu1 %v3044_v55, %s4500_s16  ;;  %v3046_v55 = vld [vmem:[#allocation5 + $0x51] sm:$0xff]  ;;  %4421 = vmatpush3.msra.mxu1 %v3443_v30 }
 0x422   : > { %4422 = vmatprep.subr.mxu1 %v3442_v58 }
 0x423   : > { %4423 = vmatpush3.msra.mxu1 %v3442_v58  ;;  %v3343_v58 = vld [vmem:[#allocation5 + $0x91] sm:$0xff] }
 0x424   : > { %3257 = vrot.lane.b32.xlu0 %v3093_v2, %s4501_s15  ;;  %3944 = vmatprep.subr.mxu1 %v4492_v0 }
 0x425   : > { %3401 = vrot.lane.b32.xlu1 %v3238_v13, %s4504_s18  ;;  %v3095_v13 = vld [vmem:[#allocation5 + $0x52] sm:$0xff] }
 0x428   : > { %3067 = vrot.lane.b32.xlu0 %v3046_v55, %s4493_s27 }
 0x429   : > { %3210 = vrot.lane.b32.xlu1 %v3045_v51, %s4500_s16 }
 0x42c   : > { %3259 = vrot.lane.b32.xlu0 %v3240_v5, %s4501_s15 }
 0x42d   : > { %3403 = vrot.lane.b32.xlu1 %v3093_v2, %s4504_s18  ;;  %v3047_v2 = vld [vmem:[#allocation5 + $0x61] sm:$0xff] }
 0x430   : > { %3116 = vrot.lane.b32.xlu0 %v3095_v13, %s4496_s30 }
 0x431   : > { %3114 = vrot.lane.b32.xlu1 %v3240_v5, %s4496_s30 }
 0x434   : > { %3309 = vrot.lane.b32.xlu0 %v6173_v33, %s4502_s23 }
 0x435   : > { %3307 = vrot.lane.b32.xlu1 %v6170_v28, %s4502_s23  ;;  %v3048_v28 = vld [vmem:[#allocation5 + $0x71] sm:$0xff] }
 0x438   : > { %3165 = vrot.lane.b32.xlu0 %v6179_v17, %s4498_s14 }
 0x439   : > { %3163 = vrot.lane.b32.xlu1 %v6173_v33, %s4498_s14  ;;  %v3097_v33 = vld [vmem:[#allocation5 + $0x72] sm:$0xff] }
 0x43c   : > { %3358 = vrot.lane.b32.xlu0 %v3046_v55, %s4503_s29 }
 0x43d   : > { %3356 = vrot.lane.b32.xlu1 %v3045_v51, %s4503_s29  ;;  %v3146_v51 = vld [vmem:[#allocation5 + $0x80] sm:$0xff] }
 0x440   : > { %3069 = vrot.lane.b32.xlu0 %v3047_v2, %s4493_s27 }
 0x441   : > { %3212 = vrot.lane.b32.xlu1 %v3046_v55, %s4500_s16 }
 0x444   : > { %3261 = vrot.lane.b32.xlu0 %v3095_v13, %s4501_s15 }
 0x445   : > { %3405 = vrot.lane.b32.xlu1 %v3240_v5, %s4504_s18 }
 0x448   : > { %3071 = vrot.lane.b32.xlu0 %v3048_v28, %s4493_s27  ;;  %s4293_s27 = sshll.u32 %s6694_s22, 5 }
 0x449   : > { %3214 = vrot.lane.b32.xlu1 %v3047_v2, %s4500_s16 }
 0x44c   : > { %3263 = vrot.lane.b32.xlu0 %v3242_v45, %s4501_s15 }
 0x44d   : > { %3407 = vrot.lane.b32.xlu1 %v3095_v13, %s4504_s18 }
 0x450   : > { %3120 = vrot.lane.b32.xlu0 %v3097_v33, %s4496_s30 }
 0x451   : > { %3118 = vrot.lane.b32.xlu1 %v3242_v45, %s4496_s30 }
 0x454   : > { %3313 = vrot.lane.b32.xlu0 %v6183_v44, %s4502_s23 }
 0x455   : > { %3311 = vrot.lane.b32.xlu1 %v6179_v17, %s4502_s23  ;;  %v3244_v17 = vld [vmem:[#allocation5 + $0x82] sm:$0xff] }
 0x458   : > { %3169 = vrot.lane.b32.xlu0 %v3146_v51, %s4498_s14 }
 0x459   : > { %3167 = vrot.lane.b32.xlu1 %v6183_v44, %s4498_s14  ;;  %v3294_v44 = vld [vmem:[#allocation5 + $0x90] sm:$0xff] }
 0x45c   : > { %3362 = vrot.lane.b32.xlu0 %v3048_v28, %s4503_s29 }
 0x45d   : > { %3360 = vrot.lane.b32.xlu1 %v3047_v2, %s4503_s29  ;;  %v3392_v2 = vld [vmem:[#allocation5 + $0x92] sm:$0xff] }
 0x460   : > { %3218 = vrot.lane.b32.xlu0 %v3195_v9, %s4500_s16 }
 0x461   : > { %3216 = vrot.lane.b32.xlu1 %v3048_v28, %s4500_s16 }
 0x464   : > { %3411 = vrot.lane.b32.xlu0 %v3097_v33, %s4504_s18 }
 0x465   : > { %3409 = vrot.lane.b32.xlu1 %v3242_v45, %s4504_s18 }
 0x468   : > { %3315 = vrot.lane.b32.xlu0 %v3146_v51, %s4502_s23 }
 0x469   : > { %3265 = vrot.lane.b32.xlu1 %v3097_v33, %s4501_s15 }
 0x46c   : > { %3364 = vrot.lane.b32.xlu0 %v3195_v9, %s4503_s29 }
 0x46d   : > { %3267 = vrot.lane.b32.xlu1 %v3244_v17, %s4501_s15 }
 0x46e   : > { %v3156_v30 = vpop.permute.xlu0 %3155 }
 0x46f   : > { %v3060_v55 = vpop.permute.xlu1 %3059  ;;  %3180 = vst.msk [vmem:[#allocation6] sm:$0xff] %vm3179_vm0, %v3156_v30 }
 0x470   : > { %3083 = vst.msk [vmem:[#allocation6 + $0x8] sm:$0xff] %vm3081_vm14, %v3060_v55  ;;  %3413 = vrot.lane.b32.xlu0 %v3244_v17, %s4504_s18 }
 0x471   : > { %3317 = vrot.lane.b32.xlu1 %v3294_v44, %s4502_s23 }
 0x472   : > { %v3205_v5 = vpop.permute.xlu0 %3204 }
 0x473   : > { %v3109_v13 = vpop.permute.xlu1 %3108  ;;  %3229 = vst.msk [vmem:[#allocation6] sm:$0xff] %vm3228_vm1, %v3205_v5 }
 0x474   : > { %3132 = vst.msk [vmem:[#allocation6 + $0x8] sm:$0xff] %vm3130_vm15, %v3109_v13 }
 0x475   : > { %3366 = vrot.lane.b32.xlu1 %v3343_v58, %s4503_s29 }
 0x476   : > { %v3207_v28 = vpop.permute.xlu0 %3206 }
 0x477   : > { %v3158_v45 = vpop.permute.xlu1 %3157 }
 0x478   : > { %3181 = vst.msk [vmem:[#allocation6 + $0x8] sm:$0xff] %vm3179_vm0, %v3158_v45 }
 0x479   : > { %3230 = vst.msk [vmem:[#allocation6 + $0x8] sm:$0xff] %vm3228_vm1, %v3207_v28  ;;  %3415 = vrot.lane.b32.xlu1 %v3392_v2, %s4504_s18 }
 0x47a   : > { %v3064_v33 = vpop.permute.xlu0 %3063 }
 0x47b   : > { %v3062_v51 = vpop.permute.xlu1 %3061  ;;  %3085 = vst.msk [vmem:[#allocation6 + $0x18] sm:$0xff] %vm3081_vm14, %v3064_v33 }
 0x47c   : > { %3084 = vst.msk [vmem:[#allocation6 + $0x10] sm:$0xff] %vm3081_vm14, %v3062_v51 }
 0x47e   : > { %v3256_v9 = vpop.permute.xlu0 %3255 }
 0x47f   : > { %v3254_v17 = vpop.permute.xlu1 %3253  ;;  %3279 = vst.msk [vmem:[#allocation6 + $0x8] sm:$0xff] %vm3277_vm2, %v3256_v9 }
 0x480   : > { %3278 = vst.msk [vmem:[#allocation6] sm:$0xff] %vm3277_vm2, %v3254_v17 }
 0x482   : > { %v3113_v44 = vpop.permute.xlu0 %3112 }
 0x483   : > { %v3111_v30 = vpop.permute.xlu1 %3110  ;;  %3134 = vst.msk [vmem:[#allocation6 + $0x18] sm:$0xff] %vm3130_vm15, %v3113_v44 }
 0x484   : > { %3133 = vst.msk [vmem:[#allocation6 + $0x10] sm:$0xff] %vm3130_vm15, %v3111_v30 }
 0x486   : > { %v3306_v55 = vpop.permute.xlu0 %3305 }
 0x487   : > { %v3304_v58 = vpop.permute.xlu1 %3303  ;;  %3329 = vst.msk [vmem:[#allocation6 + $0x8] sm:$0xff] %vm3327_vm3, %v3306_v55 }
 0x488   : > { %3328 = vst.msk [vmem:[#allocation6] sm:$0xff] %vm3327_vm3, %v3304_v58 }
 0x48a   : > { %v3162_v5 = vpop.permute.xlu0 %3161 }
 0x48b   : > { %v3160_v13 = vpop.permute.xlu1 %3159  ;;  %3183 = vst.msk [vmem:[#allocation6 + $0x18] sm:$0xff] %vm3179_vm0, %v3162_v5 }
 0x48c   : > { %3182 = vst.msk [vmem:[#allocation6 + $0x10] sm:$0xff] %vm3179_vm0, %v3160_v13 }
 0x48e   : > { %v3355_v2 = vpop.permute.xlu0 %3354 }
 0x48f   : > { %v3353_v28 = vpop.permute.xlu1 %3352  ;;  %3378 = vst.msk [vmem:[#allocation6 + $0x8] sm:$0xff] %vm3376_vm4, %v3355_v2 }
 0x490   : > { %3377 = vst.msk [vmem:[#allocation6] sm:$0xff] %vm3376_vm4, %v3353_v28 }
 0x492   : > { %v3066_v45 = vpop.permute.xlu0 %3065 }
 0x493   : > { %v3209_v33 = vpop.permute.xlu1 %3208  ;;  %3086 = vst.msk [vmem:[#allocation6 + $0x20] sm:$0xff] %vm3081_vm14, %v3066_v45 }
 0x494   : > { %3231 = vst.msk [vmem:[#allocation6 + $0x10] sm:$0xff] %vm3228_vm1, %v3209_v33 }
 0x496   : > { %v3258_v51 = vpop.permute.xlu0 %3257 }
 0x497   : > { %v3402_v9 = vpop.permute.xlu1 %3401  ;;  %3280 = vst.msk [vmem:[#allocation6 + $0x10] sm:$0xff] %vm3277_vm2, %v3258_v51 }
 0x498   : > { %3426 = vst.msk [vmem:[#allocation6] sm:$0xff] %vm3425_vm5, %v3402_v9 }
 0x49a   : > { %v3068_v17 = vpop.permute.xlu0 %3067 }
 0x49b   : > { %v3211_v44 = vpop.permute.xlu1 %3210  ;;  %3087 = vst.msk [vmem:[#allocation6 + $0x28] sm:$0xff] %vm3081_vm14, %v3068_v17 }
 0x49c   : > { %3232 = vst.msk [vmem:[#allocation6 + $0x18] sm:$0xff] %vm3228_vm1, %v3211_v44 }
 0x49e   : > { %v3260_v30 = vpop.permute.xlu0 %3259 }
 0x49f   : > { %v3404_v55 = vpop.permute.xlu1 %3403  ;;  %v3434_v58 = vld [vmem:[#allocation6] sm:$0xff]  ;;  %3281 = vst.msk [vmem:[#allocation6 + $0x18] sm:$0xff] %vm3277_vm2, %v3260_v30 }
 0x4a0   : > { %3427 = vst.msk [vmem:[#allocation6 + $0x8] sm:$0xff] %vm3425_vm5, %v3404_v55  ;;  %4424 = vmatprep.mubr.msk.f32.mxu1 %vm3451_vm6, %v3434_v58 }
 0x4a2   : > { %v3117_v5 = vpop.permute.xlu0 %3116 }
 0x4a3   : > { %v3115_v13 = vpop.permute.xlu1 %3114  ;;  %3136 = vst.msk [vmem:[#allocation6 + $0x28] sm:$0xff] %vm3130_vm15, %v3117_v5 }
 0x4a4   : > { %3135 = vst.msk [vmem:[#allocation6 + $0x20] sm:$0xff] %vm3130_vm15, %v3115_v13 }
 0x4a6   : > { %v3310_v2 = vpop.permute.xlu0 %3309 }
 0x4a7   : > { %v3308_v28 = vpop.permute.xlu1 %3307  ;;  %v3435_v45 = vld [vmem:[#allocation6 + $0x8] sm:$0xff]  ;;  %3331 = vst.msk [vmem:[#allocation6 + $0x18] sm:$0xff] %vm3327_vm3, %v3310_v2 }
 0x4a8   : > { %3330 = vst.msk [vmem:[#allocation6 + $0x10] sm:$0xff] %vm3327_vm3, %v3308_v28  ;;  %4425 = vmatmul.mubr.msk.f32.vlgmr.msra.gmra.mxu1 %vm3451_vm6, %v3435_v45 }
 0x4aa   : > { %v3166_v33 = vpop.permute.xlu0 %3165 }
 0x4ab   : > { %v3164_v51 = vpop.permute.xlu1 %3163  ;;  %3185 = vst.msk [vmem:[#allocation6 + $0x28] sm:$0xff] %vm3179_vm0, %v3166_v33 }
 0x4ac   : > { %3184 = vst.msk [vmem:[#allocation6 + $0x20] sm:$0xff] %vm3179_vm0, %v3164_v51 }
 0x4ae   : > { %v3359_v9 = vpop.permute.xlu0 %3358 }
 0x4af   : > { %v3357_v17 = vpop.permute.xlu1 %3356  ;;  %3380 = vst.msk [vmem:[#allocation6 + $0x18] sm:$0xff] %vm3376_vm4, %v3359_v9 }
 0x4b0   : > { %3379 = vst.msk [vmem:[#allocation6 + $0x10] sm:$0xff] %vm3376_vm4, %v3357_v17 }
 0x4b2   : > { %v3070_v44 = vpop.permute.xlu0 %3069 }
 0x4b3   : > { %v3213_v30 = vpop.permute.xlu1 %3212  ;;  %3088 = vst.msk [vmem:[#allocation6 + $0x30] sm:$0xff] %vm3081_vm14, %v3070_v44 }
 0x4b4   : > { %3233 = vst.msk [vmem:[#allocation6 + $0x20] sm:$0xff] %vm3228_vm1, %v3213_v30 }
 0x4b6   : > { %v3262_v55 = vpop.permute.xlu0 %3261 }
 0x4b7   : > { %v3406_v58 = vpop.permute.xlu1 %3405  ;;  %3282 = vst.msk [vmem:[#allocation6 + $0x20] sm:$0xff] %vm3277_vm2, %v3262_v55 }
 0x4b8   : > { %3428 = vst.msk [vmem:[#allocation6 + $0x10] sm:$0xff] %vm3425_vm5, %v3406_v58 }
 0x4ba   : > { %v3072_v5 = vpop.permute.xlu0 %3071 }
 0x4bb   : > { %v3215_v13 = vpop.permute.xlu1 %3214  ;;  %3089 = vst.msk [vmem:[#allocation6 + $0x38] sm:$0xff] %vm3081_vm14, %v3072_v5  ;;  %vm3860_vm14 = vcmask 786048  }
 0x4bc   : > { %3234 = vst.msk [vmem:[#allocation6 + $0x28] sm:$0xff] %vm3228_vm1, %v3215_v13 }
 0x4be   : > { %v3264_v2 = vpop.permute.xlu0 %3263 }
 0x4bf   : > { %v3408_v28 = vpop.permute.xlu1 %3407  ;;  %v3436_v45 = vld [vmem:[#allocation6 + $0x10] sm:$0xff]  ;;  %3283 = vst.msk [vmem:[#allocation6 + $0x28] sm:$0xff] %vm3277_vm2, %v3264_v2 }
 0x4c0   : > { %3429 = vst.msk [vmem:[#allocation6 + $0x18] sm:$0xff] %vm3425_vm5, %v3408_v28  ;;  %4427 = vmatprep.mubr.msk.f32.mxu1 %vm3451_vm6, %v3436_v45 }
 0x4c2   : > { %v3121_v33 = vpop.permute.xlu0 %3120 }
 0x4c3   : > { %v3119_v51 = vpop.permute.xlu1 %3118  ;;  %3138 = vst.msk [vmem:[#allocation6 + $0x38] sm:$0xff] %vm3130_vm15, %v3121_v33 }
 0x4c4   : > { %3137 = vst.msk [vmem:[#allocation6 + $0x30] sm:$0xff] %vm3130_vm15, %v3119_v51  ;;  %vm3880_vm15 = vcmask 917248  }
 0x4c6   : > { %v3314_v9 = vpop.permute.xlu0 %3313 }
 0x4c7   : > { %v3312_v17 = vpop.permute.xlu1 %3311  ;;  %v3437_v44 = vld [vmem:[#allocation6 + $0x18] sm:$0xff]  ;;  %3333 = vst.msk [vmem:[#allocation6 + $0x28] sm:$0xff] %vm3327_vm3, %v3314_v9 }
 0x4c8   : > { %3332 = vst.msk [vmem:[#allocation6 + $0x20] sm:$0xff] %vm3327_vm3, %v3312_v17  ;;  %4428 = vmatmul.mubr.msk.f32.gmra.mxu1 %vm3451_vm6, %v3437_v44 }
 0x4ca   : > { %v3170_v30 = vpop.permute.xlu0 %3169 }
 0x4cb   : > { %v3168_v55 = vpop.permute.xlu1 %3167  ;;  %3187 = vst.msk [vmem:[#allocation6 + $0x38] sm:$0xff] %vm3179_vm0, %v3170_v30 }
 0x4cc   : > { %3186 = vst.msk [vmem:[#allocation6 + $0x30] sm:$0xff] %vm3179_vm0, %v3168_v55  ;;  %vm3899_vm0 = vcmask 1048448  }
 0x4ce   : > { %v3363_v58 = vpop.permute.xlu0 %3362 }
 0x4cf   : > { %v3361_v5 = vpop.permute.xlu1 %3360  ;;  %3382 = vst.msk [vmem:[#allocation6 + $0x28] sm:$0xff] %vm3376_vm4, %v3363_v58 }
 0x4d0   : > { %3381 = vst.msk [vmem:[#allocation6 + $0x20] sm:$0xff] %vm3376_vm4, %v3361_v5 }
 0x4d2   : > { %v3219_v13 = vpop.permute.xlu0 %3218 }
 0x4d3   : > { %v3217_v2 = vpop.permute.xlu1 %3216  ;;  %3236 = vst.msk [vmem:[#allocation6 + $0x38] sm:$0xff] %vm3228_vm1, %v3219_v13 }
 0x4d4   : > { %3235 = vst.msk [vmem:[#allocation6 + $0x30] sm:$0xff] %vm3228_vm1, %v3217_v2  ;;  %vm4019_vm1 = vcmask 261120  }
 0x4d6   : > { %v3412_v28 = vpop.permute.xlu0 %3411 }
 0x4d7   : > { %v3410_v45 = vpop.permute.xlu1 %3409  ;;  %3431 = vst.msk [vmem:[#allocation6 + $0x28] sm:$0xff] %vm3425_vm5, %v3412_v28 }
 0x4d8   : > { %3430 = vst.msk [vmem:[#allocation6 + $0x20] sm:$0xff] %vm3425_vm5, %v3410_v45 }
 0x4da   : > { %v3316_v33 = vpop.permute.xlu0 %3315 }
 0x4db   : > { %v3266_v51 = vpop.permute.xlu1 %3265 }
 0x4dc   : > { %3284 = vst.msk [vmem:[#allocation6 + $0x30] sm:$0xff] %vm3277_vm2, %v3266_v51 }
 0x4dd   : > { %3334 = vst.msk [vmem:[#allocation6 + $0x30] sm:$0xff] %vm3327_vm3, %v3316_v33 }
 0x4de   : > { %v3365_v9 = vpop.permute.xlu0 %3364  ;;  %v3439_v30 = vld [vmem:[#allocation6 + $0x28] sm:$0xff] }
 0x4df   : > { %v3268_v17 = vpop.permute.xlu1 %3267  ;;  %v3438_v44 = vld [vmem:[#allocation6 + $0x20] sm:$0xff]  ;;  %3383 = vst.msk [vmem:[#allocation6 + $0x30] sm:$0xff] %vm3376_vm4, %v3365_v9 }
 0x4e0   : > { %3285 = vst.msk [vmem:[#allocation6 + $0x38] sm:$0xff] %vm3277_vm2, %v3268_v17  ;;  %4430 = vmatprep.mubr.msk.f32.mxu1 %vm3451_vm6, %v3438_v44  ;;  %vm3723_vm2 = vcmask 523264  }
 0x4e1   : > { %4431 = vmatmul.mubr.msk.f32.gmra.mxu1 %vm3451_vm6, %v3439_v30 }
 0x4e2   : > { %v3414_v55 = vpop.permute.xlu0 %3413 }
 0x4e3   : > { %v3318_v58 = vpop.permute.xlu1 %3317  ;;  %3432 = vst.msk [vmem:[#allocation6 + $0x30] sm:$0xff] %vm3425_vm5, %v3414_v55 }
 0x4e4   : > { %3335 = vst.msk [vmem:[#allocation6 + $0x38] sm:$0xff] %vm3327_vm3, %v3318_v58 }
 0x4e7   : > { %v3367_v5 = vpop.permute.xlu1 %3366 }
 0x4e8   : > { %3384 = vst.msk [vmem:[#allocation6 + $0x38] sm:$0xff] %vm3376_vm4, %v3367_v5 }
 0x4ea   : > { %v3440_v2 = vld [vmem:[#allocation6 + $0x30] sm:$0xff] }
 0x4eb   : > { %v3416_v13 = vpop.permute.xlu1 %3415  ;;  %4433 = vmatprep.mubr.msk.f32.mxu1 %vm3451_vm6, %v3440_v2 }
 0x4ec   : > { %3433 = vst.msk [vmem:[#allocation6 + $0x38] sm:$0xff] %vm3425_vm5, %v3416_v13 }
 0x4f3   : > { %v3441_v28 = vld [vmem:[#allocation6 + $0x38] sm:$0xff] }
 0x4f4   : > { %4434 = vmatmul.mubr.msk.f32.gmra.mxu1 %vm3451_vm6, %v3441_v28 }
 0x568   : > { %v4426_v45 = vpop.f32.mrf.mxu1 }
 0x569   : > { %v3583_v30 = vsel %vm3581_vm8, %v4426_v45, 0.0 }
 0x56a   : > { %v3542_v33 = vpop.f32.mrf.mxu1 }
 0x56b   : > { %v3582_v17 = vsel %vm3581_vm8, %v3542_v33, 0.0 }
 0x56c   : > { %v3584_v58 = vadd.f32 %v3583_v30, %v3582_v17 }
 0x588   : > { %v4429_v51 = vpop.f32.mrf.mxu1 }
 0x589   : > { %v3587_v2 = vsel %vm3581_vm8, %v4429_v51, 0.0 }
 0x58a   : > { %v3552_v9 = vpop.f32.mrf.mxu1 }
 0x58b   : > { %v3585_v55 = vsel %vm3581_vm8, %v3552_v9, 0.0 }
 0x58c   : > { %v3586_v5 = vadd.f32 %v3585_v55, %v3584_v58 }
 0x58e   : > { %v3588_v7 = vadd.f32 %v3587_v2, %v3586_v5 }
 0x5a1   : > { %v4432_v44 = vpop.f32.mrf.mxu1 }
 0x5a2   : > { %v3591_v36 = vsel %vm3581_vm8, %v4432_v44, 0.0 }
 0x5a3   : > { %v3562_v13 = vpop.f32.mrf.mxu1 }
 0x5a4   : > { %v3589_v28 = vsel %vm3581_vm8, %v3562_v13, 0.0 }
 0x5a5   : > { %v3590_v53 = vadd.f32 %v3589_v28, %v3588_v7 }
 0x5a7   : > { %v3592_v49 = vadd.f32 %v3591_v36, %v3590_v53 }
 0x5b4   : > { %v4435_v50 = vpop.f32.mrf.mxu1 }
 0x5b5   : > { %v3595_v57 = vsel %vm3581_vm8, %v4435_v50, 0.0 }
 0x5b6   : > { %v3572_v61 = vpop.f32.mrf.mxu1 }
 0x5b7   : > { %v3593_v41 = vsel %vm3581_vm8, %v3572_v61, 0.0 }
 0x5b8   : > { %v3594_v59 = vadd.f32 %v3593_v41, %v3592_v49 }
 0x5ba   : > { %v3596_v23 = vadd.f32 %v3595_v57, %v3594_v59 }
 0x5bc   : > { %v3597_v17 = vrot.slane %v3596_v23, 4 }
 0x5be   : > { %v3598_v30 = vadd.f32 %v3597_v17, %v3596_v23 }
 0x5c0   : > { %v3599_v55 = vrot.slane %v3598_v30, 2 }
 0x5c2   : > { %v3600_v58 = vadd.f32 %v3599_v55, %v3598_v30 }
 0x5c4   : > { %v3601_v22 = vrot.slane %v3600_v58, 1 }
 0x5c6   : > { %v3602_v29 = vadd.f32 %v3601_v22, %v3600_v58 }
 0x5c8   : > { %v3604_v47 = vmul.f32 0.015625, %v3602_v29 }
 0x5ca   : > { %v3605_v5 = vsub.f32 %v3542_v33, %v3604_v47  ;;  %v3606_v7 = vsub.f32 %v4426_v45, %v3604_v47  ;;  %v3607_v2 = vsub.f32 %v3552_v9, %v3604_v47  ;;  %v3608_v28 = vsub.f32 %v4429_v51, %v3604_v47 }
 0x5cb   : > { %v3609_v56 = vsub.f32 %v3562_v13, %v3604_v47  ;;  %v3610_v12 = vsub.f32 %v4432_v44, %v3604_v47  ;;  %v3611_v59 = vsub.f32 %v3572_v61, %v3604_v47  ;;  %v3612_v33 = vsub.f32 %v4435_v50, %v3604_v47 }
 0x5cc   : > { %v3613_v35 = vmul.f32 %v3605_v5, %v3605_v5  ;;  %v3614_v36 = vmul.f32 %v3606_v7, %v3606_v7  ;;  %v3615_v53 = vmul.f32 %v3607_v2, %v3607_v2  ;;  %v3616_v41 = vmul.f32 %v3608_v28, %v3608_v28 }
 0x5cd   : > { %v3617_v17 = vmul.f32 %v3609_v56, %v3609_v56  ;;  %v3618_v45 = vmul.f32 %v3610_v12, %v3610_v12  ;;  %v3619_v13 = vmul.f32 %v3611_v59, %v3611_v59  ;;  %v3620_v55 = vmul.f32 %v3612_v33, %v3612_v33 }
 0x5ce   : > { %v3621_v49 = vsel %vm3581_vm8, %v3613_v35, 0.0  ;;  %v3622_v57 = vsel %vm3581_vm8, %v3614_v36, 0.0  ;;  %v3624_v22 = vsel %vm3581_vm8, %v3615_v53, 0.0  ;;  %v3626_v51 = vsel %vm3581_vm8, %v3616_v41, 0.0 }
 0x5cf   : > { %v3623_v23 = vadd.f32 %v3622_v57, %v3621_v49  ;;  %v3628_v30 = vsel %vm3581_vm8, %v3617_v17, 0.0  ;;  %v3630_v35 = vsel %vm3581_vm8, %v3618_v45, 0.0  ;;  %v3632_v36 = vsel %vm3581_vm8, %v3619_v13, 0.0  ;;  %v4282_v45 = vld [vmem:[%s6641_s5] ss:$0 sm:$0xff] }
 0x5d0   : > { %v3634_v49 = vsel %vm3581_vm8, %v3620_v55, 0.0  ;;  %v3935_v55 = vld [vmem:[%s6643_s7 + $0x78] sm:$0xff] }
 0x5d1   : > { %v3625_v29 = vadd.f32 %v3624_v22, %v3623_v23  ;;  %3945 = vmatpush1.msra.mxu1 %v3935_v55 }
 0x5d2   : > { %3946 = vmatprep.subr.mxu1 %v4492_v0 }
 0x5d3   : > { %v3627_v9 = vadd.f32 %v3626_v51, %v3625_v29 }
 0x5d5   : > { %v3629_v44 = vadd.f32 %v3628_v30, %v3627_v9 }
 0x5d7   : > { %v3631_v58 = vadd.f32 %v3630_v35, %v3629_v44  ;;  %v4283_v35 = vld [vmem:[%s6642_s6] ss:$0 sm:$0xff] }
 0x5d9   : > { %v3633_v61 = vadd.f32 %v3632_v36, %v3631_v58 }
 0x5db   : > { %v3635_v53 = vadd.f32 %v3634_v49, %v3633_v61 }
 0x5dd   : > { %v3636_v57 = vrot.slane %v3635_v53, 4 }
 0x5df   : > { %v3637_v47 = vadd.f32 %v3636_v57, %v3635_v53 }
 0x5e1   : > { %v3638_v50 = vrot.slane %v3637_v47, 2 }
 0x5e3   : > { %v3639_v23 = vadd.f32 %v3638_v50, %v3637_v47 }
 0x5e5   : > { %v3640_v41 = vrot.slane %v3639_v23, 1 }
 0x5e7   : > { %v3641_v22 = vadd.f32 %v3640_v41, %v3639_v23 }
 0x5e9   : > { %v3642_v29 = vmul.f32 0.015625, %v3641_v22 }
 0x5eb   : > { %v3643_v51 = vadd.f32 1e-05, %v3642_v29 }
 0x5ed   : > { %4480 = vrsqrt.f32 %v3643_v51 }
 0x5fa   : > { %v4481_v17 = vpop.eup %4480 }
 0x5fb   : > { %v3645_v9 = vmul.f32 %v4481_v17, %v3605_v5  ;;  %v3647_v13 = vmul.f32 %v4481_v17, %v3607_v2  ;;  %v3649_v30 = vmul.f32 %v4481_v17, %v3609_v56  ;;  %v3651_v44 = vmul.f32 %v4481_v17, %v3611_v59  ;;  %v3934_v56 = vld [vmem:[%s6643_s7 + $0x70] sm:$0xff] }
 0x5fc   : > { %v3646_v58 = vmul.f32 %v4481_v17, %v3606_v7  ;;  %v3648_v36 = vmul.f32 %v4481_v17, %v3608_v28  ;;  %v3650_v61 = vmul.f32 %v4481_v17, %v3610_v12  ;;  %v3652_v49 = vmul.f32 %v4481_v17, %v3612_v33  ;;  %3947 = vmatpush1.msra.mxu1 %v3934_v56  ;;  %v3933_v33 = vld [vmem:[%s6643_s7 + $0x68] sm:$0xff] }
 0x5fd   : > { %v3660_v53 = vmul.f32 %v4282_v45, %v3645_v9  ;;  %v3662_v57 = vmul.f32 %v4282_v45, %v3647_v13  ;;  %v3664_v47 = vmul.f32 %v4282_v45, %v3649_v30  ;;  %v3666_v5 = vmul.f32 %v4282_v45, %v3651_v44  ;;  %3948 = vmatprep.subr.mxu1 %v4492_v0  ;;  %v3932_v44 = vld [vmem:[%s6643_s7 + $0x60] sm:$0xff] }
 0x5fe   : > { %v3661_v2 = vmul.f32 %v4282_v45, %v3646_v58  ;;  %v3663_v59 = vmul.f32 %v4282_v45, %v3648_v36  ;;  %v3665_v50 = vmul.f32 %v4282_v45, %v3650_v61  ;;  %v3667_v23 = vmul.f32 %v4282_v45, %v3652_v49  ;;  %3949 = vmatpush1.msra.mxu1 %v3933_v33  ;;  %v3931_v61 = vld [vmem:[%s6643_s7 + $0x58] sm:$0xff]  ;;  %v3930_v49 = vld [vmem:[%s6643_s7 + $0x50] sm:$0xff]  ;;  %v3924_v33 = vld [vmem:[%s6643_s7 + $0x20] sm:$0xff] }
 0x5ff   : > { %v6388_v41 = vadd.f32 %v4283_v35, %v3660_v53  ;;  %v6390_v7 = vadd.f32 %v4283_v35, %v3662_v57  ;;  %v6392_v12 = vadd.f32 %v4283_v35, %v3664_v47  ;;  %v6394_v28 = vadd.f32 %v4283_v35, %v3666_v5  ;;  %3950 = vmatprep.subr.mxu1 %v4492_v0  ;;  %v3929_v53 = vld [vmem:[%s6643_s7 + $0x48] sm:$0xff]  ;;  %v3928_v57 = vld [vmem:[%s6643_s7 + $0x40] sm:$0xff] }
 0x600   : > { %v6400_v22 = vadd.f32 %v4283_v35, %v3661_v2  ;;  %v6402_v29 = vadd.f32 %v4283_v35, %v3663_v59  ;;  %v6404_v51 = vadd.f32 %v4283_v35, %v3665_v50  ;;  %v6406_v17 = vadd.f32 %v4283_v35, %v3667_v23  ;;  %3951 = vmatpush1.msra.mxu1 %v3932_v44  ;;  %v3927_v59 = vld [vmem:[%s6643_s7 + $0x38] sm:$0xff]  ;;  %v3926_v50 = vld [vmem:[%s6643_s7 + $0x30] sm:$0xff]  ;;  %v3925_v23 = vld [vmem:[%s6643_s7 + $0x28] sm:$0xff] }
 0x601   : > { %v3683_v45 = vmax.f32 %v6388_v41, 0.0  ;;  %v3685_v9 = vmax.f32 %v6390_v7, 0.0  ;;  %v3687_v13 = vmax.f32 %v6392_v12, 0.0  ;;  %v3689_v30 = vmax.f32 %v6394_v28, 0.0  ;;  %3952 = vmatprep.subr.mxu1 %v4492_v0 }
 0x602   : > { %v3684_v55 = vmax.f32 %v6400_v22, 0.0  ;;  %v3686_v35 = vmax.f32 %v6402_v29, 0.0  ;;  %v3688_v58 = vmax.f32 %v6404_v51, 0.0  ;;  %v3690_v36 = vmax.f32 %v6406_v17, 0.0  ;;  %3953 = vmatpush1.msra.mxu1 %v3931_v61 }
 0x603   : > { %3726 = vst.msk [vmem:[#allocation7] sm:$0xff] %vm3581_vm8, %v3683_v45  ;;  %3728 = vst.msk [vmem:[#allocation7 + $0x10] sm:$0xff] %vm3581_vm8, %v3685_v9  ;;  %3954 = vmatprep.subr.mxu1 %v4492_v0 }
 0x604   : > { %3730 = vst.msk [vmem:[#allocation7 + $0x20] sm:$0xff] %vm3581_vm8, %v3687_v13  ;;  %3732 = vst.msk [vmem:[#allocation7 + $0x30] sm:$0xff] %vm3581_vm8, %v3689_v30  ;;  %3955 = vmatpush1.msra.mxu1 %v3930_v49 }
 0x605   : > { %3956 = vmatprep.subr.mxu1 %v4492_v0 }
 0x606   : > { %3957 = vmatpush1.msra.mxu1 %v3929_v53 }
 0x607   : > { %3958 = vmatprep.subr.mxu1 %v4492_v0 }
 0x608   : > { %3959 = vmatpush1.msra.mxu1 %v3928_v57 }
 0x609   : > { %3960 = vmatprep.subr.mxu1 %v4492_v0 }
 0x60a   : > { %v3734_v5 = vld [vmem:[#allocation7] ss:$2 sm:$0xf]  ;;  %v3736_v2 = vld [vmem:[#allocation7 + $0x10] ss:$2 sm:$0xf]  ;;  %3961 = vmatpush1.msra.mxu1 %v3927_v59 }
 0x60b   : > { %v3740_v47 = vld [vmem:[#allocation7 + $0x30] ss:$2 sm:$0xf]  ;;  %v3738_v56 = vld [vmem:[#allocation7 + $0x20] ss:$2 sm:$0xf]  ;;  %3962 = vmatprep.subr.mxu1 %v4492_v0 }
 0x60c   : > { %3750 = vst.msk [vmem:[#allocation8 + $0x9] sm:$0xf] %vm3749_vm9, %v3734_v5  ;;  %3753 = vst.msk [vmem:[#allocation8 + $0x21] sm:$0xf] %vm3749_vm9, %v3740_v47  ;;  %3963 = vmatpush1.msra.mxu1 %v3926_v50 }
 0x60d   : > { %3752 = vst.msk [vmem:[#allocation8 + $0x19] sm:$0xf] %vm3749_vm9, %v3738_v56  ;;  %3751 = vst.msk [vmem:[#allocation8 + $0x11] sm:$0xf] %vm3749_vm9, %v3736_v2  ;;  %3964 = vmatprep.subr.mxu1 %v4492_v0 }
 0x60e   : > { %3965 = vmatpush1.msra.mxu1 %v3925_v23 }
 0x60f   : > { %3966 = vmatprep.subr.mxu1 %v4492_v0 }
 0x610   : > { %3967 = vmatpush1.msra.mxu1 %v3924_v33  ;;  %v3923_v33 = vld [vmem:[%s6643_s7 + $0x18] sm:$0xff] }
 0x611   : > { %3968 = vmatprep.subr.mxu1 %v4492_v0 }
 0x612   : > { %3969 = vmatpush1.msra.mxu1 %v3923_v33  ;;  %v6663_v33 = vmax.f32 %v6066_v54, 0.0  ;;  %v6675_v54 = vmax.f32 %v5975_v20, 0.0  ;;  %v6682_v20 = vmax.f32 %v6002_v24, 0.0 }
 0x613   : > { %v4460_v44 = vld [vmem:[#allocation8 + $0x2] ss:$8 sps:$4 sm:$0xff]   ;;  %3970 = vmatprep.subr.mxu1 %v4492_v0 }
 0x614   : > { %v4461_v61 = vld [vmem:[#allocation8 + $0x1] ss:$8 sps:$4 sm:$0xff]   ;;  %3797 = vrot.lane.b32.xlu1 %v4460_v44, %s4500_s16  ;;  %v4464_v53 = vld [vmem:[#allocation8 + $0x12] ss:$8 sps:$4 sm:$0xff]  }
 0x615   : > { %3778 = vrot.lane.b32.xlu0 %v4461_v61, %s4496_s30  ;;  %v4462_v49 = vld [vmem:[#allocation8 + $0x9] ss:$8 sps:$4 sm:$0xff]   ;;  %3914 = vst.msk [vmem:[#allocation9 + $0x8] sm:$0xff] %vm3581_vm8, %v4464_v53  ;;  %v3922_v61 = vld [vmem:[%s6643_s7 + $0x10] sm:$0xff]  ;;  %v3921_v53 = vld [vmem:[%s6643_s7 + $0x8] sm:$0xff] }
 0x616   : > { %v4463_v57 = vld [vmem:[#allocation8 + $0x8] ss:$8 sps:$4 sm:$0xff]   ;;  %3971 = vmatpush1.msra.mxu1 %v3922_v61  ;;  %v6665_v61 = vmax.f32 %v6083_v10, 0.0  ;;  %v6677_v10 = vmax.f32 %v5978_v6, 0.0  ;;  %v6684_v6 = vmax.f32 %v6129_v14, 0.0  ;;  %v6691_v14 = vmax.f32 %v6148_v27, 0.0 }
 0x617   : > { %v4465_v47 = vld [vmem:[#allocation8 + $0xa] ss:$8 sps:$4 sm:$0xff]   ;;  %3972 = vmatprep.subr.mxu1 %v4492_v0 }
 0x618   : > { %3835 = vrot.lane.b32.xlu1 %v4462_v49, %s4504_s18  ;;  %v4466_v5 = vld [vmem:[#allocation8 + $0x11] ss:$8 sps:$4 sm:$0xff]   ;;  %v4475_v50 = vld [vmem:[#allocation8] ss:$8 sps:$4 sm:$0xff]   ;;  %3973 = vmatpush1.msra.mxu1 %v3921_v53 }
 0x619   : > { %3816 = vrot.lane.b32.xlu0 %v4463_v57, %s4502_s23  ;;  %v4467_v56 = vld [vmem:[#allocation8 + $0x10] ss:$8 sps:$4 sm:$0xff]   ;;  %3766 = vst.msk [vmem:[#allocation9] sm:$0xff] %vm3581_vm8, %v4475_v50  ;;  %v4477_v57 = vld [vmem:[#allocation8 + $0x22] ss:$8 sps:$4 sm:$0xff]   ;;  %3974 = vmatprep.subr.mxu1 %v4492_v0 }
 0x61a   : > { %v4468_v59 = vld [vmem:[#allocation8 + $0x12] ss:$8 sps:$4 sm:$0xff]   ;;  %3915 = vst.msk [vmem:[#allocation9 + $0x18] sm:$0xff] %vm3581_vm8, %v4477_v57  ;;  %v4473_v50 = vld [vmem:[#allocation8 + $0x21] ss:$8 sps:$4 sm:$0xff]  }
 0x61b   : > { %v4476_v23 = vld [vmem:[#allocation8 + $0x10] ss:$8 sps:$4 sm:$0xff]  }
 0x61c   : > { %3854 = vrot.lane.b32.xlu1 %v4465_v47, %s4505_s20  ;;  %v3917_v2 = vld [vmem:[#allocation9 + $0x8] sm:$0xff]  ;;  %3767 = vst.msk [vmem:[#allocation9 + $0x10] sm:$0xff] %vm3581_vm8, %v4476_v23  ;;  %v3920_v47 = vld [vmem:[%s6643_s7] sm:$0xff]  ;;  %v4474_v23 = vld [vmem:[#allocation8 + $0x20] ss:$8 sps:$4 sm:$0xff]  }
 0x61d   : > { %3780 = vrot.lane.b32.xlu0 %v4466_v5, %s4496_s30  ;;  %4284 = vmatprep.mubr.msk.f32.mxu1 %vm3581_vm8, %v3917_v2  ;;  %v4469_v44 = vld [vmem:[#allocation8 + $0x11] ss:$8 sps:$4 sm:$0xff]  }
 0x61e   : > { %v4470_v49 = vld [vmem:[#allocation8 + $0x18] ss:$8 sps:$4 sm:$0xff]   ;;  %3975 = vmatpush1.msra.mxu1 %v3920_v47 }
 0x61f   : > { %v4471_v5 = vld [vmem:[#allocation8 + $0x1a] ss:$8 sps:$4 sm:$0xff]   ;;  %4004 = vmatprep.subr.mxu1 %v4492_v0 }
 0x620   : > { %3874 = vrot.lane.b32.xlu1 %v4467_v56, %s4506_s24  ;;  %v4472_v56 = vld [vmem:[#allocation8 + $0x19] ss:$8 sps:$4 sm:$0xff]  }
 0x621   : > { %3799 = vrot.lane.b32.xlu0 %v4468_v59, %s4500_s16  ;;  %v3937_v2 = vld [vmem:[%s6643_s7 + $0x88] sm:$0xff]  ;;  %v3936_v59 = vld [vmem:[%s6643_s7 + $0x80] sm:$0xff] }
 0x622   : > { %4005 = vmatpush2.msra.mxu1 %v3937_v2 }
 0x623   : > { %4006 = vmatprep.subr.mxu1 %v4492_v0  ;;  %v6666_v0 = vmax.f32 %v5990_v16, 0.0  ;;  %v6673_v16 = vmax.f32 %v6103_v48, 0.0  ;;  %v6685_v48 = vmax.f32 %v5984_v3, 0.0  ;;  %v6690_v3 = vmax.f32 %v6008_v32, 0.0 }
 0x624   : > { %3893 = vrot.lane.b32.xlu1 %v4469_v44, %s4507_s13  ;;  %4007 = vmatpush2.msra.mxu1 %v3936_v59  ;;  %v6664_v44 = vmax.f32 %v5987_v15, 0.0  ;;  %v6671_v15 = vmax.f32 %v6095_v37, 0.0  ;;  %v6683_v37 = vmax.f32 %v5981_v34, 0.0  ;;  %v6689_v34 = vmax.f32 %v6144_v52, 0.0 }
 0x625   : > { %3818 = vrot.lane.b32.xlu0 %v4470_v49, %s4502_s23  ;;  %v6667_v49 = vmax.f32 %v5969_v1, 0.0  ;;  %v6674_v1 = vmax.f32 %v5996_v21, 0.0  ;;  %v6681_v21 = vmax.f32 %v6125_v60, 0.0  ;;  %s438_s23 = scalar_lea.vmem %s6648_s12, %s4293_s27 }
 0x628   : > { %3856 = vrot.lane.b32.xlu1 %v4471_v5, %s4505_s20 }
 0x629   : > { %3837 = vrot.lane.b32.xlu0 %v4472_v56, %s4504_s18  ;;  %s4291_s18 = sshll.u32 %s6694_s22, 4 }
 0x62a   : > { %s6606_s25 = scalar_lea.vmem %s6646_s10, %s4291_s18  ;;  %s433_s19 = scalar_lea.vmem %s6647_s11, %s4291_s18 }
 0x62c   : > { %3895 = vrot.lane.b32.xlu1 %v4473_v50, %s4507_s13 }
 0x62d   : > { %3876 = vrot.lane.b32.xlu0 %v4474_v23, %s4506_s24 }
 0x64b   : > { %2882 = vxpose.xlu0.b32.start [1/16] (narrow) %v2850_v26, 8  ;;  %v6670_v26 = vmax.f32 %v6091_v31, 0.0  ;;  %v6680_v31 = vmax.f32 %v5999_v8, 0.0  ;;  %v6687_v8 = vmax.f32 %v6136_v43, 0.0  ;;  %v6692_v43 = vmax.f32 %v6155_v40, 0.0 }
 0x64f   : > { %2883 = vxpose.xlu0.b32.cont [2/16] (narrow) %v2851_v18, 8  ;;  %v6672_v18 = vmax.f32 %v5993_v39, 0.0  ;;  %v6679_v39 = vmax.f32 %v6121_v42, 0.0 }
 0x653   : > { %2884 = vxpose.xlu0.b32.cont [3/16] (narrow) %v6663_v33, 8 }
 0x655   : > { %2914 = vxpose.xlu1.b32.start [1/16] (narrow) %v6664_v44, 8 }
 0x657   : > { %2885 = vxpose.xlu0.b32.cont [4/16] (narrow) %v6665_v61, 8 }
 0x659   : > { %2915 = vxpose.xlu1.b32.cont [2/16] (narrow) %v6666_v0, 8 }
 0x65b   : > { %2886 = vxpose.xlu0.b32.cont [5/16] (narrow) %v6667_v49, 8 }
 0x65d   : > { %2916 = vxpose.xlu1.b32.cont [3/16] (narrow) %v6668_v63, 8 }
 0x65f   : > { %2887 = vxpose.xlu0.b32.cont [6/16] (narrow) %v6669_v62, 8 }
 0x661   : > { %2917 = vxpose.xlu1.b32.cont [4/16] (narrow) %v6670_v26, 8 }
 0x663   : > { %2888 = vxpose.xlu0.b32.cont [7/16] (narrow) %v6671_v15, 8 }
 0x665   : > { %2918 = vxpose.xlu1.b32.cont [5/16] (narrow) %v6672_v18, 8 }
 0x667   : > { %2889 = vxpose.xlu0.b32.cont [8/16] (narrow) %v6673_v16, 8 }
 0x669   : > { %2919 = vxpose.xlu1.b32.cont [6/16] (narrow) %v6674_v1, 8 }
 0x66b   : > { %2890 = vxpose.xlu0.b32.cont [9/16] (narrow) %v6675_v54, 8 }
 0x66d   : > { %2920 = vxpose.xlu1.b32.cont [7/16] (narrow) %v6676_v38, 8 }
 0x66f   : > { %2891 = vxpose.xlu0.b32.cont [10/16] (narrow) %v6677_v10, 8  ;;  %v4286_v10 = vld [vmem:[%s6644_s8] ss:$0 sm:$0xff] }
 0x671   : > { %2921 = vxpose.xlu1.b32.cont [8/16] (narrow) %v6678_v25, 8 }
 0x673   : > { %2892 = vxpose.xlu0.b32.cont [11/16] (narrow) %v6679_v39, 8 }
 0x675   : > { %2922 = vxpose.xlu1.b32.cont [9/16] (narrow) %v6680_v31, 8  ;;  %v4287_v31 = vld [vmem:[%s6645_s9] ss:$0 sm:$0xff] }
 0x677   : > { %2893 = vxpose.xlu0.b32.cont [12/16] (narrow) %v6681_v21, 8 }
 0x679   : > { %2923 = vxpose.xlu1.b32.cont [10/16] (narrow) %v6682_v20, 8 }
 0x67b   : > { %2894 = vxpose.xlu0.b32.cont [13/16] (narrow) %v6683_v37, 8 }
 0x67d   : > { %2924 = vxpose.xlu1.b32.cont [11/16] (narrow) %v6684_v6, 8 }
 0x67f   : > { %2895 = vxpose.xlu0.b32.cont [14/16] (narrow) %v6685_v48, 8 }
 0x681   : > { %2925 = vxpose.xlu1.b32.cont [12/16] (narrow) %v6686_v46, 8 }
 0x683   : > { %2896 = vxpose.xlu0.b32.cont [15/16] (narrow) %v6687_v8, 8 }
 0x685   : > { %2926 = vxpose.xlu1.b32.cont [13/16] (narrow) %v6688_v19, 8 }
 0x686   : > { %v3798_v24 = vpop.permute.xlu1 %3797 }
 0x687   : > { %2897 = vxpose.xlu0.b32.end [16/16] (narrow) %v6689_v34, 8  ;;  %v3779_v42 = vpop.permute.xlu0 %3778 }
 0x688   : > { %3785 = vst.msk [vmem:[#allocation9] sm:$0xff] %vm3784_vm10, %v3779_v42 }
 0x689   : > { %2927 = vxpose.xlu1.b32.cont [14/16] (narrow) %v6690_v3, 8  ;;  %3804 = vst.msk [vmem:[#allocation9] sm:$0xff] %vm3803_vm11, %v3798_v24 }
 0x68a   : > { %v3836_v60 = vpop.permute.xlu1 %3835 }
 0x68b   : > { %3691 = vxpose.xlu0.b32.start [1/8] (short) (narrow) %v3683_v45, 16  ;;  %v3817_v11 = vpop.permute.xlu0 %3816 }
 0x68c   : > { %3823 = vst.msk [vmem:[#allocation9] sm:$0xff] %vm3822_vm12, %v3817_v11 }
 0x68d   : > { %2928 = vxpose.xlu1.b32.cont [15/16] (narrow) %v6691_v14, 8  ;;  %3842 = vst.msk [vmem:[#allocation9] sm:$0xff] %vm3841_vm13, %v3836_v60 }
 0x68e   : > { %v3855_v4 = vpop.permute.xlu1 %3854 }
 0x68f   : > { %3861 = vst.msk [vmem:[#allocation9] sm:$0xff] %vm3860_vm14, %v3855_v4  ;;  %3692 = vxpose.xlu0.b32.cont [2/8] (short) (narrow) %v3684_v55, 16  ;;  %v3781_v32 = vpop.permute.xlu0 %3780  ;;  %v3919_v55 = vld [vmem:[#allocation9 + $0x18] sm:$0xff] }
 0x690   : > { %3786 = vst.msk [vmem:[#allocation9 + $0x10] sm:$0xff] %vm3784_vm10, %v3781_v32 }
 0x691   : > { %2929 = vxpose.xlu1.b32.end [16/16] (narrow) %v6692_v43, 8 }
 0x692   : > { %v3875_v52 = vpop.permute.xlu1 %3874 }
 0x693   : > { %3881 = vst.msk [vmem:[#allocation9] sm:$0xff] %vm3880_vm15, %v3875_v52  ;;  %3693 = vxpose.xlu0.b32.cont [3/8] (short) (narrow) %v3685_v9, 16  ;;  %v3800_v27 = vpop.permute.xlu0 %3799 }
 0x694   : > { %3805 = vst.msk [vmem:[#allocation9 + $0x10] sm:$0xff] %vm3803_vm11, %v3800_v27 }
 0x696   : > { %v3894_v41 = vpop.permute.xlu1 %3893 }
 0x697   : > { %3900 = vst.msk [vmem:[#allocation9] sm:$0xff] %vm3899_vm0, %v3894_v41  ;;  %3694 = vxpose.xlu0.b32.cont [4/8] (short) (narrow) %v3686_v35, 16  ;;  %v3819_v22 = vpop.permute.xlu0 %3818 }
 0x698   : > { %3824 = vst.msk [vmem:[#allocation9 + $0x10] sm:$0xff] %vm3822_vm12, %v3819_v22 }
 0x69a   : > { %v3857_v40 = vpop.permute.xlu1 %3856 }
 0x69b   : > { %3695 = vxpose.xlu0.b32.cont [5/8] (short) (narrow) %v3687_v13, 16  ;;  %v3838_v45 = vpop.permute.xlu0 %3837 }
 0x69c   : > { %3843 = vst.msk [vmem:[#allocation9 + $0x10] sm:$0xff] %vm3841_vm13, %v3838_v45 }
 0x69d   : > { %3862 = vst.msk [vmem:[#allocation9 + $0x10] sm:$0xff] %vm3860_vm14, %v3857_v40 }
 0x69e   : > { %v3896_v7 = vpop.permute.xlu1 %3895  ;;  %v3916_v9 = vld [vmem:[#allocation9] sm:$0xff] }
 0x69f   : > { %3696 = vxpose.xlu0.b32.cont [6/8] (short) (narrow) %v3688_v58, 16  ;;  %v3877_v29 = vpop.permute.xlu0 %3876  ;;  %4009 = vmatmul.mubr.f32.vlgmr.msra.gmra.mxu1 %v3916_v9 }
 0x6a0   : > { %3882 = vst.msk [vmem:[#allocation9 + $0x10] sm:$0xff] %vm3880_vm15, %v3877_v29  ;;  %4285 = vmatprep.mubr.msk.f32.mxu1 %vm3581_vm8, %v3919_v55 }
 0x6a1   : > { %3901 = vst.msk [vmem:[#allocation9 + $0x10] sm:$0xff] %vm3899_vm0, %v3896_v7 }
 0x6a3   : > { %3697 = vxpose.xlu0.b32.cont [7/8] (short) (narrow) %v3689_v30, 16 }
 0x6a7   : > { %3698 = vxpose.xlu0.b32.end [8/8] (short) (narrow) %v3690_v36, 16 }
 0x6a8   : > { %v3918_v12 = vld [vmem:[#allocation9 + $0x10] sm:$0xff] }
 0x6a9   : > { %4014 = vmatmul.mubr.f32.gmra.mxu1 %v3918_v12 }
 0x6c7   : > { %v2898_v6 = vpop.trf.xlu0 }
 0x6c8   : > { %2946 = vst [vmem:[%s6606_s25] sm:$0xff] %v2898_v6 }
 0x6d1   : > { %v2930_v51 = vpop.trf.xlu1 }
 0x6d2   : > { %2947 = vst [vmem:[%s6606_s25 + $0x8] sm:$0xff] %v2930_v51 }
 0x707   : > { %v3707_v8 = vpop.trf.xlu0 }
 0x708   : > { %3724 = vst.msk [vmem:[%s433_s19] sm:$0xff] %vm3723_vm2, %v3707_v8 }
 0x70b   : > { %v3708_v24 = vpop.trf.xlu0 }
 0x70c   : > { %3725 = vst.msk [vmem:[%s433_s19 + $0x8] sm:$0xff] %vm3723_vm2, %v3708_v24 }
 0x75f   : > { %v4010_v13 = vpop.f32.mrf.mxu1 }
 0x760   : > { %v4020_v30 = vsel %vm4019_vm1, %v4010_v13, 0.0 }
 0x761   : > { %v4012_v35 = vpop.f32.mrf.mxu1 }
 0x769   : > { %v4015_v28 = vpop.f32.mrf.mxu1 }
 0x76a   : > { %v4021_v17 = vsel %vm4019_vm1, %v4015_v28, 0.0 }
 0x76b   : > { %v4022_v58 = vadd.f32 %v4021_v17, %v4020_v30  ;;  %v4017_v36 = vpop.f32.mrf.mxu1 }
 0x76d   : > { %v4023_v53 = vrot.slane %v4022_v58, 4 }
 0x76f   : > { %v4024_v57 = vadd.f32 %v4023_v53, %v4022_v58 }
 0x771   : > { %v4025_v47 = vrot.slane %v4024_v57, 2 }
 0x773   : > { %v4026_v5 = vadd.f32 %v4025_v47, %v4024_v57 }
 0x775   : > { %v4027_v56 = vrot.slane %v4026_v5, 1 }
 0x777   : > { %v4028_v2 = vadd.f32 %v4027_v56, %v4026_v5 }
 0x779   : > { %v4030_v59 = vmul.f32 0.0625, %v4028_v2 }
 0x77b   : > { %v4031_v50 = vsub.f32 %v4010_v13, %v4030_v59  ;;  %v4032_v23 = vsub.f32 %v4015_v28, %v4030_v59 }
 0x77d   : > { %v4033_v33 = vmul.f32 %v4031_v50, %v4031_v50  ;;  %v4034_v44 = vmul.f32 %v4032_v23, %v4032_v23 }
 0x77f   : > { %v4035_v61 = vsel %vm4019_vm1, %v4033_v33, 0.0  ;;  %v4036_v0 = vsel %vm4019_vm1, %v4034_v44, 0.0 }
 0x780   : > { %v4037_v49 = vadd.f32 %v4036_v0, %v4035_v61 }
 0x782   : > { %v4038_v63 = vrot.slane %v4037_v49, 4 }
 0x784   : > { %v4039_v62 = vadd.f32 %v4038_v63, %v4037_v49 }
 0x786   : > { %v4040_v26 = vrot.slane %v4039_v62, 2 }
 0x788   : > { %v4041_v15 = vadd.f32 %v4040_v26, %v4039_v62 }
 0x78a   : > { %v4042_v18 = vrot.slane %v4041_v15, 1 }
 0x78c   : > { %v4043_v16 = vadd.f32 %v4042_v18, %v4041_v15 }
 0x78e   : > { %v4044_v1 = vmul.f32 0.0625, %v4043_v16 }
 0x790   : > { %v4045_v54 = vadd.f32 1e-05, %v4044_v1 }
 0x792   : > { %4482 = vrsqrt.f32 %v4045_v54 }
 0x79f   : > { %v4483_v38 = vpop.eup %4482 }
 0x7a0   : > { %v4047_v25 = vmul.f32 %v4483_v38, %v4031_v50  ;;  %v4048_v39 = vmul.f32 %v4483_v38, %v4032_v23 }
 0x7a2   : > { %v4057_v21 = vmul.f32 %v4286_v10, %v4048_v39  ;;  %v4056_v20 = vmul.f32 %v4286_v10, %v4047_v25 }
 0x7a4   : > { %v4065_v37 = vadd.f32 %v4287_v31, %v4056_v20  ;;  %v4066_v46 = vadd.f32 %v4287_v31, %v4057_v21 }
 0x7a6   : > { %v4067_v48 = vmax.f32 %v4065_v37, 0.0  ;;  %v4068_v19 = vmax.f32 %v4066_v46, 0.0 }
 0x7a8   : > { %4069 = vxpose.xlu1.b32.start [1/2] (short) (narrow) %v4067_v48, 32 }
 0x7ac   : > { %4070 = vxpose.xlu1.b32.end [2/2] (short) (narrow) %v4068_v19, 32 }
 0x824   : > { %v4085_v34 = vpop.trf.xlu1 }
 0x825   : > { %4101 = vst.msk [vmem:[%s438_s23] sm:$0xff] %vm3581_vm8, %v4085_v34 }
 0x828   : > { %v4086_v42 = vpop.trf.xlu1 }
 0x829   : > { %4102 = vst.msk [vmem:[%s438_s23 + $0x8] sm:$0xff] %vm3581_vm8, %v4086_v42 }
 0x82c   : > { %v4087_v3 = vpop.trf.xlu1 }
 0x82d   : > { %4103 = vst.msk [vmem:[%s438_s23 + $0x10] sm:$0xff] %vm3581_vm8, %v4087_v3 }
 0x830   : > { %v4088_v60 = vpop.trf.xlu1 }
 0x831   : > { %4104 = vst.msk [vmem:[%s438_s23 + $0x18] sm:$0xff] %vm3581_vm8, %v4088_v60 }
 0x832 PF: > { %s23_s21 = sadd.s32 1, %s4490_s21  }
 0x833   : > { %p20_p4 = scmp.ge.s32.totalorder %s23_s21, 4  }
 0x835   :  { %22 = sbr.rel (!%p20_p4) target bundleno = 1 (0x1), region = 130 }

</bundles_post_ra>
